<compile_context>
chip_gen: v6e
topology: v6e:2x2x1
jax: 0.10.0
libtpu: 0.0.40
codegen_flags: <defaults>
</compile_context>

<pallas_src>
import functools

import numpy as np

import jax
import jax.numpy as jnp
from jax.experimental import pallas as pl
from jax.experimental.pallas import tpu as pltpu


# ---------------------------------------------------------------------------
# One-time parameter preparation (host side, outside jit)
# ---------------------------------------------------------------------------
def _planar_conv_mats(wt, W):
    """Per-vertical-tap matmul matrices for a valid, stride-1 conv in the
    planar (rows, W*Cin) layout.

    wt: (Cout, Cin, kh, kw) PyTorch conv weight.
    Returns G: (kh, W*Cin, Wo*Cout) with
        G[i, w*Cin + cin, wo*Cout + cout] = wt[cout, cin, i, w - wo]
    so that   sum_i  X[i:i+R, :] @ G[i]   is the conv output in planar
    (R, Wo*Cout) layout (rows outside the per-image valid window are garbage
    and are dropped later by the block pooling / selection matrices).
    """
    wt = np.asarray(wt, np.float32)
    Cout, Cin, kh, kw = wt.shape
    Wo = W - kw + 1
    G = np.zeros((kh, W * Cin, Wo * Cout), np.float32)
    for i in range(kh):
        for j in range(kw):
            blk = wt[:, :, i, j].T                       # (Cin, Cout)
            for wo in range(Wo):
                w = wo + j
                G[i, w * Cin:(w + 1) * Cin, wo * Cout:(wo + 1) * Cout] = blk
    return G


def _pool_w_mat(Wo, C):
    """Right-multiply matrix (Wo*C, (Wo//2)*C): averages adjacent W columns (x0.5)."""
    P = np.zeros((Wo * C, (Wo // 2) * C), np.float32)
    for w in range(Wo):
        for c in range(C):
            P[w * C + c, (w // 2) * C + c] = 0.5
    return P


def _block_pool_h_mat(bt, h_in, kh=5):
    """Left-multiply block-diagonal matrix (bt*hp, bt*h_in - (kh-1)) that, for
    each image in the tile, picks the valid conv output rows and averages
    adjacent pairs (x0.5).  Flat conv row of image b, row r is b*h_in + r."""
    hc = h_in - (kh - 1)          # conv output height per image
    hp = hc // 2                  # pooled height per image
    rows_in = bt * h_in - (kh - 1)
    P = np.zeros((bt * hp, rows_in), np.float32)
    for b in range(bt):
        for q in range(hp):
            P[b * hp + q, b * h_in + 2 * q] = 0.5
            P[b * hp + q, b * h_in + 2 * q + 1] = 0.5
    return P


def _block_select_mat(bt, h_in, kh=5):
    """Left-multiply matrix (bt, bt*h_in - (kh-1)) selecting row b*h_in of each
    image in the tile (the single valid conv5 output row per image)."""
    rows_in = bt * h_in - (kh - 1)
    S = np.zeros((bt, rows_in), np.float32)
    for b in range(bt):
        S[b, b * h_in] = 1.0
    return S


def prepare_params(params, H=32, W=32, block_batch=8):
    """Convert PyTorch-layout LeNet-5 params into fused-kernel operands.
    Runs once on host, outside the jitted forward (no per-call transposes)."""
    p = {k: np.asarray(v, np.float32) for k, v in params.items()}
    bt = block_batch
    out = {}
    # c1: 1 -> 6, 32x32 -> 28x28 (then pool -> 14x14)
    out["g1"] = _planar_conv_mats(p["c1_w"], W)                  # (5, 32, 168)
    out["b1"] = np.tile(p["c1_b"], W - 4).reshape(1, -1)         # (1, 168)
    out["pw1"] = _pool_w_mat(W - 4, 6)                           # (168, 84)
    out["ph1"] = _block_pool_h_mat(bt, H)                        # (bt*14, bt*32-4)
    H1, W1 = (H - 4) // 2, (W - 4) // 2                          # 14, 14
    # c3: 6 -> 16, 14x14 -> 10x10 (then pool -> 5x5)
    out["g3"] = _planar_conv_mats(p["c3_w"], W1)                 # (5, 84, 160)
    out["b3"] = np.tile(p["c3_b"], W1 - 4).reshape(1, -1)        # (1, 160)
    out["pw3"] = _pool_w_mat(W1 - 4, 16)                         # (160, 80)
    out["ph3"] = _block_pool_h_mat(bt, H1)                       # (bt*5, bt*14-4)
    H3, W3 = (H1 - 4) // 2, (W1 - 4) // 2                        # 5, 5
    # c5: 16 -> 120, 5x5 -> 1x1
    out["g5"] = _planar_conv_mats(p["c5_w"], W3)                 # (5, 80, 120)
    out["b5"] = p["c5_b"].reshape(1, -1)                         # (1, 120)
    out["s5"] = _block_select_mat(bt, H3)                        # (bt, bt*5-4)
    # fully connected (stored already transposed, biases as (1, N))
    out["fc_w"] = p["fc_w"].T.copy()                             # (120, 84)
    out["fc_b"] = p["fc_b"].reshape(1, -1)                       # (1, 84)
    out["out_w"] = p["out_w"].T.copy()                           # (84, 10)
    out["out_b"] = p["out_b"].reshape(1, -1)                     # (1, 10)
    return {k: jnp.asarray(v) for k, v in out.items()}


# ---------------------------------------------------------------------------
# The fused Pallas kernel: one grid step == B_TILE images' full forward pass
# ---------------------------------------------------------------------------
def _lenet5_kernel(x_ref, g1_ref, b1_ref, pw1_ref, ph1_ref,
                   g3_ref, b3_ref, pw3_ref, ph3_ref,
                   g5_ref, b5_ref, s5_ref, fcw_ref, fcb_ref, ow_ref, ob_ref,
                   o_ref):
    f32 = jnp.float32

    def conv_tanh(xp, g_ref, b_ref):
        # xp: (R_in, W*Cin) batch-flattened planar activation.
        # g_ref: (kh, W*Cin, Wo*Cout).  kh == 5, loop fully unrolled.
        kh = g_ref.shape[0]
        r = xp.shape[0] - kh + 1
        acc = jnp.dot(xp[0:r, :], g_ref[0], preferred_element_type=f32)
        for i in range(1, kh):
            acc = acc + jnp.dot(xp[i:i + r, :], g_ref[i],
                                preferred_element_type=f32)
        return jnp.tanh(acc + b_ref[...])

    def avg_pool(h, pw_ref, ph_ref):
        # 2x2 average pool == two matmuls with constant 0.5 matrices; the
        # H-pool matrix is block-diagonal and also drops invalid conv rows.
        hw = jnp.dot(h, pw_ref[...], preferred_element_type=f32)
        return jnp.dot(ph_ref[...], hw, preferred_element_type=f32)

    h = x_ref[...]                                  # (Bt*32, 32)  planar, Cin=1
    h = conv_tanh(h, g1_ref, b1_ref)                # (Bt*32-4, 168)
    h = avg_pool(h, pw1_ref, ph1_ref)               # (Bt*14, 84)
    h = conv_tanh(h, g3_ref, b3_ref)                # (Bt*14-4, 160)
    h = avg_pool(h, pw3_ref, ph3_ref)               # (Bt*5, 80)
    h = conv_tanh(h, g5_ref, b5_ref)                # (Bt*5-4, 120)
    h = jnp.dot(s5_ref[...], h, preferred_element_type=f32)       # (Bt, 120)
    h = jnp.tanh(jnp.dot(h, fcw_ref[...], preferred_element_type=f32)
                 + fcb_ref[...])                    # (Bt, 84)
    logits = jnp.dot(h, ow_ref[...], preferred_element_type=f32) + ob_ref[...]
    o_ref[...] = logits.astype(o_ref.dtype)         # (Bt, 10)


def _const_index(b, *, ndim):
    return (0,) * ndim


def lenet5_forward(x_nchw, prep):
    """x_nchw: (B, 1, 32, 32) float32 (PyTorch NCHW). Returns (B, 10) logits."""
    B, Cin, H, W = x_nchw.shape
    Bt = prep["s5"].shape[0]                        # batch tile baked into prep
    Bpad = ((B + Bt - 1) // Bt) * Bt

    xp = x_nchw.reshape(B, H, W * Cin)              # Cin == 1 -> planar image
    if Bpad != B:
        xp = jnp.pad(xp, ((0, Bpad - B), (0, 0), (0, 0)))
    x_flat = xp.reshape(Bpad * H, W * Cin)          # batch-flattened planar

    order = ("g1", "b1", "pw1", "ph1", "g3", "b3", "pw3", "ph3",
             "g5", "b5", "s5", "fc_w", "fc_b", "out_w", "out_b")
    weights = tuple(prep[k] for k in order)

    in_specs = [pl.BlockSpec((Bt * H, W * Cin), lambda b: (b, 0))]
    for wgt in weights:
        in_specs.append(pl.BlockSpec(
            wgt.shape, functools.partial(_const_index, ndim=wgt.ndim)))

    out = pl.pallas_call(
        _lenet5_kernel,
        out_shape=jax.ShapeDtypeStruct((Bpad, 10), jnp.float32),
        grid=(Bpad // Bt,),
        in_specs=in_specs,
        out_specs=pl.BlockSpec((Bt, 10), lambda b: (b, 0)),
        compiler_params=pltpu.CompilerParams(
            dimension_semantics=("parallel",)),     # shard batch tiles over TCs
    )(x_flat, *weights)
    return out[:B]


# ---------------------------------------------------------------------------
# Deterministic PyTorch-style init + pure-JAX reference (for self-check)
# ---------------------------------------------------------------------------
def _uniform(key, shape, fan_in):
    bound = 1.0 / jnp.sqrt(jnp.float32(fan_in))
    return jax.random.uniform(key, shape, jnp.float32, -bound, bound)


def init_params(key):
    ks = jax.random.split(key, 10)
    return {
        "c1_w": _uniform(ks[0], (6, 1, 5, 5), 1 * 5 * 5),
        "c1_b": _uniform(ks[1], (6,), 1 * 5 * 5),
        "c3_w": _uniform(ks[2], (16, 6, 5, 5), 6 * 5 * 5),
        "c3_b": _uniform(ks[3], (16,), 6 * 5 * 5),
        "c5_w": _uniform(ks[4], (120, 16, 5, 5), 16 * 5 * 5),
        "c5_b": _uniform(ks[5], (120,), 16 * 5 * 5),
        "fc_w": _uniform(ks[6], (84, 120), 120),
        "fc_b": _uniform(ks[7], (84,), 120),
        "out_w": _uniform(ks[8], (10, 84), 84),
        "out_b": _uniform(ks[9], (10,), 84),
    }


def _reference_forward(x, params):
    def conv_tanh(x, w, b):
        y = jax.lax.conv_general_dilated(
            x, w, window_strides=(1, 1), padding="VALID",
            dimension_numbers=("NCHW", "OIHW", "NCHW"))
        return jnp.tanh(y + b[None, :, None, None])

    def pool(x):
        s = jax.lax.reduce_window(x, 0.0, jax.lax.add,
                                  (1, 1, 2, 2), (1, 1, 2, 2), "VALID")
        return s * 0.25

    y = pool(conv_tanh(x, params["c1_w"], params["c1_b"]))
    y = pool(conv_tanh(y, params["c3_w"], params["c3_b"]))
    y = conv_tanh(y, params["c5_w"], params["c5_b"])
    y = y.reshape(y.shape[0], -1)
    y = jnp.tanh(y @ params["fc_w"].T + params["fc_b"])
    return y @ params["out_w"].T + params["out_b"]


if __name__ == "__main__":
    root = jax.random.PRNGKey(0)
    k_params, k_x = jax.random.split(root)
    params = init_params(k_params)
    prep = prepare_params(params, block_batch=8)    # one-time host-side prep

    batch = 16                                      # LeNet-5 needs 32x32 input
    x = jax.random.normal(k_x, (batch, 1, 32, 32), jnp.float32)

    fwd = jax.jit(lenet5_forward)
    logits = fwd(x, prep)
    jax.block_until_ready(logits)

    assert logits.shape == (batch, 10), logits.shape
    assert logits.dtype == jnp.float32

    ref = _reference_forward(x, params)
    max_err = float(jnp.max(jnp.abs(logits - ref)))
    assert jnp.allclose(logits, ref, atol=1e-3, rtol=1e-3), max_err

    print("KERNEL_OK")
</pallas_src>

<mosaic_0001>
module attributes {stable_mosaic.version = 11 : i64} {
  func.func @_lenet5_kernel(%arg0: i32, %arg1: memref<256x32xf32, #tpu.memory_space<vmem>>, %arg2: memref<5x32x168xf32, #tpu.memory_space<vmem>>, %arg3: memref<1x168xf32, #tpu.memory_space<vmem>>, %arg4: memref<168x84xf32, #tpu.memory_space<vmem>>, %arg5: memref<112x252xf32, #tpu.memory_space<vmem>>, %arg6: memref<5x84x160xf32, #tpu.memory_space<vmem>>, %arg7: memref<1x160xf32, #tpu.memory_space<vmem>>, %arg8: memref<160x80xf32, #tpu.memory_space<vmem>>, %arg9: memref<40x108xf32, #tpu.memory_space<vmem>>, %arg10: memref<5x80x120xf32, #tpu.memory_space<vmem>>, %arg11: memref<1x120xf32, #tpu.memory_space<vmem>>, %arg12: memref<8x36xf32, #tpu.memory_space<vmem>>, %arg13: memref<120x84xf32, #tpu.memory_space<vmem>>, %arg14: memref<1x84xf32, #tpu.memory_space<vmem>>, %arg15: memref<84x10xf32, #tpu.memory_space<vmem>>, %arg16: memref<1x10xf32, #tpu.memory_space<vmem>>, %arg17: memref<8x10xf32, #tpu.memory_space<vmem>>) attributes {dimension_semantics = [#tpu.dimension_semantics<parallel>], iteration_bounds = array<i64: 2>, scalar_prefetch = 0 : i64, scratch_operands = 0 : i64, tpu.core_type = #tpu.core_type<tc>, window_params = [{transform_indices = @transform_0, window_bounds = array<i64: 256, 32>}, {pipeline_mode = #tpu.pipeline_mode<synchronous>, transform_indices = @transform_1, window_bounds = array<i64: 5, 32, 168>}, {pipeline_mode = #tpu.pipeline_mode<synchronous>, transform_indices = @transform_2, window_bounds = array<i64: 1, 168>}, {pipeline_mode = #tpu.pipeline_mode<synchronous>, transform_indices = @transform_3, window_bounds = array<i64: 168, 84>}, {pipeline_mode = #tpu.pipeline_mode<synchronous>, transform_indices = @transform_4, window_bounds = array<i64: 112, 252>}, {pipeline_mode = #tpu.pipeline_mode<synchronous>, transform_indices = @transform_5, window_bounds = array<i64: 5, 84, 160>}, {pipeline_mode = #tpu.pipeline_mode<synchronous>, transform_indices = @transform_6, window_bounds = array<i64: 1, 160>}, {pipeline_mode = #tpu.pipeline_mode<synchronous>, transform_indices = @transform_7, window_bounds = array<i64: 160, 80>}, {pipeline_mode = #tpu.pipeline_mode<synchronous>, transform_indices = @transform_8, window_bounds = array<i64: 40, 108>}, {pipeline_mode = #tpu.pipeline_mode<synchronous>, transform_indices = @transform_9, window_bounds = array<i64: 5, 80, 120>}, {pipeline_mode = #tpu.pipeline_mode<synchronous>, transform_indices = @transform_10, window_bounds = array<i64: 1, 120>}, {pipeline_mode = #tpu.pipeline_mode<synchronous>, transform_indices = @transform_11, window_bounds = array<i64: 8, 36>}, {pipeline_mode = #tpu.pipeline_mode<synchronous>, transform_indices = @transform_12, window_bounds = array<i64: 120, 84>}, {pipeline_mode = #tpu.pipeline_mode<synchronous>, transform_indices = @transform_13, window_bounds = array<i64: 1, 84>}, {pipeline_mode = #tpu.pipeline_mode<synchronous>, transform_indices = @transform_14, window_bounds = array<i64: 84, 10>}, {pipeline_mode = #tpu.pipeline_mode<synchronous>, transform_indices = @transform_15, window_bounds = array<i64: 1, 10>}, {transform_indices = @transform_16, window_bounds = array<i64: 8, 10>}]} {
    %c0 = arith.constant 0 : index
    %c0_0 = arith.constant 0 : index
    %0 = vector.load %arg1[%c0, %c0_0] : memref<256x32xf32, #tpu.memory_space<vmem>>, vector<256x32xf32>
    %1 = vector.extract_strided_slice %0 {offsets = [0, 0], sizes = [252, 32], strides = [1, 1]} : vector<256x32xf32> to vector<252x32xf32>
    %c0_1 = arith.constant 0 : index
    %c0_2 = arith.constant 0 : index
    %c0_3 = arith.constant 0 : index
    %2 = vector.load %arg2[%c0_1, %c0_2, %c0_3] : memref<5x32x168xf32, #tpu.memory_space<vmem>>, vector<1x32x168xf32>
    %3 = vector.shape_cast %2 : vector<1x32x168xf32> to vector<32x168xf32>
    %cst = arith.constant dense<0.000000e+00> : vector<252x168xf32>
    %4 = tpu.matmul %1, %3, %cst {dimension_numbers = #tpu.dot_dimension_numbers<[1], [0], [0], [1], [0, 0, 1, 1], [], []>} : vector<252x32xf32>, vector<32x168xf32>, vector<252x168xf32> -> vector<252x168xf32>
    %5 = vector.extract_strided_slice %0 {offsets = [1, 0], sizes = [252, 32], strides = [1, 1]} : vector<256x32xf32> to vector<252x32xf32>
    %c1 = arith.constant 1 : index
    %c0_4 = arith.constant 0 : index
    %c0_5 = arith.constant 0 : index
    %6 = vector.load %arg2[%c1, %c0_4, %c0_5] : memref<5x32x168xf32, #tpu.memory_space<vmem>>, vector<1x32x168xf32>
    %7 = vector.shape_cast %6 : vector<1x32x168xf32> to vector<32x168xf32>
    %cst_6 = arith.constant dense<0.000000e+00> : vector<252x168xf32>
    %8 = tpu.matmul %5, %7, %cst_6 {dimension_numbers = #tpu.dot_dimension_numbers<[1], [0], [0], [1], [0, 0, 1, 1], [], []>} : vector<252x32xf32>, vector<32x168xf32>, vector<252x168xf32> -> vector<252x168xf32>
    %9 = arith.addf %4, %8 : vector<252x168xf32>
    %10 = vector.extract_strided_slice %0 {offsets = [2, 0], sizes = [252, 32], strides = [1, 1]} : vector<256x32xf32> to vector<252x32xf32>
    %c2 = arith.constant 2 : index
    %c0_7 = arith.constant 0 : index
    %c0_8 = arith.constant 0 : index
    %11 = vector.load %arg2[%c2, %c0_7, %c0_8] : memref<5x32x168xf32, #tpu.memory_space<vmem>>, vector<1x32x168xf32>
    %12 = vector.shape_cast %11 : vector<1x32x168xf32> to vector<32x168xf32>
    %cst_9 = arith.constant dense<0.000000e+00> : vector<252x168xf32>
    %13 = tpu.matmul %10, %12, %cst_9 {dimension_numbers = #tpu.dot_dimension_numbers<[1], [0], [0], [1], [0, 0, 1, 1], [], []>} : vector<252x32xf32>, vector<32x168xf32>, vector<252x168xf32> -> vector<252x168xf32>
    %14 = arith.addf %9, %13 : vector<252x168xf32>
    %15 = vector.extract_strided_slice %0 {offsets = [3, 0], sizes = [252, 32], strides = [1, 1]} : vector<256x32xf32> to vector<252x32xf32>
    %c3 = arith.constant 3 : index
    %c0_10 = arith.constant 0 : index
    %c0_11 = arith.constant 0 : index
    %16 = vector.load %arg2[%c3, %c0_10, %c0_11] : memref<5x32x168xf32, #tpu.memory_space<vmem>>, vector<1x32x168xf32>
    %17 = vector.shape_cast %16 : vector<1x32x168xf32> to vector<32x168xf32>
    %cst_12 = arith.constant dense<0.000000e+00> : vector<252x168xf32>
    %18 = tpu.matmul %15, %17, %cst_12 {dimension_numbers = #tpu.dot_dimension_numbers<[1], [0], [0], [1], [0, 0, 1, 1], [], []>} : vector<252x32xf32>, vector<32x168xf32>, vector<252x168xf32> -> vector<252x168xf32>
    %19 = arith.addf %14, %18 : vector<252x168xf32>
    %20 = vector.extract_strided_slice %0 {offsets = [4, 0], sizes = [252, 32], strides = [1, 1]} : vector<256x32xf32> to vector<252x32xf32>
    %c4 = arith.constant 4 : index
    %c0_13 = arith.constant 0 : index
    %c0_14 = arith.constant 0 : index
    %21 = vector.load %arg2[%c4, %c0_13, %c0_14] : memref<5x32x168xf32, #tpu.memory_space<vmem>>, vector<1x32x168xf32>
    %22 = vector.shape_cast %21 : vector<1x32x168xf32> to vector<32x168xf32>
    %cst_15 = arith.constant dense<0.000000e+00> : vector<252x168xf32>
    %23 = tpu.matmul %20, %22, %cst_15 {dimension_numbers = #tpu.dot_dimension_numbers<[1], [0], [0], [1], [0, 0, 1, 1], [], []>} : vector<252x32xf32>, vector<32x168xf32>, vector<252x168xf32> -> vector<252x168xf32>
    %24 = arith.addf %19, %23 : vector<252x168xf32>
    %c0_16 = arith.constant 0 : index
    %c0_17 = arith.constant 0 : index
    %25 = vector.load %arg3[%c0_16, %c0_17] : memref<1x168xf32, #tpu.memory_space<vmem>>, vector<1x168xf32>
    %26 = vector.broadcast %25 : vector<1x168xf32> to vector<252x168xf32>
    %27 = arith.addf %24, %26 : vector<252x168xf32>
    %28 = math.tanh %27 : vector<252x168xf32>
    %c0_18 = arith.constant 0 : index
    %c0_19 = arith.constant 0 : index
    %29 = vector.load %arg4[%c0_18, %c0_19] : memref<168x84xf32, #tpu.memory_space<vmem>>, vector<168x84xf32>
    %cst_20 = arith.constant dense<0.000000e+00> : vector<252x84xf32>
    %30 = tpu.matmul %28, %29, %cst_20 {dimension_numbers = #tpu.dot_dimension_numbers<[1], [0], [0], [1], [0, 0, 1, 1], [], []>} : vector<252x168xf32>, vector<168x84xf32>, vector<252x84xf32> -> vector<252x84xf32>
    %c0_21 = arith.constant 0 : index
    %c0_22 = arith.constant 0 : index
    %31 = vector.load %arg5[%c0_21, %c0_22] : memref<112x252xf32, #tpu.memory_space<vmem>>, vector<112x252xf32>
    %cst_23 = arith.constant dense<0.000000e+00> : vector<112x84xf32>
    %32 = tpu.matmul %31, %30, %cst_23 {dimension_numbers = #tpu.dot_dimension_numbers<[1], [0], [0], [1], [0, 0, 1, 1], [], []>} : vector<112x252xf32>, vector<252x84xf32>, vector<112x84xf32> -> vector<112x84xf32>
    %33 = vector.extract_strided_slice %32 {offsets = [0, 0], sizes = [108, 84], strides = [1, 1]} : vector<112x84xf32> to vector<108x84xf32>
    %c0_24 = arith.constant 0 : index
    %c0_25 = arith.constant 0 : index
    %c0_26 = arith.constant 0 : index
    %34 = vector.load %arg6[%c0_24, %c0_25, %c0_26] : memref<5x84x160xf32, #tpu.memory_space<vmem>>, vector<1x84x160xf32>
    %35 = vector.shape_cast %34 : vector<1x84x160xf32> to vector<84x160xf32>
    %cst_27 = arith.constant dense<0.000000e+00> : vector<108x160xf32>
    %36 = tpu.matmul %33, %35, %cst_27 {dimension_numbers = #tpu.dot_dimension_numbers<[1], [0], [0], [1], [0, 0, 1, 1], [], []>} : vector<108x84xf32>, vector<84x160xf32>, vector<108x160xf32> -> vector<108x160xf32>
    %37 = vector.extract_strided_slice %32 {offsets = [1, 0], sizes = [108, 84], strides = [1, 1]} : vector<112x84xf32> to vector<108x84xf32>
    %c1_28 = arith.constant 1 : index
    %c0_29 = arith.constant 0 : index
    %c0_30 = arith.constant 0 : index
    %38 = vector.load %arg6[%c1_28, %c0_29, %c0_30] : memref<5x84x160xf32, #tpu.memory_space<vmem>>, vector<1x84x160xf32>
    %39 = vector.shape_cast %38 : vector<1x84x160xf32> to vector<84x160xf32>
    %cst_31 = arith.constant dense<0.000000e+00> : vector<108x160xf32>
    %40 = tpu.matmul %37, %39, %cst_31 {dimension_numbers = #tpu.dot_dimension_numbers<[1], [0], [0], [1], [0, 0, 1, 1], [], []>} : vector<108x84xf32>, vector<84x160xf32>, vector<108x160xf32> -> vector<108x160xf32>
    %41 = arith.addf %36, %40 : vector<108x160xf32>
    %42 = vector.extract_strided_slice %32 {offsets = [2, 0], sizes = [108, 84], strides = [1, 1]} : vector<112x84xf32> to vector<108x84xf32>
    %c2_32 = arith.constant 2 : index
    %c0_33 = arith.constant 0 : index
    %c0_34 = arith.constant 0 : index
    %43 = vector.load %arg6[%c2_32, %c0_33, %c0_34] : memref<5x84x160xf32, #tpu.memory_space<vmem>>, vector<1x84x160xf32>
    %44 = vector.shape_cast %43 : vector<1x84x160xf32> to vector<84x160xf32>
    %cst_35 = arith.constant dense<0.000000e+00> : vector<108x160xf32>
    %45 = tpu.matmul %42, %44, %cst_35 {dimension_numbers = #tpu.dot_dimension_numbers<[1], [0], [0], [1], [0, 0, 1, 1], [], []>} : vector<108x84xf32>, vector<84x160xf32>, vector<108x160xf32> -> vector<108x160xf32>
    %46 = arith.addf %41, %45 : vector<108x160xf32>
    %47 = vector.extract_strided_slice %32 {offsets = [3, 0], sizes = [108, 84], strides = [1, 1]} : vector<112x84xf32> to vector<108x84xf32>
    %c3_36 = arith.constant 3 : index
    %c0_37 = arith.constant 0 : index
    %c0_38 = arith.constant 0 : index
    %48 = vector.load %arg6[%c3_36, %c0_37, %c0_38] : memref<5x84x160xf32, #tpu.memory_space<vmem>>, vector<1x84x160xf32>
    %49 = vector.shape_cast %48 : vector<1x84x160xf32> to vector<84x160xf32>
    %cst_39 = arith.constant dense<0.000000e+00> : vector<108x160xf32>
    %50 = tpu.matmul %47, %49, %cst_39 {dimension_numbers = #tpu.dot_dimension_numbers<[1], [0], [0], [1], [0, 0, 1, 1], [], []>} : vector<108x84xf32>, vector<84x160xf32>, vector<108x160xf32> -> vector<108x160xf32>
    %51 = arith.addf %46, %50 : vector<108x160xf32>
    %52 = vector.extract_strided_slice %32 {offsets = [4, 0], sizes = [108, 84], strides = [1, 1]} : vector<112x84xf32> to vector<108x84xf32>
    %c4_40 = arith.constant 4 : index
    %c0_41 = arith.constant 0 : index
    %c0_42 = arith.constant 0 : index
    %53 = vector.load %arg6[%c4_40, %c0_41, %c0_42] : memref<5x84x160xf32, #tpu.memory_space<vmem>>, vector<1x84x160xf32>
    %54 = vector.shape_cast %53 : vector<1x84x160xf32> to vector<84x160xf32>
    %cst_43 = arith.constant dense<0.000000e+00> : vector<108x160xf32>
    %55 = tpu.matmul %52, %54, %cst_43 {dimension_numbers = #tpu.dot_dimension_numbers<[1], [0], [0], [1], [0, 0, 1, 1], [], []>} : vector<108x84xf32>, vector<84x160xf32>, vector<108x160xf32> -> vector<108x160xf32>
    %56 = arith.addf %51, %55 : vector<108x160xf32>
    %c0_44 = arith.constant 0 : index
    %c0_45 = arith.constant 0 : index
    %57 = vector.load %arg7[%c0_44, %c0_45] : memref<1x160xf32, #tpu.memory_space<vmem>>, vector<1x160xf32>
    %58 = vector.broadcast %57 : vector<1x160xf32> to vector<108x160xf32>
    %59 = arith.addf %56, %58 : vector<108x160xf32>
    %60 = math.tanh %59 : vector<108x160xf32>
    %c0_46 = arith.constant 0 : index
    %c0_47 = arith.constant 0 : index
    %61 = vector.load %arg8[%c0_46, %c0_47] : memref<160x80xf32, #tpu.memory_space<vmem>>, vector<160x80xf32>
    %cst_48 = arith.constant dense<0.000000e+00> : vector<108x80xf32>
    %62 = tpu.matmul %60, %61, %cst_48 {dimension_numbers = #tpu.dot_dimension_numbers<[1], [0], [0], [1], [0, 0, 1, 1], [], []>} : vector<108x160xf32>, vector<160x80xf32>, vector<108x80xf32> -> vector<108x80xf32>
    %c0_49 = arith.constant 0 : index
    %c0_50 = arith.constant 0 : index
    %63 = vector.load %arg9[%c0_49, %c0_50] : memref<40x108xf32, #tpu.memory_space<vmem>>, vector<40x108xf32>
    %cst_51 = arith.constant dense<0.000000e+00> : vector<40x80xf32>
    %64 = tpu.matmul %63, %62, %cst_51 {dimension_numbers = #tpu.dot_dimension_numbers<[1], [0], [0], [1], [0, 0, 1, 1], [], []>} : vector<40x108xf32>, vector<108x80xf32>, vector<40x80xf32> -> vector<40x80xf32>
    %65 = vector.extract_strided_slice %64 {offsets = [0, 0], sizes = [36, 80], strides = [1, 1]} : vector<40x80xf32> to vector<36x80xf32>
    %c0_52 = arith.constant 0 : index
    %c0_53 = arith.constant 0 : index
    %c0_54 = arith.constant 0 : index
    %66 = vector.load %arg10[%c0_52, %c0_53, %c0_54] : memref<5x80x120xf32, #tpu.memory_space<vmem>>, vector<1x80x120xf32>
    %67 = vector.shape_cast %66 : vector<1x80x120xf32> to vector<80x120xf32>
    %cst_55 = arith.constant dense<0.000000e+00> : vector<36x120xf32>
    %68 = tpu.matmul %65, %67, %cst_55 {dimension_numbers = #tpu.dot_dimension_numbers<[1], [0], [0], [1], [0, 0, 1, 1], [], []>} : vector<36x80xf32>, vector<80x120xf32>, vector<36x120xf32> -> vector<36x120xf32>
    %69 = vector.extract_strided_slice %64 {offsets = [1, 0], sizes = [36, 80], strides = [1, 1]} : vector<40x80xf32> to vector<36x80xf32>
    %c1_56 = arith.constant 1 : index
    %c0_57 = arith.constant 0 : index
    %c0_58 = arith.constant 0 : index
    %70 = vector.load %arg10[%c1_56, %c0_57, %c0_58] : memref<5x80x120xf32, #tpu.memory_space<vmem>>, vector<1x80x120xf32>
    %71 = vector.shape_cast %70 : vector<1x80x120xf32> to vector<80x120xf32>
    %cst_59 = arith.constant dense<0.000000e+00> : vector<36x120xf32>
    %72 = tpu.matmul %69, %71, %cst_59 {dimension_numbers = #tpu.dot_dimension_numbers<[1], [0], [0], [1], [0, 0, 1, 1], [], []>} : vector<36x80xf32>, vector<80x120xf32>, vector<36x120xf32> -> vector<36x120xf32>
    %73 = arith.addf %68, %72 : vector<36x120xf32>
    %74 = vector.extract_strided_slice %64 {offsets = [2, 0], sizes = [36, 80], strides = [1, 1]} : vector<40x80xf32> to vector<36x80xf32>
    %c2_60 = arith.constant 2 : index
    %c0_61 = arith.constant 0 : index
    %c0_62 = arith.constant 0 : index
    %75 = vector.load %arg10[%c2_60, %c0_61, %c0_62] : memref<5x80x120xf32, #tpu.memory_space<vmem>>, vector<1x80x120xf32>
    %76 = vector.shape_cast %75 : vector<1x80x120xf32> to vector<80x120xf32>
    %cst_63 = arith.constant dense<0.000000e+00> : vector<36x120xf32>
    %77 = tpu.matmul %74, %76, %cst_63 {dimension_numbers = #tpu.dot_dimension_numbers<[1], [0], [0], [1], [0, 0, 1, 1], [], []>} : vector<36x80xf32>, vector<80x120xf32>, vector<36x120xf32> -> vector<36x120xf32>
    %78 = arith.addf %73, %77 : vector<36x120xf32>
    %79 = vector.extract_strided_slice %64 {offsets = [3, 0], sizes = [36, 80], strides = [1, 1]} : vector<40x80xf32> to vector<36x80xf32>
    %c3_64 = arith.constant 3 : index
    %c0_65 = arith.constant 0 : index
    %c0_66 = arith.constant 0 : index
    %80 = vector.load %arg10[%c3_64, %c0_65, %c0_66] : memref<5x80x120xf32, #tpu.memory_space<vmem>>, vector<1x80x120xf32>
    %81 = vector.shape_cast %80 : vector<1x80x120xf32> to vector<80x120xf32>
    %cst_67 = arith.constant dense<0.000000e+00> : vector<36x120xf32>
    %82 = tpu.matmul %79, %81, %cst_67 {dimension_numbers = #tpu.dot_dimension_numbers<[1], [0], [0], [1], [0, 0, 1, 1], [], []>} : vector<36x80xf32>, vector<80x120xf32>, vector<36x120xf32> -> vector<36x120xf32>
    %83 = arith.addf %78, %82 : vector<36x120xf32>
    %84 = vector.extract_strided_slice %64 {offsets = [4, 0], sizes = [36, 80], strides = [1, 1]} : vector<40x80xf32> to vector<36x80xf32>
    %c4_68 = arith.constant 4 : index
    %c0_69 = arith.constant 0 : index
    %c0_70 = arith.constant 0 : index
    %85 = vector.load %arg10[%c4_68, %c0_69, %c0_70] : memref<5x80x120xf32, #tpu.memory_space<vmem>>, vector<1x80x120xf32>
    %86 = vector.shape_cast %85 : vector<1x80x120xf32> to vector<80x120xf32>
    %cst_71 = arith.constant dense<0.000000e+00> : vector<36x120xf32>
    %87 = tpu.matmul %84, %86, %cst_71 {dimension_numbers = #tpu.dot_dimension_numbers<[1], [0], [0], [1], [0, 0, 1, 1], [], []>} : vector<36x80xf32>, vector<80x120xf32>, vector<36x120xf32> -> vector<36x120xf32>
    %88 = arith.addf %83, %87 : vector<36x120xf32>
    %c0_72 = arith.constant 0 : index
    %c0_73 = arith.constant 0 : index
    %89 = vector.load %arg11[%c0_72, %c0_73] : memref<1x120xf32, #tpu.memory_space<vmem>>, vector<1x120xf32>
    %90 = vector.broadcast %89 : vector<1x120xf32> to vector<36x120xf32>
    %91 = arith.addf %88, %90 : vector<36x120xf32>
    %92 = math.tanh %91 : vector<36x120xf32>
    %c0_74 = arith.constant 0 : index
    %c0_75 = arith.constant 0 : index
    %93 = vector.load %arg12[%c0_74, %c0_75] : memref<8x36xf32, #tpu.memory_space<vmem>>, vector<8x36xf32>
    %cst_76 = arith.constant dense<0.000000e+00> : vector<8x120xf32>
    %94 = tpu.matmul %93, %92, %cst_76 {dimension_numbers = #tpu.dot_dimension_numbers<[1], [0], [0], [1], [0, 0, 1, 1], [], []>} : vector<8x36xf32>, vector<36x120xf32>, vector<8x120xf32> -> vector<8x120xf32>
    %c0_77 = arith.constant 0 : index
    %c0_78 = arith.constant 0 : index
    %95 = vector.load %arg13[%c0_77, %c0_78] : memref<120x84xf32, #tpu.memory_space<vmem>>, vector<120x84xf32>
    %cst_79 = arith.constant dense<0.000000e+00> : vector<8x84xf32>
    %96 = tpu.matmul %94, %95, %cst_79 {dimension_numbers = #tpu.dot_dimension_numbers<[1], [0], [0], [1], [0, 0, 1, 1], [], []>} : vector<8x120xf32>, vector<120x84xf32>, vector<8x84xf32> -> vector<8x84xf32>
    %c0_80 = arith.constant 0 : index
    %c0_81 = arith.constant 0 : index
    %97 = vector.load %arg14[%c0_80, %c0_81] : memref<1x84xf32, #tpu.memory_space<vmem>>, vector<1x84xf32>
    %98 = vector.broadcast %97 : vector<1x84xf32> to vector<8x84xf32>
    %99 = arith.addf %96, %98 : vector<8x84xf32>
    %100 = math.tanh %99 : vector<8x84xf32>
    %c0_82 = arith.constant 0 : index
    %c0_83 = arith.constant 0 : index
    %101 = vector.load %arg15[%c0_82, %c0_83] : memref<84x10xf32, #tpu.memory_space<vmem>>, vector<84x10xf32>
    %cst_84 = arith.constant dense<0.000000e+00> : vector<8x10xf32>
    %102 = tpu.matmul %100, %101, %cst_84 {dimension_numbers = #tpu.dot_dimension_numbers<[1], [0], [0], [1], [0, 0, 1, 1], [], []>} : vector<8x84xf32>, vector<84x10xf32>, vector<8x10xf32> -> vector<8x10xf32>
    %c0_85 = arith.constant 0 : index
    %c0_86 = arith.constant 0 : index
    %103 = vector.load %arg16[%c0_85, %c0_86] : memref<1x10xf32, #tpu.memory_space<vmem>>, vector<1x10xf32>
    %104 = vector.broadcast %103 : vector<1x10xf32> to vector<8x10xf32>
    %105 = arith.addf %102, %104 : vector<8x10xf32>
    %c0_87 = arith.constant 0 : index
    %c0_88 = arith.constant 0 : index
    %106 = vector.load %arg17[%c0_87, %c0_88] : memref<8x10xf32, #tpu.memory_space<vmem>>, vector<8x10xf32>
    tpu.vector_store %arg17[%c0_87, %c0_88], %105 {strides = array<i32>} : memref<8x10xf32, #tpu.memory_space<vmem>>, vector<8x10xf32>,
    return
  }
  func.func @transform_0(%arg0: i32) -> (i32, i32) {
    %c0_i32 = arith.constant 0 : i32
    %c0_i32_0 = arith.constant 0 : i32
    return %arg0, %c0_i32 : i32, i32
  }
  func.func @transform_1(%arg0: i32) -> (i32, i32, i32) {
    %c0_i32 = arith.constant 0 : i32
    %c0_i32_0 = arith.constant 0 : i32
    %c0_i32_1 = arith.constant 0 : i32
    %c0_i32_2 = arith.constant 0 : i32
    return %c0_i32, %c0_i32_0, %c0_i32_1 : i32, i32, i32
  }
  func.func @transform_2(%arg0: i32) -> (i32, i32) {
    %c0_i32 = arith.constant 0 : i32
    %c0_i32_0 = arith.constant 0 : i32
    %c0_i32_1 = arith.constant 0 : i32
    return %c0_i32, %c0_i32_0 : i32, i32
  }
  func.func @transform_3(%arg0: i32) -> (i32, i32) {
    %c0_i32 = arith.constant 0 : i32
    %c0_i32_0 = arith.constant 0 : i32
    %c0_i32_1 = arith.constant 0 : i32
    return %c0_i32, %c0_i32_0 : i32, i32
  }
  func.func @transform_4(%arg0: i32) -> (i32, i32) {
    %c0_i32 = arith.constant 0 : i32
    %c0_i32_0 = arith.constant 0 : i32
    %c0_i32_1 = arith.constant 0 : i32
    return %c0_i32, %c0_i32_0 : i32, i32
  }
  func.func @transform_5(%arg0: i32) -> (i32, i32, i32) {
    %c0_i32 = arith.constant 0 : i32
    %c0_i32_0 = arith.constant 0 : i32
    %c0_i32_1 = arith.constant 0 : i32
    %c0_i32_2 = arith.constant 0 : i32
    return %c0_i32, %c0_i32_0, %c0_i32_1 : i32, i32, i32
  }
  func.func @transform_6(%arg0: i32) -> (i32, i32) {
    %c0_i32 = arith.constant 0 : i32
    %c0_i32_0 = arith.constant 0 : i32
    %c0_i32_1 = arith.constant 0 : i32
    return %c0_i32, %c0_i32_0 : i32, i32
  }
  func.func @transform_7(%arg0: i32) -> (i32, i32) {
    %c0_i32 = arith.constant 0 : i32
    %c0_i32_0 = arith.constant 0 : i32
    %c0_i32_1 = arith.constant 0 : i32
    return %c0_i32, %c0_i32_0 : i32, i32
  }
  func.func @transform_8(%arg0: i32) -> (i32, i32) {
    %c0_i32 = arith.constant 0 : i32
    %c0_i32_0 = arith.constant 0 : i32
    %c0_i32_1 = arith.constant 0 : i32
    return %c0_i32, %c0_i32_0 : i32, i32
  }
  func.func @transform_9(%arg0: i32) -> (i32, i32, i32) {
    %c0_i32 = arith.constant 0 : i32
    %c0_i32_0 = arith.constant 0 : i32
    %c0_i32_1 = arith.constant 0 : i32
    %c0_i32_2 = arith.constant 0 : i32
    return %c0_i32, %c0_i32_0, %c0_i32_1 : i32, i32, i32
  }
  func.func @transform_10(%arg0: i32) -> (i32, i32) {
    %c0_i32 = arith.constant 0 : i32
    %c0_i32_0 = arith.constant 0 : i32
    %c0_i32_1 = arith.constant 0 : i32
    return %c0_i32, %c0_i32_0 : i32, i32
  }
  func.func @transform_11(%arg0: i32) -> (i32, i32) {
    %c0_i32 = arith.constant 0 : i32
    %c0_i32_0 = arith.constant 0 : i32
    %c0_i32_1 = arith.constant 0 : i32
    return %c0_i32, %c0_i32_0 : i32, i32
  }
  func.func @transform_12(%arg0: i32) -> (i32, i32) {
    %c0_i32 = arith.constant 0 : i32
    %c0_i32_0 = arith.constant 0 : i32
    %c0_i32_1 = arith.constant 0 : i32
    return %c0_i32, %c0_i32_0 : i32, i32
  }
  func.func @transform_13(%arg0: i32) -> (i32, i32) {
    %c0_i32 = arith.constant 0 : i32
    %c0_i32_0 = arith.constant 0 : i32
    %c0_i32_1 = arith.constant 0 : i32
    return %c0_i32, %c0_i32_0 : i32, i32
  }
  func.func @transform_14(%arg0: i32) -> (i32, i32) {
    %c0_i32 = arith.constant 0 : i32
    %c0_i32_0 = arith.constant 0 : i32
    %c0_i32_1 = arith.constant 0 : i32
    return %c0_i32, %c0_i32_0 : i32, i32
  }
  func.func @transform_15(%arg0: i32) -> (i32, i32) {
    %c0_i32 = arith.constant 0 : i32
    %c0_i32_0 = arith.constant 0 : i32
    %c0_i32_1 = arith.constant 0 : i32
    return %c0_i32, %c0_i32_0 : i32, i32
  }
  func.func @transform_16(%arg0: i32) -> (i32, i32) {
    %c0_i32 = arith.constant 0 : i32
    %c0_i32_0 = arith.constant 0 : i32
    return %arg0, %c0_i32 : i32, i32
  }
}

</mosaic_0001>

<bundles_post_ra>
// kernel: lenet5_forward.1
= control target key start
LH: loop header
LB: loop body
LE: loop exit
PB: predicated region body
PF: predicated region fallthrough
CT: control target
= control target key end

     0   :  { %s10865_s0 = inlined_call_operand.vmem [shape: f32[512,32], index: 0, kind: input, shape index: {}]   ;;  %s10866_s1 = inlined_call_operand.vmem [shape: f32[5,32,168], index: 1, kind: input, shape index: {}]   ;;  %s10867_s2 = inlined_call_operand.vmem [shape: f32[1,168], index: 2, kind: input, shape index: {}]   ;;  %s10868_s3 = inlined_call_operand.vmem [shape: f32[168,84], index: 3, kind: input, shape index: {}]   ;;  %s10869_s4 = inlined_call_operand.vmem [shape: f32[112,252], index: 4, kind: input, shape index: {}]   ;;  %s10870_s5 = inlined_call_operand.vmem [shape: f32[5,84,160], index: 5, kind: input, shape index: {}]   ;;  %s10871_s6 = inlined_call_operand.vmem [shape: f32[1,160], index: 6, kind: input, shape index: {}]   ;;  %s10872_s7 = inlined_call_operand.vmem [shape: f32[160,80], index: 7, kind: input, shape index: {}]   ;;  %s10873_s8 = inlined_call_operand.vmem [shape: f32[40,108], index: 8, kind: input, shape index: {}]   ;;  %s10874_s9 = inlined_call_operand.vmem [shape: f32[5,80,120], index: 9, kind: input, shape index: {}]   ;;  %s10875_s10 = inlined_call_operand.vmem [shape: f32[1,120], index: 10, kind: input, shape index: {}]   ;;  %s10876_s11 = inlined_call_operand.vmem [shape: f32[8,36], index: 11, kind: input, shape index: {}]   ;;  %s10877_s12 = inlined_call_operand.vmem [shape: f32[120,84], index: 12, kind: input, shape index: {}]   ;;  %s10878_s13 = inlined_call_operand.vmem [shape: f32[1,84], index: 13, kind: input, shape index: {}]   ;;  %s10879_s14 = inlined_call_operand.vmem [shape: f32[84,10], index: 14, kind: input, shape index: {}]   ;;  %s10880_s15 = inlined_call_operand.vmem [shape: f32[1,10], index: 15, kind: input, shape index: {}]   ;;  %s10881_s16 = inlined_call_operand.hbm [shape: f32[16,10], index: 16, kind: output, shape index: {}]  }
   0x1   :  { %10893 = sst [smem:[#allocation106_spill]] %s10865_s0 }
   0x2   :  { %21 = vsyncpa [#allocation3], 0 }
   0x3   :  { %23 = vsyncpa [#allocation3 + $0x1], 0  ;;  %s7384_s21 = smov 0   ;;  %s7386_s22 = smov 0  }
   0x4   :  { %s7388_s23 = smov 0   ;;  %s7390_s24 = smov 0  }
   0x5 LB: > { %10894 = sst [smem:[#allocation5_spill]] %s7282_s21  ;;  %s7405_s25 = sadd.s32 4294967295, %s7294_s24   ;;  %s7294_s24 = sphi %s7390_s24, %s11188_s24   ;;  %s7290_s23 = sphi %s7388_s23, %s11190_s23   ;;  %s7286_s22 = sphi %s7386_s22, %s11192_s22   ;;  %s7282_s21 = sphi %s7384_s21, %s11191_s21  }
   0x6   : > { %10895 = sst [smem:[#allocation6_spill]] %s7290_s23  ;;  %s5963_s26 = sadd.s32 4294967294, %s7294_s24  }
   0x7   : > { %10896 = sst [smem:[#allocation7_spill]] %s7294_s24  ;;  %s7409_s27 = sadd.s32 1, %s7294_s24  }
   0x8   : > { %10897 = sst [smem:[#allocation8_spill]] %s7409_s27  ;;  %s377_s28 = sadd.s32 1, %s7290_s23 }
   0x9   : > { %s374_s29 = ssub.s32 %s7294_s24, %s7409_s27  ;;  %p387_p0 = scmp.ne.s32.totalorder %s7290_s23, %s7286_s22 }
   0xa   : > { %p375_p1 = scmp.eq.s32.totalorder %s374_s29, 0  ;;  %p388_p2 = scmp.eq.s32.totalorder %s7405_s25, 1 }
   0xb   : > { %p393_p3 = scmp.ne.s32.totalorder %s7286_s22, %s7282_s21  ;;  %p394_p4 = scmp.eq.s32.totalorder %s5963_s26, 1 }
   0xc   : > { %s7420_s30 = scalar_select %p375_p1, %s7290_s23, %s377_s28  }
   0xd   : > { %p7422_p5 = por %p388_p2, %p387_p0  ;;  %p7426_p6 = por %p394_p4, %p393_p3 }
   0xe   : > { %10898 = sst [smem:[#allocation9_spill]] %s7420_s30  ;;  %p5966_p7 = scmp.ge.s32.totalorder %s7294_s24, 1 }
   0xf   : > { %s10900_s17 = scalar_select %p7426_p6, 1, 0 }
  0x10   : > { %p466_p8 = scmp.lt.s32.totalorder %s7294_s24, 3 }
  0x11   : > { %10901 = sst [smem:[#allocation10_spill]] %s10900_s17 }
  0x12   : > { %p467_p9 = pnand %p5966_p7, %p466_p8 }
  0x14   : > { %470 = sbr.rel (%p467_p9) target bundleno = 2749 (0xabd), region = 84 }
  0x19   : > { %v5977_v0 = vld [vmem:[%s10866_s1 + $0x78] sm:$0xff]  ;;  %v5976_v2 = vld [vmem:[%s10866_s1 + $0x70] sm:$0xff]  ;;  %s5968_s30 = sshll.u32 %s7405_s25, 5  ;;  %v5975_v4 = vld [vmem:[%s10866_s1 + $0x68] sm:$0xff]  ;;  %s10902_s29 = sld [smem:[#allocation106_spill]]  ;;  %vm603_vm0 = vcmask 1046528  }
  0x1a   : > { %v561_v1 = vld [vmem:[%s10866_s1 + $0x38] sm:$0xff]  ;;  %756 = vmatprep.subr.mxu0 %v5977_v0  ;;  %v560_v3 = vld [vmem:[%s10866_s1 + $0x30] sm:$0xff]  ;;  %v559_v5 = vld [vmem:[%s10866_s1 + $0x28] sm:$0xff]  ;;  %p517_p10 = scmp.lt.s32.totalorder %s5968_s30, 63  ;;  %vm667_vm1 = vcmask 261120   ;;  %v10888_v20 = vmov 0.0  }
  0x1b   : > { %1077 = vmatprep.subr.mxu1 %v561_v1  ;;  %757 = vmatpush1.msra.mxu0 %v5976_v2  ;;  %v5974_v6 = vld [vmem:[%s10866_s1 + $0x60] sm:$0xff]  ;;  %v5973_v8 = vld [vmem:[%s10866_s1 + $0x58] sm:$0xff]  ;;  %v5972_v10 = vld [vmem:[%s10866_s1 + $0x50] sm:$0xff]  ;;  %vm1777_vm2 = vcmask 1044480   ;;  %vm1319_vm3 = vcmask 1045504   ;;  %vm2235_vm4 = vcmask 1043456  }
  0x1c   : > { %1078 = vmatpush1.msra.mxu1 %v560_v3  ;;  %v558_v7 = vld [vmem:[%s10866_s1 + $0x20] sm:$0xff]  ;;  %758 = vmatprep.subr.mxu0 %v5975_v4  ;;  %v557_v9 = vld [vmem:[%s10866_s1 + $0x18] sm:$0xff]  ;;  %v556_v11 = vld [vmem:[%s10866_s1 + $0x10] sm:$0xff]  ;;  %s11194_s30 = smov (!%p517_p10, %s5968_s30), 63  ;;  %vm2845_vm5 = vcmask 326656   ;;  %vm3195_vm6 = vcmask 1014784  }
  0x1d   : > { %1079 = vmatprep.subr.mxu1 %v559_v5  ;;  %759 = vmatpush1.msra.mxu0 %v5974_v6  ;;  %v5971_v12 = vld [vmem:[%s10866_s1 + $0x48] sm:$0xff]  ;;  %v5970_v14 = vld [vmem:[%s10866_s1 + $0x40] sm:$0xff]  ;;  %s5969_s18 = sshll.u32 %s11194_s30, 3  ;;  %v6049_v16 = vld [vmem:[%s10866_s1 + $0xb8] sm:$0xff]  ;;  %vm3462_vm7 = vcmask 687104   ;;  %vm7297_vm8 = vmmov 0  }
  0x1e   : > { %1080 = vmatpush1.msra.mxu1 %v558_v7  ;;  %v555_v13 = vld [vmem:[%s10866_s1 + $0x8] sm:$0xff]  ;;  %760 = vmatprep.subr.mxu0 %v5973_v8  ;;  %v554_v15 = vld [vmem:[%s10866_s1] sm:$0xff]  ;;  %v6048_v25 = vld [vmem:[%s10866_s1 + $0xb0] sm:$0xff]  ;;  %vm4882_vm9 = vcmask 883712   ;;  %vm5026_vm10 = vcmask 654336   ;;  %vm5620_vm11 = vcmask 293888  }
  0x1f   : > { %1081 = vmatprep.subr.mxu1 %v557_v9  ;;  %761 = vmatpush1.msra.mxu0 %v5972_v10  ;;  %s7484_s24 = scalar_lea.vmem %s10902_s29, %s5969_s18  ;;  %v6047_v27 = vld [vmem:[%s10866_s1 + $0xa8] sm:$0xff]  ;;  %v6089_v28 = vld [vmem:[%s10866_s1 + $0xf8] sm:$0xff]  ;;  %v6046_v29 = vld [vmem:[%s10866_s1 + $0xa0] sm:$0xff]  ;;  %vm5719_vm12 = vcmask 982016   ;;  %s513_s28 = sand.u32 1, %s7286_s22   ;;  %vm5888_vm13 = vcmask 80896  }
  0x20   : > { %1082 = vmatpush1.msra.mxu1 %v556_v11  ;;  %762 = vmatprep.subr.mxu0 %v5971_v12  ;;  %v7490_v17 = vld [vmem:[%s7484_s24] sm:$0xff]  ;;  %v7493_v18 = vld [vmem:[%s7484_s24 + $0x8] sm:$0xff]  ;;  %v7496_v19 = vld [vmem:[%s7484_s24 + $0x10] sm:$0xff]  ;;  %s5967_s29 = sshll.u32 %s513_s28, 3  ;;  %s5891_s20 = scalar_lea.sflag [#allocation3], %s513_s28 }
  0x21   : > { %1083 = vmatprep.subr.mxu1 %v555_v13  ;;  %763 = vmatpush1.msra.mxu0 %v5970_v14  ;;  %v604_v21 = vrot.slane %v7490_v17, 1  ;;  %v605_v22 = vrot.slane %v7493_v18, 1  ;;  %v607_v23 = vrot.slane %v7496_v19, 1  ;;  %v7504_v24 = vld [vmem:[%s7484_s24 + $0x18] sm:$0xff]  ;;  %v7527_v32 = vld [vmem:[%s7484_s24 + $0x20] sm:$0xff]  ;;  %v7537_v35 = vld [vmem:[%s7484_s24 + $0x28] sm:$0xff] }
  0x22   : > { %796 = vmatprep.mubr.f32.mxu0 %v10888_v20  ;;  %1084 = vmatpush1.msra.mxu1 %v554_v15  ;;  %v609_v31 = vrot.slane %v7504_v24, 1  ;;  %v611_v34 = vrot.slane %v7527_v32, 1  ;;  %v6088_v36 = vld [vmem:[%s10866_s1 + $0xf0] sm:$0xff]  ;;  %v6045_v37 = vld [vmem:[%s10866_s1 + $0x98] sm:$0xff]  ;;  %v6087_v38 = vld [vmem:[%s10866_s1 + $0xe8] sm:$0xff]  ;;  %v613_v41 = vrot.slane %v7537_v35, 1 }
  0x23   : > { %1117 = vmatprep.mubr.f32.mxu1 %v10888_v20  ;;  %v606_v26 = vsel %vm603_vm0, %v604_v21, %v605_v22  ;;  %1471 = vmatprep.subr.mxu0 %v6049_v16  ;;  %v608_v30 = vsel %vm603_vm0, %v605_v22, %v607_v23  ;;  %v6044_v39 = vld [vmem:[%s10866_s1 + $0x90] sm:$0xff]  ;;  %v6086_v43 = vld [vmem:[%s10866_s1 + $0xe0] sm:$0xff]  ;;  %v6043_v44 = vld [vmem:[%s10866_s1 + $0x88] sm:$0xff]  ;;  %s515_s30 = scalar_lea.vmem [#allocation2], %s5967_s29 }
  0x24   : > { %6010 = vmatmul.mubr.msk.f32.vlgmr.msra.gmra.mxu1 %vm667_vm1, %v7490_v17  ;;  %5978 = vmatmul.mubr.msk.f32.vlgmr.msra.gmra.mxu0 %vm667_vm1, %v606_v26  ;;  %v610_v33 = vsel %vm603_vm0, %v607_v23, %v609_v31  ;;  %v612_v40 = vsel %vm603_vm0, %v609_v31, %v611_v34  ;;  %v7559_v42 = vld [vmem:[%s7484_s24 + $0x30] sm:$0xff]  ;;  %v6085_v45 = vld [vmem:[%s10866_s1 + $0xd8] sm:$0xff]  ;;  %v6042_v46 = vld [vmem:[%s10866_s1 + $0x80] sm:$0xff]  ;;  %v614_v47 = vsel %vm603_vm0, %v611_v34, %v613_v41  ;;  %s5904_s21 = sshll.u32 %s515_s30, 4  ;;  %s5905_s21 = int_to_ptr.vmem [resolvable:$true] %s5904_s21 }
  0x25   : > { %1123 = vmatprep.mubr.f32.mxu1 %v10888_v20  ;;  %802 = vmatprep.mubr.f32.mxu0 %v10888_v20  ;;  %v615_v48 = vrot.slane %v7559_v42, 1  ;;  %v7581_v49 = vld [vmem:[%s7484_s24 + $0x38] sm:$0xff]  ;;  %v6084_v50 = vld [vmem:[%s10866_s1 + $0xd0] sm:$0xff]  ;;  %v6083_v51 = vld [vmem:[%s10866_s1 + $0xc8] sm:$0xff]  ;;  %s7234_s26 = scalar_lea.vmem %s5905_s21, 128 }
  0x26   : > { %1472 = vmatpush1.msra.mxu0 %v6048_v25  ;;  %1929 = vmatprep.subr.mxu1 %v6089_v28  ;;  %v617_v53 = vrot.slane %v7581_v49, 1  ;;  %v7597_v54 = vld [vmem:[%s7484_s24 + $0x40] sm:$0xff]  ;;  %v7610_v58 = vld [vmem:[%s7484_s24 + $0x48] sm:$0xff]  ;;  %v7621_v61 = vld [vmem:[%s7484_s24 + $0x50] sm:$0xff]  ;;  %p7235_p11 = scmp.ne.s32.totalorder %s5905_s21, %s7234_s26 }
  0x27   : > { %1473 = vmatprep.subr.mxu0 %v6047_v27  ;;  %1930 = vmatpush1.msra.mxu1 %v6088_v36  ;;  %v616_v52 = vsel %vm603_vm0, %v613_v41, %v615_v48  ;;  %v6082_v55 = vld [vmem:[%s10866_s1 + $0xc0] sm:$0xff]  ;;  %v619_v57 = vrot.slane %v7597_v54, 1  ;;  %v621_v60 = vrot.slane %v7610_v58, 1  ;;  %v623_v63 = vrot.slane %v7621_v61, 1  ;;  %v7631_v0 = vld [vmem:[%s7484_s24 + $0x58] sm:$0xff]  ;;  %v7651_v6 = vld [vmem:[%s7484_s24 + $0x68] sm:$0xff] }
  0x28   : > { %6011 = vmatmul.mubr.msk.f32.gmra.mxu1 %vm667_vm1, %v7493_v18  ;;  %1474 = vmatpush1.msra.mxu0 %v6046_v29  ;;  %v618_v56 = vsel %vm603_vm0, %v615_v48, %v617_v53  ;;  %v625_v2 = vrot.slane %v7631_v0, 1  ;;  %v7641_v3 = vld [vmem:[%s7484_s24 + $0x60] sm:$0xff]  ;;  %v629_v8 = vrot.slane %v7651_v6, 1  ;;  %v7661_v9 = vld [vmem:[%s7484_s24 + $0x70] sm:$0xff]  ;;  %v7671_v12 = vld [vmem:[%s7484_s24 + $0x78] sm:$0xff]  ;;  %p7236_p12 = pnand %p7235_p11, %p7422_p5 }
  0x29   : > { %5979 = vmatmul.mubr.msk.f32.gmra.mxu0 %vm667_vm1, %v608_v30  ;;  %1129 = vmatprep.mubr.f32.mxu1 %v10888_v20  ;;  %v620_v59 = vsel %vm603_vm0, %v617_v53, %v619_v57  ;;  %v622_v62 = vsel %vm603_vm0, %v619_v57, %v621_v60  ;;  %v624_v1 = vsel %vm603_vm0, %v621_v60, %v623_v63  ;;  %v627_v5 = vrot.slane %v7641_v3, 1  ;;  %v7681_v15 = vld [vmem:[%s7484_s24 + $0x80] sm:$0xff]  ;;  %v7691_v22 = vld [vmem:[%s7484_s24 + $0x88] sm:$0xff]  ;;  %v7701_v26 = vld [vmem:[%s7484_s24 + $0x90] sm:$0xff] }
  0x2a   : > { %808 = vmatprep.mubr.f32.mxu0 %v10888_v20  ;;  %1475 = vmatprep.subr.mxu0 %v6045_v37  ;;  %v626_v4 = vsel %vm603_vm0, %v623_v63, %v625_v2  ;;  %v631_v11 = vrot.slane %v7661_v9, 1  ;;  %v633_v14 = vrot.slane %v7671_v12, 1  ;;  %v635_v21 = vrot.slane %v7681_v15, 1  ;;  %v7711_v29 = vld [vmem:[%s7484_s24 + $0x98] sm:$0xff]  ;;  %v7731_v37 = vld [vmem:[%s7484_s24 + $0xa8] sm:$0xff]  ;;  %p7237_p13 = pneg %p7236_p12 }
  0x2b   : > { %1931 = vmatprep.subr.mxu1 %v6087_v38  ;;  %1476 = vmatpush1.msra.mxu0 %v6044_v39  ;;  %v628_v7 = vsel %vm603_vm0, %v625_v2, %v627_v5  ;;  %v630_v10 = vsel %vm603_vm0, %v627_v5, %v629_v8  ;;  %v637_v25 = vrot.slane %v7691_v22, 1  ;;  %v639_v28 = vrot.slane %v7701_v26, 1  ;;  %v6129_v63 = vld [vmem:[%s10866_s1 + $0x138] sm:$0xff]  ;;  %v7814_v5 = vld [vmem:[%s7484_s24 + $0xe8] sm:$0xff] }
  0x2c   : > { %6012 = vmatmul.mubr.msk.f32.gmra.mxu1 %vm667_vm1, %v7496_v19  ;;  %1477 = vmatprep.subr.mxu0 %v6043_v44  ;;  %v632_v13 = vsel %vm603_vm0, %v629_v8, %v631_v11  ;;  %v634_v16 = vsel %vm603_vm0, %v631_v11, %v633_v14  ;;  %v636_v23 = vsel %vm603_vm0, %v633_v14, %v635_v21  ;;  %v641_v31 = vrot.slane %v7711_v29, 1  ;;  %v7751_v44 = vld [vmem:[%s7484_s24 + $0xb8] sm:$0xff] }
  0x2d   : > { %5980 = vmatmul.mubr.msk.f32.gmra.mxu0 %vm667_vm1, %v610_v33  ;;  %1135 = vmatprep.mubr.f32.mxu1 %v10888_v20  ;;  %v638_v27 = vsel %vm603_vm0, %v635_v21, %v637_v25  ;;  %v640_v30 = vsel %vm603_vm0, %v637_v25, %v639_v28  ;;  %v7721_v33 = vld [vmem:[%s7484_s24 + $0xa0] sm:$0xff]  ;;  %v645_v39 = vrot.slane %v7731_v37, 1  ;;  %v661_v8 = vrot.slane %v7814_v5, 1  ;;  %v7834_v14 = vld [vmem:[%s7484_s24 + $0xf8] sm:$0xff] }
  0x2e   : > { %814 = vmatprep.mubr.f32.mxu0 %v10888_v20  ;;  %1932 = vmatpush1.msra.mxu1 %v6086_v43  ;;  %v642_v34 = vsel %vm603_vm0, %v639_v28, %v641_v31  ;;  %v643_v36 = vrot.slane %v7721_v33, 1  ;;  %v665_v21 = vrot.slane %v7834_v14, 1  ;;  %v1778_v25 = vrot.slane %v7490_v17, 3 }
  0x2f   : > { %1933 = vmatprep.subr.mxu1 %v6085_v45  ;;  %1478 = vmatpush1.msra.mxu0 %v6042_v46  ;;  %v649_v46 = vrot.slane %v7751_v44, 1  ;;  %v1320_v28 = vrot.slane %v7490_v17, 2  ;;  %v1323_v17 = vrot.slane %v7496_v19, 2 }
  0x30   : > { %6013 = vmatmul.mubr.msk.f32.gmra.mxu1 %vm667_vm1, %v7504_v24  ;;  %v644_v38 = vsel %vm603_vm0, %v641_v31, %v643_v36  ;;  %v646_v41 = vsel %vm603_vm0, %v643_v36, %v645_v39  ;;  %2387 = vmatprep.subr.mxu0 %v6129_v63  ;;  %v1329_v63 = vrot.slane %v7537_v35, 2 }
  0x31   : > { %5981 = vmatmul.mubr.msk.f32.gmra.mxu0 %vm667_vm1, %v612_v40  ;;  %1141 = vmatprep.mubr.f32.mxu1 %v10888_v20  ;;  %v7741_v40 = vld [vmem:[%s7484_s24 + $0xb0] sm:$0xff] }
  0x32   : > { %820 = vmatprep.mubr.f32.mxu0 %v10888_v20  ;;  %1934 = vmatpush1.msra.mxu1 %v6084_v50  ;;  %v647_v43 = vrot.slane %v7741_v40, 1 }
  0x33   : > { %1935 = vmatprep.subr.mxu1 %v6083_v51  ;;  %v7771_v51 = vld [vmem:[%s7484_s24 + $0xc8] sm:$0xff] }
  0x34   : > { %6014 = vmatmul.mubr.msk.f32.gmra.mxu1 %vm667_vm1, %v7527_v32  ;;  %v648_v45 = vsel %vm603_vm0, %v645_v39, %v647_v43  ;;  %v650_v48 = vsel %vm603_vm0, %v647_v43, %v649_v46  ;;  %v653_v53 = vrot.slane %v7771_v51, 1 }
  0x35   : > { %5982 = vmatmul.mubr.msk.f32.gmra.mxu0 %vm667_vm1, %v614_v47  ;;  %1147 = vmatprep.mubr.f32.mxu1 %v10888_v20  ;;  %v7761_v47 = vld [vmem:[%s7484_s24 + $0xc0] sm:$0xff] }
  0x36   : > { %826 = vmatprep.mubr.f32.mxu0 %v10888_v20  ;;  %1936 = vmatpush1.msra.mxu1 %v6082_v55  ;;  %v651_v50 = vrot.slane %v7761_v47, 1  ;;  %v7781_v55 = vld [vmem:[%s7484_s24 + $0xd0] sm:$0xff] }
  0x37   : > { %2942 = vmatprep.subr.mxu1 %v10888_v20  ;;  %v655_v57 = vrot.slane %v7781_v55, 1 }
  0x38   : > { %6015 = vmatmul.mubr.msk.f32.gmra.mxu1 %vm667_vm1, %v7537_v35 }
  0x39   : > { %5983 = vmatmul.mubr.msk.f32.gmra.mxu0 %vm667_vm1, %v616_v52  ;;  %1153 = vmatprep.mubr.f32.mxu1 %v10888_v20  ;;  %v652_v52 = vsel %vm603_vm0, %v649_v46, %v651_v50  ;;  %v656_v60 = vsel %vm603_vm0, %v653_v53, %v655_v57  ;;  %v6125_v46 = vld [vmem:[%s10866_s1 + $0x118] sm:$0xff] }
  0x3a   : > { %832 = vmatprep.mubr.f32.mxu0 %v10888_v20 }
  0x3c   : > { %6016 = vmatmul.mubr.msk.f32.gmra.mxu1 %vm667_vm1, %v7559_v42 }
  0x3d   : > { %5984 = vmatmul.mubr.msk.f32.gmra.mxu0 %vm667_vm1, %v618_v56  ;;  %1159 = vmatprep.mubr.f32.mxu1 %v10888_v20  ;;  %v654_v56 = vsel %vm603_vm0, %v651_v50, %v653_v53 }
  0x3e   : > { %838 = vmatprep.mubr.f32.mxu0 %v10888_v20 }
  0x40   : > { %6017 = vmatmul.mubr.msk.f32.gmra.mxu1 %vm667_vm1, %v7581_v49 }
  0x41   : > { %5985 = vmatmul.mubr.msk.f32.gmra.mxu0 %vm667_vm1, %v620_v59  ;;  %1165 = vmatprep.mubr.f32.mxu1 %v10888_v20  ;;  %v7791_v59 = vld [vmem:[%s7484_s24 + $0xd8] sm:$0xff] }
  0x42   : > { %844 = vmatprep.mubr.f32.mxu0 %v10888_v20 }
  0x44   : > { %6018 = vmatmul.mubr.msk.f32.gmra.mxu1 %vm667_vm1, %v7597_v54 }
  0x45   : > { %5986 = vmatmul.mubr.msk.f32.gmra.mxu0 %vm667_vm1, %v622_v62  ;;  %1171 = vmatprep.mubr.f32.mxu1 %v10888_v20  ;;  %v657_v62 = vrot.slane %v7791_v59, 1 }
  0x46   : > { %850 = vmatprep.mubr.f32.mxu0 %v10888_v20 }
  0x47   : > { %v658_v2 = vsel %vm603_vm0, %v655_v57, %v657_v62  ;;  %v6122_v57 = vld [vmem:[%s10866_s1 + $0x100] sm:$0xff] }
  0x48   : > { %6019 = vmatmul.mubr.msk.f32.gmra.mxu1 %vm667_vm1, %v7610_v58 }
  0x49   : > { %5987 = vmatmul.mubr.msk.f32.gmra.mxu0 %vm667_vm1, %v624_v1  ;;  %1177 = vmatprep.mubr.f32.mxu1 %v10888_v20  ;;  %v7804_v1 = vld [vmem:[%s7484_s24 + $0xe0] sm:$0xff] }
  0x4a   : > { %856 = vmatprep.mubr.f32.mxu0 %v10888_v20 }
  0x4c   : > { %6020 = vmatmul.mubr.msk.f32.gmra.mxu1 %vm667_vm1, %v7621_v61 }
  0x4d   : > { %5988 = vmatmul.mubr.msk.f32.gmra.mxu0 %vm667_vm1, %v626_v4  ;;  %1183 = vmatprep.mubr.f32.mxu1 %v10888_v20  ;;  %v659_v4 = vrot.slane %v7804_v1, 1 }
  0x4e   : > { %862 = vmatprep.mubr.f32.mxu0 %v10888_v20 }
  0x4f   : > { %v662_v11 = vsel %vm603_vm0, %v659_v4, %v661_v8 }
  0x50   : > { %6021 = vmatmul.mubr.msk.f32.gmra.mxu1 %vm667_vm1, %v7631_v0 }
  0x51   : > { %5989 = vmatmul.mubr.msk.f32.gmra.mxu0 %vm667_vm1, %v628_v7  ;;  %1189 = vmatprep.mubr.f32.mxu1 %v10888_v20  ;;  %v660_v7 = vsel %vm603_vm0, %v657_v62, %v659_v4  ;;  %v1787_v62 = vrot.slane %v7537_v35, 3  ;;  %v1789_v4 = vrot.slane %v7559_v42, 3 }
  0x52   : > { %868 = vmatprep.mubr.f32.mxu0 %v10888_v20 }
  0x53   : > { %v1790_v35 = vsel %vm1777_vm2, %v1787_v62, %v1789_v4 }
  0x54   : > { %6022 = vmatmul.mubr.msk.f32.gmra.mxu1 %vm667_vm1, %v7641_v3 }
  0x55   : > { %5990 = vmatmul.mubr.msk.f32.gmra.mxu0 %vm667_vm1, %v630_v10  ;;  %1195 = vmatprep.mubr.f32.mxu1 %v10888_v20  ;;  %v7824_v10 = vld [vmem:[%s7484_s24 + $0xf0] sm:$0xff] }
  0x56   : > { %874 = vmatprep.mubr.f32.mxu0 %v10888_v20 }
  0x58   : > { %6023 = vmatmul.mubr.msk.f32.gmra.mxu1 %vm667_vm1, %v7651_v6 }
  0x59   : > { %5991 = vmatmul.mubr.msk.f32.gmra.mxu0 %vm667_vm1, %v632_v13  ;;  %1201 = vmatprep.mubr.f32.mxu1 %v10888_v20  ;;  %v663_v13 = vrot.slane %v7824_v10, 1 }
  0x5a   : > { %880 = vmatprep.mubr.f32.mxu0 %v10888_v20 }
  0x5c   : > { %6024 = vmatmul.mubr.msk.f32.gmra.mxu1 %vm667_vm1, %v7661_v9 }
  0x5d   : > { %5992 = vmatmul.mubr.msk.f32.gmra.mxu0 %vm667_vm1, %v634_v16  ;;  %1207 = vmatprep.mubr.f32.mxu1 %v10888_v20  ;;  %v664_v16 = vsel %vm603_vm0, %v661_v8, %v663_v13  ;;  %v1331_v8 = vrot.slane %v7559_v42, 2 }
  0x5e   : > { %886 = vmatprep.mubr.f32.mxu0 %v10888_v20 }
  0x60   : > { %6025 = vmatmul.mubr.msk.f32.gmra.mxu1 %vm667_vm1, %v7671_v12 }
  0x61   : > { %5993 = vmatmul.mubr.msk.f32.gmra.mxu0 %vm667_vm1, %v636_v23  ;;  %1213 = vmatprep.mubr.f32.mxu1 %v10888_v20  ;;  %v666_v23 = vsel %vm603_vm0, %v663_v13, %v665_v21  ;;  %v1332_v13 = vsel %vm1319_vm3, %v1329_v63, %v1331_v8 }
  0x62   : > { %892 = vmatprep.mubr.f32.mxu0 %v10888_v20 }
  0x64   : > { %6026 = vmatmul.mubr.msk.f32.gmra.mxu1 %vm667_vm1, %v7681_v15 }
  0x65   : > { %5994 = vmatmul.mubr.msk.f32.gmra.mxu0 %vm667_vm1, %v638_v27  ;;  %1219 = vmatprep.mubr.f32.mxu1 %v10888_v20  ;;  %v1779_v27 = vrot.slane %v7493_v18, 3 }
  0x66   : > { %898 = vmatprep.mubr.f32.mxu0 %v10888_v20 }
  0x67   : > { %v1780_v31 = vsel %vm1777_vm2, %v1778_v25, %v1779_v27  ;;  %v1335_v25 = vrot.slane %v7597_v54, 2 }
  0x68   : > { %6027 = vmatmul.mubr.msk.f32.gmra.mxu1 %vm667_vm1, %v7691_v22 }
  0x69   : > { %5995 = vmatmul.mubr.msk.f32.gmra.mxu0 %vm667_vm1, %v640_v30  ;;  %1225 = vmatprep.mubr.f32.mxu1 %v10888_v20  ;;  %v1321_v30 = vrot.slane %v7493_v18, 2  ;;  %v6128_v18 = vld [vmem:[%s10866_s1 + $0x130] sm:$0xff] }
  0x6a   : > { %904 = vmatprep.mubr.f32.mxu0 %v10888_v20 }
  0x6b   : > { %v1322_v36 = vsel %vm1319_vm3, %v1320_v28, %v1321_v30  ;;  %v1324_v43 = vsel %vm1319_vm3, %v1321_v30, %v1323_v17  ;;  %v1337_v30 = vrot.slane %v7610_v58, 2 }
  0x6c   : > { %6028 = vmatmul.mubr.msk.f32.gmra.mxu1 %vm667_vm1, %v7701_v26 }
  0x6d   : > { %5996 = vmatmul.mubr.msk.f32.gmra.mxu0 %vm667_vm1, %v642_v34  ;;  %1231 = vmatprep.mubr.f32.mxu1 %v10888_v20  ;;  %v1781_v34 = vrot.slane %v7496_v19, 3  ;;  %v6126_v19 = vld [vmem:[%s10866_s1 + $0x120] sm:$0xff] }
  0x6e   : > { %910 = vmatprep.mubr.f32.mxu0 %v10888_v20 }
  0x6f   : > { %v1782_v39 = vsel %vm1777_vm2, %v1779_v27, %v1781_v34  ;;  %v1795_v27 = vrot.slane %v7610_v58, 3 }
  0x70   : > { %6029 = vmatmul.mubr.msk.f32.gmra.mxu1 %vm667_vm1, %v7711_v29 }
  0x71   : > { %5997 = vmatmul.mubr.msk.f32.gmra.mxu0 %vm667_vm1, %v644_v38  ;;  %1237 = vmatprep.mubr.f32.mxu1 %v10888_v20  ;;  %v6127_v38 = vld [vmem:[%s10866_s1 + $0x128] sm:$0xff] }
  0x72   : > { %916 = vmatprep.mubr.f32.mxu0 %v10888_v20 }
  0x74   : > { %6030 = vmatmul.mubr.msk.f32.gmra.mxu1 %vm667_vm1, %v7721_v33 }
  0x75   : > { %5998 = vmatmul.mubr.msk.f32.gmra.mxu0 %vm667_vm1, %v646_v41  ;;  %1243 = vmatprep.mubr.f32.mxu1 %v10888_v20  ;;  %v1783_v41 = vrot.slane %v7504_v24, 3 }
  0x76   : > { %922 = vmatprep.mubr.f32.mxu0 %v10888_v20 }
  0x77   : > { %v1784_v50 = vsel %vm1777_vm2, %v1781_v34, %v1783_v41  ;;  %v1338_v34 = vsel %vm1319_vm3, %v1335_v25, %v1337_v30 }
  0x78   : > { %6031 = vmatmul.mubr.msk.f32.gmra.mxu1 %vm667_vm1, %v7731_v37 }
  0x79   : > { %5999 = vmatmul.mubr.msk.f32.gmra.mxu0 %vm667_vm1, %v648_v45  ;;  %1249 = vmatprep.mubr.f32.mxu1 %v10888_v20  ;;  %v1325_v45 = vrot.slane %v7504_v24, 2  ;;  %v1785_v24 = vrot.slane %v7527_v32, 3 }
  0x7a   : > { %928 = vmatprep.mubr.f32.mxu0 %v10888_v20 }
  0x7b   : > { %v1326_v53 = vsel %vm1319_vm3, %v1323_v17, %v1325_v45  ;;  %v1799_v17 = vrot.slane %v7631_v0, 3 }
  0x7c   : > { %6032 = vmatmul.mubr.msk.f32.gmra.mxu1 %vm667_vm1, %v7741_v40 }
  0x7d   : > { %6000 = vmatmul.mubr.msk.f32.gmra.mxu0 %vm667_vm1, %v650_v48  ;;  %1255 = vmatprep.mubr.f32.mxu1 %v10888_v20  ;;  %v6124_v48 = vld [vmem:[%s10866_s1 + $0x110] sm:$0xff] }
  0x7e   : > { %934 = vmatprep.mubr.f32.mxu0 %v10888_v20 }
  0x80   : > { %6033 = vmatmul.mubr.msk.f32.gmra.mxu1 %vm667_vm1, %v7751_v44 }
  0x81   : > { %6001 = vmatmul.mubr.msk.f32.gmra.mxu0 %vm667_vm1, %v652_v52  ;;  %1261 = vmatprep.mubr.f32.mxu1 %v10888_v20  ;;  %v6123_v52 = vld [vmem:[%s10866_s1 + $0x108] sm:$0xff] }
  0x82   : > { %940 = vmatprep.mubr.f32.mxu0 %v10888_v20 }
  0x84   : > { %6034 = vmatmul.mubr.msk.f32.gmra.mxu1 %vm667_vm1, %v7761_v47 }
  0x85   : > { %6002 = vmatmul.mubr.msk.f32.gmra.mxu0 %vm667_vm1, %v654_v56  ;;  %1267 = vmatprep.mubr.f32.mxu1 %v10888_v20  ;;  %v1327_v56 = vrot.slane %v7527_v32, 2 }
  0x86   : > { %946 = vmatprep.mubr.f32.mxu0 %v10888_v20 }
  0x87   : > { %v1328_v32 = vsel %vm1319_vm3, %v1325_v45, %v1327_v56 }
  0x88   : > { %6035 = vmatmul.mubr.msk.f32.gmra.mxu1 %vm667_vm1, %v7771_v51 }
  0x89   : > { %6003 = vmatmul.mubr.msk.f32.gmra.mxu0 %vm667_vm1, %v656_v60  ;;  %1273 = vmatprep.mubr.f32.mxu1 %v10888_v20  ;;  %v1786_v60 = vsel %vm1777_vm2, %v1783_v41, %v1785_v24 }
  0x8a   : > { %952 = vmatprep.mubr.f32.mxu0 %v10888_v20 }
  0x8c   : > { %6036 = vmatmul.mubr.msk.f32.gmra.mxu1 %vm667_vm1, %v7781_v55 }
  0x8d   : > { %6004 = vmatmul.mubr.msk.f32.gmra.mxu0 %vm667_vm1, %v658_v2  ;;  %1279 = vmatprep.mubr.f32.mxu1 %v10888_v20  ;;  %v1788_v2 = vsel %vm1777_vm2, %v1785_v24, %v1787_v62  ;;  %v1347_v24 = vrot.slane %v7661_v9, 2  ;;  %v1351_v62 = vrot.slane %v7681_v15, 2 }
  0x8e   : > { %958 = vmatprep.mubr.f32.mxu0 %v10888_v20 }
  0x90   : > { %6037 = vmatmul.mubr.msk.f32.gmra.mxu1 %vm667_vm1, %v7791_v59 }
  0x91   : > { %6005 = vmatmul.mubr.msk.f32.gmra.mxu0 %vm667_vm1, %v660_v7  ;;  %1285 = vmatprep.mubr.f32.mxu1 %v10888_v20  ;;  %v1330_v7 = vsel %vm1319_vm3, %v1327_v56, %v1329_v63  ;;  %v1349_v56 = vrot.slane %v7671_v12, 2 }
  0x92   : > { %964 = vmatprep.mubr.f32.mxu0 %v10888_v20 }
  0x93   : > { %v1352_v63 = vsel %vm1319_vm3, %v1349_v56, %v1351_v62 }
  0x94   : > { %6038 = vmatmul.mubr.msk.f32.gmra.mxu1 %vm667_vm1, %v7804_v1 }
  0x95   : > { %6006 = vmatmul.mubr.msk.f32.gmra.mxu0 %vm667_vm1, %v662_v11  ;;  %1291 = vmatprep.mubr.f32.mxu1 %v10888_v20  ;;  %v1791_v11 = vrot.slane %v7581_v49, 3 }
  0x96   : > { %970 = vmatprep.mubr.f32.mxu0 %v10888_v20 }
  0x97   : > { %v1792_v42 = vsel %vm1777_vm2, %v1789_v4, %v1791_v11  ;;  %v1813_v4 = vrot.slane %v7701_v26, 3 }
  0x98   : > { %6039 = vmatmul.mubr.msk.f32.gmra.mxu1 %vm667_vm1, %v7814_v5 }
  0x99   : > { %6007 = vmatmul.mubr.msk.f32.gmra.mxu0 %vm667_vm1, %v664_v16  ;;  %1297 = vmatprep.mubr.f32.mxu1 %v10888_v20  ;;  %v1333_v16 = vrot.slane %v7581_v49, 2 }
  0x9a   : > { %976 = vmatprep.mubr.f32.mxu0 %v10888_v20 }
  0x9b   : > { %v1336_v28 = vsel %vm1319_vm3, %v1333_v16, %v1335_v25 }
  0x9c   : > { %6040 = vmatmul.mubr.msk.f32.gmra.mxu1 %vm667_vm1, %v7824_v10 }
  0x9d   : > { %6008 = vmatmul.mubr.msk.f32.gmra.mxu0 %vm667_vm1, %v666_v23  ;;  %1303 = vmatprep.mubr.f32.mxu1 %v10888_v20  ;;  %v1334_v23 = vsel %vm1319_vm3, %v1331_v8, %v1333_v16  ;;  %v1355_v8 = vrot.slane %v7701_v26, 2  ;;  %v1357_v26 = vrot.slane %v7711_v29, 2 }
  0x9e   : > { %982 = vmatprep.mubr.f32.mxu0 %v10888_v20 }
  0xa0   : > { %6041 = vmatmul.mubr.msk.f32.gmra.mxu1 %vm667_vm1, %v7834_v14 }
  0xa1   : > { %6009 = vmatmul.mubr.msk.f32.gmra.mxu0 %vm667_vm1, %v665_v21  ;;  %1969 = vmatprep.mubr.f32.mxu1 %v10888_v20  ;;  %v1793_v21 = vrot.slane %v7597_v54, 3 }
  0xa2   : > { %1511 = vmatprep.mubr.f32.mxu0 %v10888_v20 }
  0xa3   : > { %v1794_v49 = vsel %vm1777_vm2, %v1791_v11, %v1793_v21  ;;  %v1796_v54 = vsel %vm1777_vm2, %v1793_v21, %v1795_v27 }
  0xa4   : > { %6090 = vmatmul.mubr.msk.f32.vlgmr.msra.gmra.mxu1 %vm667_vm1, %v1780_v31  ;;  %v1797_v31 = vrot.slane %v7621_v61, 3 }
  0xa5   : > { %6050 = vmatmul.mubr.msk.f32.vlgmr.msra.gmra.mxu0 %vm667_vm1, %v1322_v36  ;;  %1975 = vmatprep.mubr.f32.mxu1 %v10888_v20  ;;  %v1339_v36 = vrot.slane %v7621_v61, 2 }
  0xa6   : > { %1517 = vmatprep.mubr.f32.mxu0 %v10888_v20  ;;  %2388 = vmatpush1.msra.mxu0 %v6128_v18  ;;  %v1798_v58 = vsel %vm1777_vm2, %v1795_v27, %v1797_v31  ;;  %v1800_v61 = vsel %vm1777_vm2, %v1797_v31, %v1799_v17 }
  0xa7   : > { %2389 = vmatprep.subr.mxu0 %v6127_v38  ;;  %v1340_v18 = vsel %vm1319_vm3, %v1337_v30, %v1339_v36  ;;  %v1341_v38 = vrot.slane %v7631_v0, 2  ;;  %v1817_v30 = vrot.slane %v7721_v33, 3 }
  0xa8   : > { %6091 = vmatmul.mubr.msk.f32.gmra.mxu1 %vm667_vm1, %v1782_v39  ;;  %2390 = vmatpush1.msra.mxu0 %v6126_v19  ;;  %v1801_v39 = vrot.slane %v7641_v3, 3  ;;  %v1343_v19 = vrot.slane %v7641_v3, 2 }
  0xa9   : > { %6051 = vmatmul.mubr.msk.f32.gmra.mxu0 %vm667_vm1, %v1324_v43  ;;  %1981 = vmatprep.mubr.f32.mxu1 %v10888_v20  ;;  %v1342_v41 = vsel %vm1319_vm3, %v1339_v36, %v1341_v38  ;;  %v1803_v43 = vrot.slane %v7651_v6, 3 }
  0xaa   : > { %1523 = vmatprep.mubr.f32.mxu0 %v10888_v20  ;;  %2391 = vmatprep.subr.mxu0 %v6125_v46  ;;  %v1802_v0 = vsel %vm1777_vm2, %v1799_v17, %v1801_v39  ;;  %v1344_v45 = vsel %vm1319_vm3, %v1341_v38, %v1343_v19  ;;  %v1345_v46 = vrot.slane %v7651_v6, 2 }
  0xab   : > { %2392 = vmatpush1.msra.mxu0 %v6124_v48  ;;  %v1804_v3 = vsel %vm1777_vm2, %v1801_v39, %v1803_v43  ;;  %v1805_v48 = vrot.slane %v7661_v9, 3 }
  0xac   : > { %6092 = vmatmul.mubr.msk.f32.gmra.mxu1 %vm667_vm1, %v1784_v50  ;;  %2393 = vmatprep.subr.mxu0 %v6123_v52  ;;  %v1346_v50 = vsel %vm1319_vm3, %v1343_v19, %v1345_v46  ;;  %v1807_v52 = vrot.slane %v7671_v12, 3  ;;  %v1361_v19 = vrot.slane %v7731_v37, 2 }
  0xad   : > { %6052 = vmatmul.mubr.msk.f32.gmra.mxu0 %vm667_vm1, %v1326_v53  ;;  %1987 = vmatprep.mubr.f32.mxu1 %v10888_v20  ;;  %v1806_v6 = vsel %vm1777_vm2, %v1803_v43, %v1805_v48  ;;  %v1348_v53 = vsel %vm1319_vm3, %v1345_v46, %v1347_v24 }
  0xae   : > { %1529 = vmatprep.mubr.f32.mxu0 %v10888_v20  ;;  %2394 = vmatpush1.msra.mxu0 %v6122_v57  ;;  %v1808_v9 = vsel %vm1777_vm2, %v1805_v48, %v1807_v52  ;;  %v1809_v57 = vrot.slane %v7681_v15, 3  ;;  %v1821_v48 = vrot.slane %v7741_v40, 3 }
  0xb0   : > { %6093 = vmatmul.mubr.msk.f32.gmra.mxu1 %vm667_vm1, %v1786_v60  ;;  %v1350_v60 = vsel %vm1319_vm3, %v1347_v24, %v1349_v56  ;;  %v1810_v12 = vsel %vm1777_vm2, %v1807_v52, %v1809_v57 }
  0xb1   : > { %6053 = vmatmul.mubr.msk.f32.gmra.mxu0 %vm667_vm1, %v1328_v32  ;;  %1993 = vmatprep.mubr.f32.mxu1 %v10888_v20  ;;  %v1811_v32 = vrot.slane %v7691_v22, 3 }
  0xb2   : > { %1535 = vmatprep.mubr.f32.mxu0 %v10888_v20 }
  0xb3   : > { %v1812_v15 = vsel %vm1777_vm2, %v1809_v57, %v1811_v32  ;;  %v1814_v11 = vsel %vm1777_vm2, %v1811_v32, %v1813_v4  ;;  %v1365_v32 = vrot.slane %v7751_v44, 2 }
  0xb4   : > { %6094 = vmatmul.mubr.msk.f32.gmra.mxu1 %vm667_vm1, %v1788_v2  ;;  %v1353_v2 = vrot.slane %v7691_v22, 2 }
  0xb5   : > { %6054 = vmatmul.mubr.msk.f32.gmra.mxu0 %vm667_vm1, %v1330_v7  ;;  %1999 = vmatprep.mubr.f32.mxu1 %v10888_v20 }
  0xb6   : > { %1541 = vmatprep.mubr.f32.mxu0 %v10888_v20  ;;  %v1354_v7 = vsel %vm1319_vm3, %v1351_v62, %v1353_v2  ;;  %v1356_v21 = vsel %vm1319_vm3, %v1353_v2, %v1355_v8 }
  0xb8   : > { %6095 = vmatmul.mubr.msk.f32.gmra.mxu1 %vm667_vm1, %v1790_v35 }
  0xb9   : > { %6055 = vmatmul.mubr.msk.f32.gmra.mxu0 %vm667_vm1, %v1332_v13  ;;  %2005 = vmatprep.mubr.f32.mxu1 %v10888_v20  ;;  %v1815_v13 = vrot.slane %v7711_v29, 3  ;;  %v1358_v29 = vsel %vm1319_vm3, %v1355_v8, %v1357_v26  ;;  %v1825_v8 = vrot.slane %v7761_v47, 3 }
  0xba   : > { %1547 = vmatprep.mubr.f32.mxu0 %v10888_v20 }
  0xbb   : > { %v1818_v38 = vsel %vm1777_vm2, %v1815_v13, %v1817_v30 }
  0xbc   : > { %6096 = vmatmul.mubr.msk.f32.gmra.mxu1 %vm667_vm1, %v1792_v42 }
  0xbd   : > { %6056 = vmatmul.mubr.msk.f32.gmra.mxu0 %vm667_vm1, %v1334_v23  ;;  %2011 = vmatprep.mubr.f32.mxu1 %v10888_v20 }
  0xbe   : > { %1553 = vmatprep.mubr.f32.mxu0 %v10888_v20 }
  0xc0   : > { %6097 = vmatmul.mubr.msk.f32.gmra.mxu1 %vm667_vm1, %v1794_v49 }
  0xc1   : > { %6057 = vmatmul.mubr.msk.f32.gmra.mxu0 %vm667_vm1, %v1336_v28  ;;  %2017 = vmatprep.mubr.f32.mxu1 %v10888_v20  ;;  %v1816_v28 = vsel %vm1777_vm2, %v1813_v4, %v1815_v13 }
  0xc2   : > { %1559 = vmatprep.mubr.f32.mxu0 %v10888_v20 }
  0xc4   : > { %6098 = vmatmul.mubr.msk.f32.gmra.mxu1 %vm667_vm1, %v1796_v54 }
  0xc5   : > { %6058 = vmatmul.mubr.msk.f32.gmra.mxu0 %vm667_vm1, %v1338_v34  ;;  %2023 = vmatprep.mubr.f32.mxu1 %v10888_v20  ;;  %v1359_v34 = vrot.slane %v7721_v33, 2 }
  0xc6   : > { %1565 = vmatprep.mubr.f32.mxu0 %v10888_v20 }
  0xc7   : > { %v1360_v33 = vsel %vm1319_vm3, %v1357_v26, %v1359_v34 }
  0xc8   : > { %6099 = vmatmul.mubr.msk.f32.gmra.mxu1 %vm667_vm1, %v1798_v58 }
  0xc9   : > { %6059 = vmatmul.mubr.msk.f32.gmra.mxu0 %vm667_vm1, %v1340_v18  ;;  %2029 = vmatprep.mubr.f32.mxu1 %v10888_v20 }
  0xca   : > { %1571 = vmatprep.mubr.f32.mxu0 %v10888_v20 }
  0xcc   : > { %6100 = vmatmul.mubr.msk.f32.gmra.mxu1 %vm667_vm1, %v1800_v61  ;;  %v1819_v61 = vrot.slane %v7731_v37, 3  ;;  %v1362_v37 = vsel %vm1319_vm3, %v1359_v34, %v1361_v19 }
  0xcd   : > { %6060 = vmatmul.mubr.msk.f32.gmra.mxu0 %vm667_vm1, %v1342_v41  ;;  %2035 = vmatprep.mubr.f32.mxu1 %v10888_v20 }
  0xce   : > { %1577 = vmatprep.mubr.f32.mxu0 %v10888_v20  ;;  %v1822_v57 = vsel %vm1777_vm2, %v1819_v61, %v1821_v48 }
  0xd0   : > { %6101 = vmatmul.mubr.msk.f32.gmra.mxu1 %vm667_vm1, %v1802_v0 }
  0xd1   : > { %6061 = vmatmul.mubr.msk.f32.gmra.mxu0 %vm667_vm1, %v1344_v45  ;;  %2041 = vmatprep.mubr.f32.mxu1 %v10888_v20 }
  0xd2   : > { %1583 = vmatprep.mubr.f32.mxu0 %v10888_v20 }
  0xd4   : > { %6102 = vmatmul.mubr.msk.f32.gmra.mxu1 %vm667_vm1, %v1804_v3  ;;  %v1820_v3 = vsel %vm1777_vm2, %v1817_v30, %v1819_v61  ;;  %v1369_v30 = vrot.slane %v7771_v51, 2 }
  0xd5   : > { %6062 = vmatmul.mubr.msk.f32.gmra.mxu0 %vm667_vm1, %v1346_v50  ;;  %2047 = vmatprep.mubr.f32.mxu1 %v10888_v20 }
  0xd6   : > { %1589 = vmatprep.mubr.f32.mxu0 %v10888_v20 }
  0xd8   : > { %6103 = vmatmul.mubr.msk.f32.gmra.mxu1 %vm667_vm1, %v1806_v6  ;;  %v1363_v6 = vrot.slane %v7741_v40, 2 }
  0xd9   : > { %6063 = vmatmul.mubr.msk.f32.gmra.mxu0 %vm667_vm1, %v1348_v53  ;;  %2053 = vmatprep.mubr.f32.mxu1 %v10888_v20 }
  0xda   : > { %1595 = vmatprep.mubr.f32.mxu0 %v10888_v20  ;;  %v1364_v40 = vsel %vm1319_vm3, %v1361_v19, %v1363_v6 }
  0xdc   : > { %6104 = vmatmul.mubr.msk.f32.gmra.mxu1 %vm667_vm1, %v1808_v9 }
  0xdd   : > { %6064 = vmatmul.mubr.msk.f32.gmra.mxu0 %vm667_vm1, %v1350_v60  ;;  %2059 = vmatprep.mubr.f32.mxu1 %v10888_v20  ;;  %v1823_v60 = vrot.slane %v7751_v44, 3  ;;  %v1366_v44 = vsel %vm1319_vm3, %v1363_v6, %v1365_v32 }
  0xde   : > { %1601 = vmatprep.mubr.f32.mxu0 %v10888_v20 }
  0xe0   : > { %6105 = vmatmul.mubr.msk.f32.gmra.mxu1 %vm667_vm1, %v1810_v12 }
  0xe1   : > { %6065 = vmatmul.mubr.msk.f32.gmra.mxu0 %vm667_vm1, %v1352_v63  ;;  %2065 = vmatprep.mubr.f32.mxu1 %v10888_v20 }
  0xe2   : > { %1607 = vmatprep.mubr.f32.mxu0 %v10888_v20 }
  0xe4   : > { %v1119_v35 = vpop.f32.mrf.mxu1  ;;  %6106 = vmatmul.mubr.msk.f32.gmra.mxu1 %vm667_vm1, %v1812_v15  ;;  %v798_v22 = vpop.f32.mrf.mxu0 }
  0xe5   : > { %6066 = vmatmul.mubr.msk.f32.gmra.mxu0 %vm667_vm1, %v1354_v7  ;;  %2071 = vmatprep.mubr.f32.mxu1 %v10888_v20  ;;  %v8021_v16 = vadd.f32 %v1119_v35, %v798_v22  ;;  %v1824_v7 = vsel %vm1777_vm2, %v1821_v48, %v1823_v60 }
  0xe6   : > { %v1121_v42 = vpop.f32.mrf.mxu1  ;;  %1613 = vmatprep.mubr.f32.mxu0 %v10888_v20  ;;  %v800_v23 = vpop.f32.mrf.mxu0 }
  0xe7   : > { %v8026_v25 = vadd.f32 %v1121_v42, %v800_v23  ;;  %v1826_v23 = vsel %vm1777_vm2, %v1823_v60, %v1825_v8 }
  0xe8   : > { %v1125_v49 = vpop.f32.mrf.mxu1  ;;  %6107 = vmatmul.mubr.msk.f32.gmra.mxu1 %vm667_vm1, %v1814_v11  ;;  %v1367_v11 = vrot.slane %v7761_v47, 2 }
  0xe9   : > { %v804_v27 = vpop.f32.mrf.mxu0  ;;  %6067 = vmatmul.mubr.msk.f32.gmra.mxu0 %vm667_vm1, %v1356_v21  ;;  %2077 = vmatprep.mubr.f32.mxu1 %v10888_v20 }
  0xea   : > { %v8033_v54 = vadd.f32 %v1125_v49, %v804_v27  ;;  %v1127_v31 = vpop.f32.mrf.mxu1  ;;  %1619 = vmatprep.mubr.f32.mxu0 %v10888_v20  ;;  %v1827_v49 = vrot.slane %v7771_v51, 3  ;;  %v1368_v47 = vsel %vm1319_vm3, %v1365_v32, %v1367_v11  ;;  %v1370_v51 = vsel %vm1319_vm3, %v1367_v11, %v1369_v30 }
  0xeb   : > { %v806_v36 = vpop.f32.mrf.mxu0 }
  0xec   : > { %v8038_v58 = vadd.f32 %v1127_v31, %v806_v36  ;;  %v1131_v17 = vpop.f32.mrf.mxu1  ;;  %6108 = vmatmul.mubr.msk.f32.gmra.mxu1 %vm667_vm1, %v1816_v28 }
  0xed   : > { %v810_v18 = vpop.f32.mrf.mxu0  ;;  %6068 = vmatmul.mubr.msk.f32.gmra.mxu0 %vm667_vm1, %v1358_v29  ;;  %2083 = vmatprep.mubr.f32.mxu1 %v10888_v20 }
  0xee   : > { %v8045_v39 = vadd.f32 %v1131_v17, %v810_v18  ;;  %v1133_v41 = vpop.f32.mrf.mxu1  ;;  %1625 = vmatprep.mubr.f32.mxu0 %v10888_v20  ;;  %v1828_v17 = vsel %vm1777_vm2, %v1825_v8, %v1827_v49  ;;  %v1829_v18 = vrot.slane %v7781_v55, 3 }
  0xef   : > { %v812_v0 = vpop.f32.mrf.mxu0 }
  0xf0   : > { %v8050_v43 = vadd.f32 %v1133_v41, %v812_v0  ;;  %v1137_v45 = vpop.f32.mrf.mxu1  ;;  %6109 = vmatmul.mubr.msk.f32.gmra.mxu1 %vm667_vm1, %v1818_v38  ;;  %v1371_v41 = vrot.slane %v7781_v55, 2 }
  0xf1   : > { %v816_v46 = vpop.f32.mrf.mxu0  ;;  %6069 = vmatmul.mubr.msk.f32.gmra.mxu0 %vm667_vm1, %v1360_v33  ;;  %2089 = vmatprep.mubr.f32.mxu1 %v10888_v20 }
  0xf2   : > { %v8057_v50 = vadd.f32 %v1137_v45, %v816_v46  ;;  %v1139_v24 = vpop.f32.mrf.mxu1  ;;  %1631 = vmatprep.mubr.f32.mxu0 %v10888_v20  ;;  %v1830_v46 = vsel %vm1777_vm2, %v1827_v49, %v1829_v18  ;;  %v1372_v55 = vsel %vm1319_vm3, %v1369_v30, %v1371_v41 }
  0xf3   : > { %v818_v52 = vpop.f32.mrf.mxu0 }
  0xf4   : > { %v8062_v53 = vadd.f32 %v1139_v24, %v818_v52  ;;  %v1143_v56 = vpop.f32.mrf.mxu1  ;;  %6110 = vmatmul.mubr.msk.f32.gmra.mxu1 %vm667_vm1, %v1820_v3  ;;  %v1831_v3 = vrot.slane %v7791_v59, 3 }
  0xf5   : > { %v822_v9 = vpop.f32.mrf.mxu0  ;;  %6070 = vmatmul.mubr.msk.f32.gmra.mxu0 %vm667_vm1, %v1362_v37  ;;  %2095 = vmatprep.mubr.f32.mxu1 %v10888_v20  ;;  %v1373_v37 = vrot.slane %v7791_v59, 2 }
  0xf6   : > { %v8069_v62 = vadd.f32 %v1143_v56, %v822_v9  ;;  %v1145_v12 = vpop.f32.mrf.mxu1  ;;  %1637 = vmatprep.mubr.f32.mxu0 %v10888_v20  ;;  %v1832_v9 = vsel %vm1777_vm2, %v1829_v18, %v1831_v3 }
  0xf7   : > { %v824_v63 = vpop.f32.mrf.mxu0  ;;  %v1374_v59 = vsel %vm1319_vm3, %v1371_v41, %v1373_v37 }
  0xf8   : > { %v8074_v2 = vadd.f32 %v1145_v12, %v824_v63  ;;  %v1149_v15 = vpop.f32.mrf.mxu1  ;;  %6111 = vmatmul.mubr.msk.f32.gmra.mxu1 %vm667_vm1, %v1822_v57  ;;  %v1833_v57 = vrot.slane %v7804_v1, 3 }
  0xf9   : > { %v828_v4 = vpop.f32.mrf.mxu0  ;;  %6071 = vmatmul.mubr.msk.f32.gmra.mxu0 %vm667_vm1, %v1364_v40  ;;  %2101 = vmatprep.mubr.f32.mxu1 %v10888_v20  ;;  %v1375_v40 = vrot.slane %v7804_v1, 2 }
  0xfa   : > { %v8081_v35 = vadd.f32 %v1149_v15, %v828_v4  ;;  %v1151_v22 = vpop.f32.mrf.mxu1  ;;  %1643 = vmatprep.mubr.f32.mxu0 %v10888_v20  ;;  %v1834_v4 = vsel %vm1777_vm2, %v1831_v3, %v1833_v57 }
  0xfb   : > { %v830_v13 = vpop.f32.mrf.mxu0  ;;  %v1376_v1 = vsel %vm1319_vm3, %v1373_v37, %v1375_v40 }
  0xfc   : > { %v8086_v42 = vadd.f32 %v1151_v22, %v830_v13  ;;  %v1155_v21 = vpop.f32.mrf.mxu1  ;;  %6112 = vmatmul.mubr.msk.f32.gmra.mxu1 %vm667_vm1, %v1824_v7  ;;  %v1835_v7 = vrot.slane %v7814_v5, 3 }
  0xfd   : > { %v834_v26 = vpop.f32.mrf.mxu0  ;;  %6072 = vmatmul.mubr.msk.f32.gmra.mxu0 %vm667_vm1, %v1366_v44  ;;  %2107 = vmatprep.mubr.f32.mxu1 %v10888_v20  ;;  %v1377_v44 = vrot.slane %v7814_v5, 2 }
  0xfe   : > { %v8093_v27 = vadd.f32 %v1155_v21, %v834_v26  ;;  %v1157_v28 = vpop.f32.mrf.mxu1  ;;  %1649 = vmatprep.mubr.f32.mxu0 %v10888_v20  ;;  %v1836_v26 = vsel %vm1777_vm2, %v1833_v57, %v1835_v7  ;;  %v7202_v57 = vld [vmem:[%s7484_s24] sm:$0xff] }
  0xff   : > { %v836_v31 = vpop.f32.mrf.mxu0  ;;  %v1378_v5 = vsel %vm1319_vm3, %v1375_v40, %v1377_v44  ;;  %v7203_v40 = vld [vmem:[%s7484_s24 + $0x8] sm:$0xff] }
 0x100   : > { %v8098_v29 = vadd.f32 %v1157_v28, %v836_v31  ;;  %v1161_v34 = vpop.f32.mrf.mxu1  ;;  %6113 = vmatmul.mubr.msk.f32.gmra.mxu1 %vm667_vm1, %v1826_v23  ;;  %v1837_v23 = vrot.slane %v7824_v10, 3 }
 0x101   : > { %v840_v36 = vpop.f32.mrf.mxu0  ;;  %6073 = vmatmul.mubr.msk.f32.gmra.mxu0 %vm667_vm1, %v1368_v47  ;;  %2113 = vmatprep.mubr.f32.mxu1 %v10888_v20  ;;  %v1379_v47 = vrot.slane %v7824_v10, 2 }
 0x102   : > { %v8105_v38 = vadd.f32 %v1161_v34, %v840_v36  ;;  %v1163_v61 = vpop.f32.mrf.mxu1  ;;  %1655 = vmatprep.mubr.f32.mxu0 %v10888_v20  ;;  %v1838_v36 = vsel %vm1777_vm2, %v1835_v7, %v1837_v23 }
 0x103   : > { %v842_v33 = vpop.f32.mrf.mxu0  ;;  %v1380_v10 = vsel %vm1319_vm3, %v1377_v44, %v1379_v47 }
 0x104   : > { %v8110_v19 = vadd.f32 %v1163_v61, %v842_v33  ;;  %v1167_v0 = vpop.f32.mrf.mxu1  ;;  %6114 = vmatmul.mubr.msk.f32.gmra.mxu1 %vm667_vm1, %v1828_v17  ;;  %v1839_v17 = vrot.slane %v7834_v14, 3 }
 0x105   : > { %v846_v45 = vpop.f32.mrf.mxu0  ;;  %6074 = vmatmul.mubr.msk.f32.gmra.mxu0 %vm667_vm1, %v1370_v51  ;;  %2119 = vmatprep.mubr.f32.mxu1 %v10888_v20  ;;  %v1381_v51 = vrot.slane %v7834_v14, 2 }
 0x106   : > { %v8117_v48 = vadd.f32 %v1167_v0, %v846_v45  ;;  %v8119_v24 = vpop.f32.mrf.mxu1  ;;  %1661 = vmatprep.mubr.f32.mxu0 %v10888_v20  ;;  %v1840_v45 = vsel %vm1777_vm2, %v1837_v23, %v1839_v17 }
 0x107   : > { %v8124_v6 = vpop.f32.mrf.mxu0  ;;  %v1382_v14 = vsel %vm1319_vm3, %v1379_v47, %v1381_v51 }
 0x108   : > { %v1173_v52 = vpop.f32.mrf.mxu1  ;;  %6115 = vmatmul.mubr.msk.f32.gmra.mxu1 %vm667_vm1, %v1830_v46 }
 0x109   : > { %v852_v56 = vpop.f32.mrf.mxu0  ;;  %6075 = vmatmul.mubr.msk.f32.gmra.mxu0 %vm667_vm1, %v1372_v55  ;;  %2125 = vmatprep.mubr.f32.mxu1 %v10888_v20 }
 0x10a   : > { %v8131_v60 = vadd.f32 %v1173_v52, %v852_v56  ;;  %v8133_v12 = vpop.f32.mrf.mxu1  ;;  %1667 = vmatprep.mubr.f32.mxu0 %v10888_v20 }
 0x10b   : > { %10903 = vst [vmem:[#allocation11_spill] sm:$0xff] %v8133_v12  ;;  %v8138_v32 = vpop.f32.mrf.mxu0 }
 0x10c   : > { %10904 = vst [vmem:[#allocation12_spill] sm:$0xff] %v8138_v32  ;;  %v1179_v63 = vpop.f32.mrf.mxu1  ;;  %6116 = vmatmul.mubr.msk.f32.gmra.mxu1 %vm667_vm1, %v1832_v9 }
 0x10d   : > { %v858_v15 = vpop.f32.mrf.mxu0  ;;  %6076 = vmatmul.mubr.msk.f32.gmra.mxu0 %vm667_vm1, %v1374_v59  ;;  %2131 = vmatprep.mubr.f32.mxu1 %v10888_v20  ;;  %v2236_v59 = vrot.slane %v7202_v57, 4 }
 0x10e   : > { %v8145_v8 = vadd.f32 %v1179_v63, %v858_v15  ;;  %v8147_v22 = vpop.f32.mrf.mxu1  ;;  %1673 = vmatprep.mubr.f32.mxu0 %v10888_v20  ;;  %v2237_v63 = vrot.slane %v7203_v40, 4 }
 0x10f   : > { %10905 = vst [vmem:[#allocation13_spill] sm:$0xff] %v8147_v22  ;;  %v8152_v11 = vpop.f32.mrf.mxu0 }
 0x110   : > { %10906 = vst [vmem:[#allocation14_spill] sm:$0xff] %v8152_v11  ;;  %v1185_v13 = vpop.f32.mrf.mxu1  ;;  %6117 = vmatmul.mubr.msk.f32.gmra.mxu1 %vm667_vm1, %v1834_v4 }
 0x111   : > { %v864_v21 = vpop.f32.mrf.mxu0  ;;  %6077 = vmatmul.mubr.msk.f32.gmra.mxu0 %vm667_vm1, %v1376_v1  ;;  %2137 = vmatprep.mubr.f32.mxu1 %v10888_v20 }
 0x112   : > { %v8159_v49 = vadd.f32 %v1185_v13, %v864_v21  ;;  %v8161_v28 = vpop.f32.mrf.mxu1  ;;  %1679 = vmatprep.mubr.f32.mxu0 %v10888_v20  ;;  %v2238_v13 = vsel %vm2235_vm4, %v2236_v59, %v2237_v63  ;;  %v7204_v21 = vld [vmem:[%s7484_s24 + $0x10] sm:$0xff] }
 0x113   : > { %10907 = vst [vmem:[#allocation15_spill] sm:$0xff] %v8161_v28  ;;  %v8166_v30 = vpop.f32.mrf.mxu0  ;;  %v7225_v28 = vld [vmem:[%s7484_s24 + $0xb8] sm:$0xff] }
 0x114   : > { %10908 = vst [vmem:[#allocation16_spill] sm:$0xff] %v8166_v30  ;;  %v1191_v31 = vpop.f32.mrf.mxu1  ;;  %6118 = vmatmul.mubr.msk.f32.gmra.mxu1 %vm667_vm1, %v1836_v26  ;;  %v2239_v26 = vrot.slane %v7204_v21, 4  ;;  %v7207_v21 = vld [vmem:[%s7484_s24 + $0x28] sm:$0xff] }
 0x115   : > { %v870_v34 = vpop.f32.mrf.mxu0  ;;  %6078 = vmatmul.mubr.msk.f32.gmra.mxu0 %vm667_vm1, %v1378_v5  ;;  %2143 = vmatprep.mubr.f32.mxu1 %v10888_v20 }
 0x116   : > { %v8173_v18 = vadd.f32 %v1191_v31, %v870_v34  ;;  %v8175_v61 = vpop.f32.mrf.mxu1  ;;  %1685 = vmatprep.mubr.f32.mxu0 %v10888_v20 }
 0x117   : > { %10909 = vst [vmem:[#allocation17_spill] sm:$0xff] %v8175_v61  ;;  %v8180_v41 = vpop.f32.mrf.mxu0  ;;  %v7223_v61 = vld [vmem:[%s7484_s24 + $0xa8] sm:$0xff] }
 0x118   : > { %10910 = vst [vmem:[#allocation18_spill] sm:$0xff] %v8180_v41  ;;  %v1197_v33 = vpop.f32.mrf.mxu1  ;;  %6119 = vmatmul.mubr.msk.f32.gmra.mxu1 %vm667_vm1, %v1838_v36  ;;  %v2240_v36 = vsel %vm2235_vm4, %v2237_v63, %v2239_v26  ;;  %v7224_v41 = vld [vmem:[%s7484_s24 + $0xb0] sm:$0xff] }
 0x119   : > { %v876_v0 = vpop.f32.mrf.mxu0  ;;  %6079 = vmatmul.mubr.msk.f32.gmra.mxu0 %vm667_vm1, %v1380_v10  ;;  %2149 = vmatprep.mubr.f32.mxu1 %v10888_v20 }
 0x11a   : > { %v8186_v46 = vadd.f32 %v1197_v33, %v876_v0  ;;  %v8188_v3 = vpop.f32.mrf.mxu1  ;;  %1691 = vmatprep.mubr.f32.mxu0 %v10888_v20 }
 0x11b   : > { %10911 = vst [vmem:[#allocation19_spill] sm:$0xff] %v8188_v3  ;;  %v8192_v55 = vpop.f32.mrf.mxu0 }
 0x11c   : > { %10912 = vst [vmem:[#allocation20_spill] sm:$0xff] %v8192_v55  ;;  %v1203_v37 = vpop.f32.mrf.mxu1  ;;  %6120 = vmatmul.mubr.msk.f32.gmra.mxu1 %vm667_vm1, %v1840_v45  ;;  %v7222_v55 = vld [vmem:[%s7484_s24 + $0xa0] sm:$0xff] }
 0x11d   : > { %v882_v52 = vpop.f32.mrf.mxu0  ;;  %6080 = vmatmul.mubr.msk.f32.gmra.mxu0 %vm667_vm1, %v1382_v14  ;;  %2155 = vmatprep.mubr.f32.mxu1 %v10888_v20 }
 0x11e   : > { %v8197_v56 = vadd.f32 %v1203_v37, %v882_v52  ;;  %v8199_v9 = vpop.f32.mrf.mxu1  ;;  %1697 = vmatprep.mubr.f32.mxu0 %v10888_v20  ;;  %v7206_v52 = vld [vmem:[%s7484_s24 + $0x20] sm:$0xff] }
 0x11f   : > { %10913 = vst [vmem:[#allocation21_spill] sm:$0xff] %v8199_v9  ;;  %v8204_v15 = vpop.f32.mrf.mxu0  ;;  %v2243_v57 = vrot.slane %v7206_v52, 4 }
 0x120   : > { %10914 = vst [vmem:[#allocation22_spill] sm:$0xff] %v8204_v15  ;;  %v1209_v4 = vpop.f32.mrf.mxu1  ;;  %6121 = vmatmul.mubr.msk.f32.gmra.mxu1 %vm667_vm1, %v1839_v17  ;;  %v7205_v17 = vld [vmem:[%s7484_s24 + $0x18] sm:$0xff] }
 0x121   : > { %v888_v7 = vpop.f32.mrf.mxu0  ;;  %6081 = vmatmul.mubr.msk.f32.gmra.mxu0 %vm667_vm1, %v1381_v51  ;;  %v2241_v10 = vrot.slane %v7205_v17, 4 }
 0x122   : > { %v8208_v1 = vadd.f32 %v1209_v4, %v888_v7  ;;  %v8210_v44 = vpop.f32.mrf.mxu1  ;;  %2427 = vmatprep.mubr.f32.mxu0 %v10888_v20 }
 0x123   : > { %10915 = vst [vmem:[#allocation23_spill] sm:$0xff] %v8210_v44  ;;  %v8215_v23 = vpop.f32.mrf.mxu0  ;;  %v2242_v37 = vsel %vm2235_vm4, %v2239_v26, %v2241_v10 }
 0x124   : > { %10916 = vst [vmem:[#allocation24_spill] sm:$0xff] %v8215_v23  ;;  %v1215_v5 = vpop.f32.mrf.mxu1 }
 0x125   : > { %v894_v47 = vpop.f32.mrf.mxu0  ;;  %6130 = vmatmul.mubr.msk.f32.vlgmr.msra.gmra.mxu0 %vm667_vm1, %v2238_v13  ;;  %v2244_v13 = vsel %vm2235_vm4, %v2241_v10, %v2243_v57 }
 0x126   : > { %v8218_v31 = vadd.f32 %v1215_v5, %v894_v47  ;;  %v8220_v34 = vpop.f32.mrf.mxu1  ;;  %2433 = vmatprep.mubr.f32.mxu0 %v10888_v20  ;;  %v2245_v5 = vrot.slane %v7207_v21, 4 }
 0x127   : > { %10917 = vst [vmem:[#allocation25_spill] sm:$0xff] %v8220_v34  ;;  %v8225_v51 = vpop.f32.mrf.mxu0 }
 0x128   : > { %10918 = vst [vmem:[#allocation26_spill] sm:$0xff] %v8225_v51  ;;  %v1221_v33 = vpop.f32.mrf.mxu1 }
 0x129   : > { %v900_v0 = vpop.f32.mrf.mxu0  ;;  %6131 = vmatmul.mubr.msk.f32.gmra.mxu0 %vm667_vm1, %v2240_v36 }
 0x12a   : > { %v8228_v45 = vadd.f32 %v1221_v33, %v900_v0  ;;  %v8230_v14 = vpop.f32.mrf.mxu1  ;;  %2439 = vmatprep.mubr.f32.mxu0 %v10888_v20  ;;  %v2246_v0 = vsel %vm2235_vm4, %v2243_v57, %v2245_v5 }
 0x12b   : > { %10919 = vst [vmem:[#allocation27_spill] sm:$0xff] %v8230_v14  ;;  %v8235_v59 = vpop.f32.mrf.mxu0 }
 0x12c   : > { %10920 = vst [vmem:[#allocation28_spill] sm:$0xff] %v8235_v59  ;;  %v1227_v40 = vpop.f32.mrf.mxu1 }
 0x12d   : > { %v906_v63 = vpop.f32.mrf.mxu0  ;;  %6132 = vmatmul.mubr.msk.f32.gmra.mxu0 %vm667_vm1, %v2242_v37  ;;  %v7208_v37 = vld [vmem:[%s7484_s24 + $0x30] sm:$0xff] }
 0x12e   : > { %v8238_v4 = vadd.f32 %v1227_v40, %v906_v63  ;;  %v8240_v7 = vpop.f32.mrf.mxu1  ;;  %2445 = vmatprep.mubr.f32.mxu0 %v10888_v20  ;;  %v2247_v52 = vrot.slane %v7208_v37, 4 }
 0x12f   : > { %10921 = vst [vmem:[#allocation29_spill] sm:$0xff] %v8240_v7  ;;  %v8245_v26 = vpop.f32.mrf.mxu0 }
 0x130   : > { %10922 = vst [vmem:[#allocation30_spill] sm:$0xff] %v8245_v26  ;;  %v1233_v47 = vpop.f32.mrf.mxu1 }
 0x131   : > { %v912_v36 = vpop.f32.mrf.mxu0  ;;  %6133 = vmatmul.mubr.msk.f32.gmra.mxu0 %vm667_vm1, %v2244_v13 }
 0x132   : > { %v8248_v17 = vadd.f32 %v1233_v47, %v912_v36  ;;  %v8250_v33 = vpop.f32.mrf.mxu1  ;;  %2451 = vmatprep.mubr.f32.mxu0 %v10888_v20  ;;  %v2248_v47 = vsel %vm2235_vm4, %v2245_v5, %v2247_v52  ;;  %v7209_v36 = vld [vmem:[%s7484_s24 + $0x38] sm:$0xff] }
 0x133   : > { %10923 = vst [vmem:[#allocation31_spill] sm:$0xff] %v8250_v33  ;;  %v8255_v10 = vpop.f32.mrf.mxu0  ;;  %v2249_v33 = vrot.slane %v7209_v36, 4 }
 0x134   : > { %10924 = vst [vmem:[#allocation32_spill] sm:$0xff] %v8255_v10  ;;  %v1239_v40 = vpop.f32.mrf.mxu1 }
 0x135   : > { %v918_v63 = vpop.f32.mrf.mxu0  ;;  %6134 = vmatmul.mubr.msk.f32.gmra.mxu0 %vm667_vm1, %v2246_v0 }
 0x136   : > { %v8258_v21 = vadd.f32 %v1239_v40, %v918_v63  ;;  %v8260_v13 = vpop.f32.mrf.mxu1  ;;  %2457 = vmatprep.mubr.f32.mxu0 %v10888_v20  ;;  %v2250_v40 = vsel %vm2235_vm4, %v2247_v52, %v2249_v33  ;;  %v7210_v63 = vld [vmem:[%s7484_s24 + $0x40] sm:$0xff] }
 0x137   : > { %10925 = vst [vmem:[#allocation33_spill] sm:$0xff] %v8260_v13  ;;  %v8265_v57 = vpop.f32.mrf.mxu0  ;;  %v2251_v13 = vrot.slane %v7210_v63, 4 }
 0x138   : > { %10926 = vst [vmem:[#allocation34_spill] sm:$0xff] %v8265_v57  ;;  %v1245_v37 = vpop.f32.mrf.mxu1 }
 0x139   : > { %v924_v7 = vpop.f32.mrf.mxu0  ;;  %6135 = vmatmul.mubr.msk.f32.gmra.mxu0 %vm667_vm1, %v2248_v47 }
 0x13a   : > { %v8268_v10 = vadd.f32 %v1245_v37, %v924_v7  ;;  %v8270_v0 = vpop.f32.mrf.mxu1  ;;  %2463 = vmatprep.mubr.f32.mxu0 %v10888_v20  ;;  %v2252_v7 = vsel %vm2235_vm4, %v2249_v33, %v2251_v13  ;;  %v7211_v37 = vld [vmem:[%s7484_s24 + $0x48] sm:$0xff] }
 0x13b   : > { %10927 = vst [vmem:[#allocation35_spill] sm:$0xff] %v8270_v0  ;;  %v8275_v5 = vpop.f32.mrf.mxu0  ;;  %v2253_v0 = vrot.slane %v7211_v37, 4 }
 0x13c   : > { %10928 = vst [vmem:[#allocation36_spill] sm:$0xff] %v8275_v5  ;;  %v1251_v36 = vpop.f32.mrf.mxu1 }
 0x13d   : > { %v930_v26 = vpop.f32.mrf.mxu0  ;;  %6136 = vmatmul.mubr.msk.f32.gmra.mxu0 %vm667_vm1, %v2250_v40 }
 0x13e   : > { %v8278_v57 = vadd.f32 %v1251_v36, %v930_v26  ;;  %v8280_v47 = vpop.f32.mrf.mxu1  ;;  %2469 = vmatprep.mubr.f32.mxu0 %v10888_v20  ;;  %v2254_v26 = vsel %vm2235_vm4, %v2251_v13, %v2253_v0  ;;  %v7212_v36 = vld [vmem:[%s7484_s24 + $0x50] sm:$0xff] }
 0x13f   : > { %10929 = vst [vmem:[#allocation37_spill] sm:$0xff] %v8280_v47  ;;  %v8285_v52 = vpop.f32.mrf.mxu0  ;;  %v2255_v47 = vrot.slane %v7212_v36, 4 }
 0x140   : > { %10930 = vst [vmem:[#allocation38_spill] sm:$0xff] %v8285_v52  ;;  %v1257_v63 = vpop.f32.mrf.mxu1 }
 0x141   : > { %v936_v14 = vpop.f32.mrf.mxu0  ;;  %6137 = vmatmul.mubr.msk.f32.gmra.mxu0 %vm667_vm1, %v2252_v7 }
 0x142   : > { %v8288_v5 = vadd.f32 %v1257_v63, %v936_v14  ;;  %v8290_v40 = vpop.f32.mrf.mxu1  ;;  %2475 = vmatprep.mubr.f32.mxu0 %v10888_v20  ;;  %v2256_v14 = vsel %vm2235_vm4, %v2253_v0, %v2255_v47  ;;  %v7213_v63 = vld [vmem:[%s7484_s24 + $0x58] sm:$0xff] }
 0x143   : > { %10931 = vst [vmem:[#allocation39_spill] sm:$0xff] %v8290_v40  ;;  %v8295_v33 = vpop.f32.mrf.mxu0  ;;  %v2257_v40 = vrot.slane %v7213_v63, 4 }
 0x144   : > { %10932 = vst [vmem:[#allocation40_spill] sm:$0xff] %v8295_v33  ;;  %v1263_v37 = vpop.f32.mrf.mxu1 }
 0x145   : > { %v942_v59 = vpop.f32.mrf.mxu0  ;;  %6138 = vmatmul.mubr.msk.f32.gmra.mxu0 %vm667_vm1, %v2254_v26 }
 0x146   : > { %v8298_v52 = vadd.f32 %v1263_v37, %v942_v59  ;;  %v8300_v7 = vpop.f32.mrf.mxu1  ;;  %2481 = vmatprep.mubr.f32.mxu0 %v10888_v20  ;;  %v2258_v59 = vsel %vm2235_vm4, %v2255_v47, %v2257_v40  ;;  %v7214_v37 = vld [vmem:[%s7484_s24 + $0x60] sm:$0xff] }
 0x147   : > { %10933 = vst [vmem:[#allocation41_spill] sm:$0xff] %v8300_v7  ;;  %v8305_v13 = vpop.f32.mrf.mxu0  ;;  %v2259_v7 = vrot.slane %v7214_v37, 4 }
 0x148   : > { %10934 = vst [vmem:[#allocation42_spill] sm:$0xff] %v8305_v13  ;;  %v1269_v36 = vpop.f32.mrf.mxu1 }
 0x149   : > { %v948_v34 = vpop.f32.mrf.mxu0  ;;  %6139 = vmatmul.mubr.msk.f32.gmra.mxu0 %vm667_vm1, %v2256_v14 }
 0x14a   : > { %v8308_v33 = vadd.f32 %v1269_v36, %v948_v34  ;;  %v8310_v26 = vpop.f32.mrf.mxu1  ;;  %2487 = vmatprep.mubr.f32.mxu0 %v10888_v20  ;;  %v2260_v34 = vsel %vm2235_vm4, %v2257_v40, %v2259_v7  ;;  %v7215_v36 = vld [vmem:[%s7484_s24 + $0x68] sm:$0xff] }
 0x14b   : > { %10935 = vst [vmem:[#allocation43_spill] sm:$0xff] %v8310_v26  ;;  %v8315_v0 = vpop.f32.mrf.mxu0  ;;  %v2261_v26 = vrot.slane %v7215_v36, 4 }
 0x14c   : > { %10936 = vst [vmem:[#allocation44_spill] sm:$0xff] %v8315_v0  ;;  %v1275_v63 = vpop.f32.mrf.mxu1 }
 0x14d   : > { %v954_v51 = vpop.f32.mrf.mxu0  ;;  %6140 = vmatmul.mubr.msk.f32.gmra.mxu0 %vm667_vm1, %v2258_v59  ;;  %v2839_v59 = vld [vmem:[%s10868_s3 + $0x78] sm:$0xff]  ;;  %v2262_v40 = vsel %vm2235_vm4, %v2259_v7, %v2261_v26  ;;  %v2837_v7 = vld [vmem:[%s10868_s3 + $0x68] sm:$0xff] }
 0x14e   : > { %v8318_v13 = vadd.f32 %v1275_v63, %v954_v51  ;;  %v8320_v14 = vpop.f32.mrf.mxu1  ;;  %2493 = vmatprep.mubr.f32.mxu0 %v10888_v20  ;;  %2943 = vmatpush1.msra.mxu1 %v2839_v59 }
 0x14f   : > { %10937 = vst [vmem:[#allocation45_spill] sm:$0xff] %v8320_v14  ;;  %v8325_v47 = vpop.f32.mrf.mxu0  ;;  %v7216_v14 = vld [vmem:[%s7484_s24 + $0x70] sm:$0xff]  ;;  %2944 = vmatprep.subr.mxu1 %v10888_v20 }
 0x150   : > { %10938 = vst [vmem:[#allocation46_spill] sm:$0xff] %v8325_v47  ;;  %v1281_v37 = vpop.f32.mrf.mxu1  ;;  %v2263_v36 = vrot.slane %v7216_v14, 4 }
 0x151   : > { %v960_v44 = vpop.f32.mrf.mxu0  ;;  %6141 = vmatmul.mubr.msk.f32.gmra.mxu0 %vm667_vm1, %v2260_v34  ;;  %v2838_v34 = vld [vmem:[%s10868_s3 + $0x70] sm:$0xff] }
 0x152   : > { %v8331_v51 = vadd.f32 %v1281_v37, %v960_v44  ;;  %v8333_v63 = vpop.f32.mrf.mxu1  ;;  %2499 = vmatprep.mubr.f32.mxu0 %v10888_v20  ;;  %2945 = vmatpush1.msra.mxu1 %v2838_v34 }
 0x153   : > { %10939 = vst [vmem:[#allocation47_spill] sm:$0xff] %v8333_v63  ;;  %v8338_v47 = vpop.f32.mrf.mxu0  ;;  %2946 = vmatprep.subr.mxu1 %v10888_v20  ;;  %v2264_v63 = vsel %vm2235_vm4, %v2261_v26, %v2263_v36  ;;  %v2835_v26 = vld [vmem:[%s10868_s3 + $0x58] sm:$0xff] }
 0x154   : > { %10940 = vst [vmem:[#allocation48_spill] sm:$0xff] %v8338_v47  ;;  %v1287_v44 = vpop.f32.mrf.mxu1  ;;  %v7217_v47 = vld [vmem:[%s7484_s24 + $0x78] sm:$0xff]  ;;  %2947 = vmatpush1.msra.mxu1 %v2837_v7 }
 0x155   : > { %v966_v37 = vpop.f32.mrf.mxu0  ;;  %6142 = vmatmul.mubr.msk.f32.gmra.mxu0 %vm667_vm1, %v2262_v40  ;;  %v2265_v34 = vrot.slane %v7217_v47, 4  ;;  %2948 = vmatprep.subr.mxu1 %v10888_v20  ;;  %v2836_v40 = vld [vmem:[%s10868_s3 + $0x60] sm:$0xff] }
 0x156   : > { %v8349_v14 = vadd.f32 %v1287_v44, %v966_v37  ;;  %v8351_v59 = vpop.f32.mrf.mxu1  ;;  %2505 = vmatprep.mubr.f32.mxu0 %v10888_v20  ;;  %2949 = vmatpush1.msra.mxu1 %v2836_v40 }
 0x157   : > { %10941 = vst [vmem:[#allocation49_spill] sm:$0xff] %v8351_v59  ;;  %v8356_v0 = vpop.f32.mrf.mxu0  ;;  %2950 = vmatprep.subr.mxu1 %v10888_v20  ;;  %v2266_v59 = vsel %vm2235_vm4, %v2263_v36, %v2265_v34 }
 0x158   : > { %10942 = vst [vmem:[#allocation50_spill] sm:$0xff] %v8356_v0  ;;  %v1293_v44 = vpop.f32.mrf.mxu1  ;;  %v7218_v0 = vld [vmem:[%s7484_s24 + $0x80] sm:$0xff]  ;;  %2951 = vmatpush1.msra.mxu1 %v2835_v26 }
 0x159   : > { %v972_v37 = vpop.f32.mrf.mxu0  ;;  %6143 = vmatmul.mubr.msk.f32.gmra.mxu0 %vm667_vm1, %v2264_v63  ;;  %v2267_v40 = vrot.slane %v7218_v0, 4  ;;  %2952 = vmatprep.subr.mxu1 %v10888_v20  ;;  %v2834_v63 = vld [vmem:[%s10868_s3 + $0x50] sm:$0xff]  ;;  %v2833_v0 = vld [vmem:[%s10868_s3 + $0x48] sm:$0xff] }
 0x15a   : > { %v8367_v47 = vadd.f32 %v1293_v44, %v972_v37  ;;  %v8369_v7 = vpop.f32.mrf.mxu1  ;;  %2511 = vmatprep.mubr.f32.mxu0 %v10888_v20  ;;  %2953 = vmatpush1.msra.mxu1 %v2834_v63 }
 0x15b   : > { %10943 = vst [vmem:[#allocation51_spill] sm:$0xff] %v8369_v7  ;;  %v8374_v23 = vpop.f32.mrf.mxu0  ;;  %2954 = vmatprep.subr.mxu1 %v10888_v20  ;;  %v2268_v7 = vsel %vm2235_vm4, %v2265_v34, %v2267_v40 }
 0x15c   : > { %10944 = vst [vmem:[#allocation52_spill] sm:$0xff] %v8374_v23  ;;  %v1299_v44 = vpop.f32.mrf.mxu1  ;;  %v7219_v23 = vld [vmem:[%s7484_s24 + $0x88] sm:$0xff]  ;;  %2955 = vmatpush1.msra.mxu1 %v2833_v0 }
 0x15d   : > { %v978_v37 = vpop.f32.mrf.mxu0  ;;  %6144 = vmatmul.mubr.msk.f32.gmra.mxu0 %vm667_vm1, %v2266_v59  ;;  %v2269_v63 = vrot.slane %v7219_v23, 4  ;;  %2956 = vmatprep.subr.mxu1 %v10888_v20  ;;  %v2832_v59 = vld [vmem:[%s10868_s3 + $0x40] sm:$0xff]  ;;  %v2831_v23 = vld [vmem:[%s10868_s3 + $0x38] sm:$0xff] }
 0x15e   : > { %v8385_v36 = vadd.f32 %v1299_v44, %v978_v37  ;;  %v8387_v26 = vpop.f32.mrf.mxu1  ;;  %2517 = vmatprep.mubr.f32.mxu0 %v10888_v20  ;;  %2957 = vmatpush1.msra.mxu1 %v2832_v59 }
 0x15f   : > { %10945 = vst [vmem:[#allocation53_spill] sm:$0xff] %v8387_v26  ;;  %v8392_v9 = vpop.f32.mrf.mxu0  ;;  %2958 = vmatprep.subr.mxu1 %v10888_v20  ;;  %v2270_v26 = vsel %vm2235_vm4, %v2267_v40, %v2269_v63 }
 0x160   : > { %10946 = vst [vmem:[#allocation54_spill] sm:$0xff] %v8392_v9  ;;  %v1305_v44 = vpop.f32.mrf.mxu1  ;;  %v7220_v9 = vld [vmem:[%s7484_s24 + $0x90] sm:$0xff]  ;;  %2959 = vmatpush1.msra.mxu1 %v2831_v23 }
 0x161   : > { %v984_v37 = vpop.f32.mrf.mxu0  ;;  %6145 = vmatmul.mubr.msk.f32.gmra.mxu0 %vm667_vm1, %v2268_v7  ;;  %v2271_v59 = vrot.slane %v7220_v9, 4  ;;  %2960 = vmatprep.subr.mxu1 %v10888_v20  ;;  %v2830_v7 = vld [vmem:[%s10868_s3 + $0x30] sm:$0xff]  ;;  %v2829_v9 = vld [vmem:[%s10868_s3 + $0x28] sm:$0xff] }
 0x162   : > { %v8403_v34 = vadd.f32 %v1305_v44, %v984_v37  ;;  %v8405_v0 = vpop.f32.mrf.mxu1  ;;  %2523 = vmatprep.mubr.f32.mxu0 %v10888_v20  ;;  %2961 = vmatpush1.msra.mxu1 %v2830_v7 }
 0x163   : > { %10947 = vst [vmem:[#allocation55_spill] sm:$0xff] %v8405_v0  ;;  %v8410_v15 = vpop.f32.mrf.mxu0  ;;  %2962 = vmatprep.subr.mxu1 %v10888_v20  ;;  %v2272_v23 = vsel %vm2235_vm4, %v2269_v63, %v2271_v59  ;;  %v7221_v0 = vld [vmem:[%s7484_s24 + $0x98] sm:$0xff] }
 0x164   : > { %10948 = vst [vmem:[#allocation56_spill] sm:$0xff] %v8410_v15  ;;  %v8416_v44 = vpop.f32.mrf.mxu1  ;;  %v2273_v15 = vrot.slane %v7221_v0, 4  ;;  %2963 = vmatpush1.msra.mxu1 %v2829_v9  ;;  %v2827_v63 = vld [vmem:[%s10868_s3 + $0x18] sm:$0xff] }
 0x165   : > { %v1513_v37 = vpop.f32.mrf.mxu0  ;;  %6146 = vmatmul.mubr.msk.f32.gmra.mxu0 %vm667_vm1, %v2270_v26  ;;  %2964 = vmatprep.subr.mxu1 %v10888_v20  ;;  %v2828_v26 = vld [vmem:[%s10868_s3 + $0x20] sm:$0xff] }
 0x166   : > { %v8424_v40 = vadd.f32 %v1513_v37, %v8021_v16  ;;  %2529 = vmatprep.mubr.f32.mxu0 %v10888_v20  ;;  %v8429_v3 = vpop.f32.mrf.mxu1  ;;  %2965 = vmatpush1.msra.mxu1 %v2828_v26  ;;  %v2274_v9 = vsel %vm2235_vm4, %v2271_v59, %v2273_v15 }
 0x167   : > { %v1515_v7 = vpop.f32.mrf.mxu0  ;;  %2966 = vmatprep.subr.mxu1 %v10888_v20 }
 0x168   : > { %v8436_v16 = vadd.f32 %v1515_v7, %v8026_v25  ;;  %v2275_v25 = vrot.slane %v7222_v55, 4  ;;  %2967 = vmatpush1.msra.mxu1 %v2827_v63  ;;  %v8449_v26 = vpop.f32.mrf.mxu1  ;;  %v2825_v55 = vld [vmem:[%s10868_s3 + $0x8] sm:$0xff] }
 0x169   : > { %v1519_v37 = vpop.f32.mrf.mxu0  ;;  %6147 = vmatmul.mubr.msk.f32.gmra.mxu0 %vm667_vm1, %v2272_v23  ;;  %2968 = vmatprep.subr.mxu1 %v10888_v20  ;;  %v2826_v23 = vld [vmem:[%s10868_s3 + $0x10] sm:$0xff] }
 0x16a   : > { %v8444_v0 = vadd.f32 %v1519_v37, %v8033_v54  ;;  %2535 = vmatprep.mubr.f32.mxu0 %v10888_v20  ;;  %2969 = vmatpush1.msra.mxu1 %v2826_v23  ;;  %v2276_v63 = vsel %vm2235_vm4, %v2273_v15, %v2275_v25  ;;  %v2824_v23 = vld [vmem:[%s10868_s3] sm:$0xff] }
 0x16b   : > { %v1521_v7 = vpop.f32.mrf.mxu0  ;;  %2970 = vmatprep.subr.mxu1 %v10888_v20 }
 0x16c   : > { %v8456_v54 = vadd.f32 %v1521_v7, %v8038_v58  ;;  %v2277_v58 = vrot.slane %v7223_v61, 4  ;;  %2971 = vmatpush1.msra.mxu1 %v2825_v55  ;;  %v8469_v7 = vpop.f32.mrf.mxu1  ;;  %v2844_v61 = vld [vmem:[%s10868_s3 + $0xa0] sm:$0xff] }
 0x16d   : > { %v1525_v37 = vpop.f32.mrf.mxu0  ;;  %6148 = vmatmul.mubr.msk.f32.gmra.mxu0 %vm667_vm1, %v2274_v9  ;;  %2972 = vmatprep.subr.mxu1 %v10888_v20 }
 0x16e   : > { %v8464_v59 = vadd.f32 %v1525_v37, %v8045_v39  ;;  %2541 = vmatprep.mubr.f32.mxu0 %v10888_v20  ;;  %2973 = vmatpush1.msra.mxu1 %v2824_v23  ;;  %v2278_v55 = vsel %vm2235_vm4, %v2275_v25, %v2277_v58  ;;  %v2843_v23 = vld [vmem:[%s10868_s3 + $0x98] sm:$0xff] }
 0x16f   : > { %v1527_v9 = vpop.f32.mrf.mxu0  ;;  %2996 = vmatprep.subr.mxu1 %v10888_v20 }
 0x170   : > { %v8476_v39 = vadd.f32 %v1527_v9, %v8050_v43  ;;  %v2279_v43 = vrot.slane %v7224_v41, 4  ;;  %2997 = vmatpush2.msra.mxu1 %v2844_v61  ;;  %v8489_v9 = vpop.f32.mrf.mxu1  ;;  %v2842_v41 = vld [vmem:[%s10868_s3 + $0x90] sm:$0xff] }
 0x171   : > { %v1531_v37 = vpop.f32.mrf.mxu0  ;;  %6149 = vmatmul.mubr.msk.f32.gmra.mxu0 %vm667_vm1, %v2276_v63  ;;  %2998 = vmatprep.subr.mxu1 %v10888_v20 }
 0x172   : > { %v8484_v15 = vadd.f32 %v1531_v37, %v8057_v50  ;;  %2547 = vmatprep.mubr.f32.mxu0 %v10888_v20  ;;  %2999 = vmatpush2.msra.mxu1 %v2843_v23  ;;  %v2280_v61 = vsel %vm2235_vm4, %v2277_v58, %v2279_v43  ;;  %v2841_v23 = vld [vmem:[%s10868_s3 + $0x88] sm:$0xff] }
 0x173   : > { %v1533_v63 = vpop.f32.mrf.mxu0  ;;  %3000 = vmatprep.subr.mxu1 %v10888_v20 }
 0x174   : > { %v8496_v50 = vadd.f32 %v1533_v63, %v8062_v53  ;;  %v2281_v53 = vrot.slane %v7225_v28, 4  ;;  %3001 = vmatpush2.msra.mxu1 %v2842_v41  ;;  %v8509_v63 = vpop.f32.mrf.mxu1  ;;  %v2840_v28 = vld [vmem:[%s10868_s3 + $0x80] sm:$0xff] }
 0x175   : > { %v1537_v37 = vpop.f32.mrf.mxu0  ;;  %6150 = vmatmul.mubr.msk.f32.gmra.mxu0 %vm667_vm1, %v2278_v55  ;;  %3002 = vmatprep.subr.mxu1 %v10888_v20 }
 0x176   : > { %v8504_v25 = vadd.f32 %v1537_v37, %v8069_v62  ;;  %2553 = vmatprep.mubr.f32.mxu0 %v10888_v20  ;;  %3003 = vmatpush2.msra.mxu1 %v2841_v23  ;;  %v2282_v41 = vsel %vm2235_vm4, %v2279_v43, %v2281_v53  ;;  %v8529_v23 = vpop.f32.mrf.mxu1 }
 0x177   : > { %v1539_v55 = vpop.f32.mrf.mxu0  ;;  %3004 = vmatprep.subr.mxu1 %v10888_v20 }
 0x178   : > { %v8516_v62 = vadd.f32 %v1539_v55, %v8074_v2  ;;  %v7226_v2 = vld [vmem:[%s7484_s24 + $0xc0] sm:$0xff]  ;;  %3005 = vmatpush2.msra.mxu1 %v2840_v28  ;;  %v8541_v28 = vpop.f32.mrf.mxu1 }
 0x179   : > { %v1543_v37 = vpop.f32.mrf.mxu0  ;;  %6151 = vmatmul.mubr.msk.f32.gmra.mxu0 %vm667_vm1, %v2280_v61  ;;  %v2283_v55 = vrot.slane %v7226_v2, 4 }
 0x17a   : > { %v8524_v58 = vadd.f32 %v1543_v37, %v8081_v35  ;;  %2559 = vmatprep.mubr.f32.mxu0 %v10888_v20  ;;  %v7227_v37 = vld [vmem:[%s7484_s24 + $0xc8] sm:$0xff] }
 0x17b   : > { %v1545_v61 = vpop.f32.mrf.mxu0  ;;  %v2284_v43 = vsel %vm2235_vm4, %v2281_v53, %v2283_v55  ;;  %v2285_v2 = vrot.slane %v7227_v37, 4 }
 0x17c   : > { %v8532_v30 = vadd.f32 %v1545_v61, %v8086_v42  ;;  %v8553_v61 = vpop.f32.mrf.mxu1 }
 0x17d   : > { %v1549_v22 = vpop.f32.mrf.mxu0  ;;  %6152 = vmatmul.mubr.msk.f32.gmra.mxu0 %vm667_vm1, %v2282_v41 }
 0x17e   : > { %v8536_v35 = vadd.f32 %v1549_v22, %v8093_v27  ;;  %2565 = vmatprep.mubr.f32.mxu0 %v10888_v20  ;;  %v2286_v27 = vsel %vm2235_vm4, %v2283_v55, %v2285_v2  ;;  %v7228_v22 = vld [vmem:[%s7484_s24 + $0xd0] sm:$0xff]  ;;  %v7229_v55 = vld [vmem:[%s7484_s24 + $0xd8] sm:$0xff] }
 0x17f   : > { %v1551_v11 = vpop.f32.mrf.mxu0  ;;  %v2287_v53 = vrot.slane %v7228_v22, 4  ;;  %v8565_v22 = vpop.f32.mrf.mxu1 }
 0x180   : > { %v8544_v12 = vadd.f32 %v1551_v11, %v8098_v29 }
 0x181   : > { %v1555_v42 = vpop.f32.mrf.mxu0  ;;  %6153 = vmatmul.mubr.msk.f32.gmra.mxu0 %vm667_vm1, %v2284_v43 }
 0x182   : > { %v8548_v41 = vadd.f32 %v1555_v42, %v8105_v38  ;;  %2571 = vmatprep.mubr.f32.mxu0 %v10888_v20  ;;  %v2288_v38 = vsel %vm2235_vm4, %v2285_v2, %v2287_v53  ;;  %v2289_v42 = vrot.slane %v7229_v55, 4  ;;  %v8576_v2 = vpop.f32.mrf.mxu1 }
 0x183   : > { %v1557_v37 = vpop.f32.mrf.mxu0 }
 0x184   : > { %10949 = vst [vmem:[#allocation57_spill] sm:$0xff] %v8548_v41  ;;  %v8556_v29 = vadd.f32 %v1557_v37, %v8110_v19 }
 0x185   : > { %v1561_v11 = vpop.f32.mrf.mxu0  ;;  %6154 = vmatmul.mubr.msk.f32.gmra.mxu0 %vm667_vm1, %v2286_v27  ;;  %v7230_v27 = vld [vmem:[%s7484_s24 + $0xe0] sm:$0xff] }
 0x186   : > { %v8560_v43 = vadd.f32 %v1561_v11, %v8117_v48  ;;  %2577 = vmatprep.mubr.f32.mxu0 %v10888_v20  ;;  %v2290_v48 = vsel %vm2235_vm4, %v2287_v53, %v2289_v42  ;;  %v2291_v37 = vrot.slane %v7230_v27, 4  ;;  %v8587_v53 = vpop.f32.mrf.mxu1 }
 0x187   : > { %v8567_v32 = vpop.f32.mrf.mxu0 }
 0x188   : > { %10950 = vst [vmem:[#allocation58_spill] sm:$0xff] %v8560_v43 }
 0x189   : > { %v1567_v41 = vpop.f32.mrf.mxu0  ;;  %6155 = vmatmul.mubr.msk.f32.gmra.mxu0 %vm667_vm1, %v2288_v38 }
 0x18a   : > { %v8571_v19 = vadd.f32 %v1567_v41, %v8131_v60  ;;  %2583 = vmatprep.mubr.f32.mxu0 %v10888_v20  ;;  %v2292_v60 = vsel %vm2235_vm4, %v2289_v42, %v2291_v37  ;;  %v7231_v41 = vld [vmem:[%s7484_s24 + $0xe8] sm:$0xff]  ;;  %v8598_v42 = vpop.f32.mrf.mxu1 }
 0x18b   : > { %v8578_v11 = vpop.f32.mrf.mxu0  ;;  %v2293_v38 = vrot.slane %v7231_v41, 4 }
 0x18c   : > { %10951 = vst [vmem:[#allocation59_spill] sm:$0xff] %v8571_v19  ;;  %10952 = vst [vmem:[#allocation60_spill] sm:$0xff] %v8578_v11 }
 0x18d   : > { %v1573_v55 = vpop.f32.mrf.mxu0  ;;  %6156 = vmatmul.mubr.msk.f32.gmra.mxu0 %vm667_vm1, %v2290_v48  ;;  %v7232_v48 = vld [vmem:[%s7484_s24 + $0xf0] sm:$0xff] }
 0x18e   : > { %v8582_v43 = vadd.f32 %v1573_v55, %v8145_v8  ;;  %2589 = vmatprep.mubr.f32.mxu0 %v10888_v20  ;;  %v2294_v8 = vsel %vm2235_vm4, %v2291_v37, %v2293_v38  ;;  %v2295_v55 = vrot.slane %v7232_v48, 4 }
 0x18f   : > { %v8589_v27 = vpop.f32.mrf.mxu0 }
 0x190   : > { %10953 = vst [vmem:[#allocation61_spill] sm:$0xff] %v8582_v43  ;;  %10954 = vst [vmem:[#allocation62_spill] sm:$0xff] %v8589_v27 }
 0x191   : > { %v1579_v19 = vpop.f32.mrf.mxu0  ;;  %6157 = vmatmul.mubr.msk.f32.gmra.mxu0 %vm667_vm1, %v2292_v60 }
 0x192   : > { %v8593_v11 = vadd.f32 %v1579_v19, %v8159_v49  ;;  %2595 = vmatprep.mubr.f32.mxu0 %v10888_v20  ;;  %v2296_v49 = vsel %vm2235_vm4, %v2293_v38, %v2295_v55  ;;  %v7233_v19 = vld [vmem:[%s7484_s24 + $0xf8] sm:$0xff]  ;;  %s6471_s24 = sshll.u32 %s7405_s25, 7  ;;  %s7298_s25 = smov [#allocation2]  }
 0x193   : > { %v8600_v41 = vpop.f32.mrf.mxu0  ;;  %v2297_v60 = vrot.slane %v7233_v19, 4  ;;  %s10830_s19 = scalar_lea.hbm %s10881_s16, %s6471_s24  ;;  %s7238_s29 = sshll.u32 %s7298_s25, 4  ;;  %s7239_s29 = int_to_ptr.vmem [resolvable:$false] %s7238_s29 }
 0x194   : > { %10955 = vst [vmem:[#allocation63_spill] sm:$0xff] %v8593_v11  ;;  %10956 = vst [vmem:[#allocation64_spill] sm:$0xff] %v8600_v41  ;;  %v8609_v11 = vpop.f32.mrf.mxu1  ;;  %s7240_s23 = scalar_lea.vmem %s7239_s29, 256  ;;  %p7241_p0 = scmp.lt.s32.totalorder %s5905_s21, %s7239_s29 }
 0x195   : > { %v1585_v43 = vpop.f32.mrf.mxu0  ;;  %6158 = vmatmul.mubr.msk.f32.gmra.mxu0 %vm667_vm1, %v2294_v8  ;;  %p7242_p1 = scmp.lt.s32.totalorder %s7240_s23, %s7234_s26 }
 0x196   : > { %v8604_v27 = vadd.f32 %v1585_v43, %v8173_v18  ;;  %2601 = vmatprep.mubr.f32.mxu0 %v10888_v20  ;;  %v2298_v18 = vsel %vm2235_vm4, %v2295_v55, %v2297_v60  ;;  %v8619_v43 = vpop.f32.mrf.mxu1 }
 0x197   : > { %v8611_v37 = vpop.f32.mrf.mxu0  ;;  %p7243_p2 = por %p7242_p1, %p7241_p0 }
 0x199   : > { %v1591_v48 = vpop.f32.mrf.mxu0  ;;  %6159 = vmatmul.mubr.msk.f32.gmra.mxu0 %vm667_vm1, %v2296_v49  ;;  %v8628_v49 = vpop.f32.mrf.mxu1  ;;  %p7244_p3 = pnand %p7243_p2, %p7237_p13 }
 0x19a   : > { %v8615_v41 = vadd.f32 %v1591_v48, %v8186_v46  ;;  %2607 = vmatprep.mubr.f32.mxu0 %v10888_v20 }
 0x19b   : > { %v8621_v8 = vpop.f32.mrf.mxu0 }
 0x19c   : > { %10957 = vst [vmem:[#allocation65_spill] sm:$0xff] %v8615_v41  ;;  %10958 = vst [vmem:[#allocation66_spill] sm:$0xff] %v8621_v8  ;;  %v8636_v41 = vpop.f32.mrf.mxu1 }
 0x19d   : > { %v1597_v38 = vpop.f32.mrf.mxu0  ;;  %6160 = vmatmul.mubr.msk.f32.gmra.mxu0 %vm667_vm1, %v2298_v18 }
 0x19e   : > { %v8625_v19 = vadd.f32 %v1597_v38, %v8197_v56  ;;  %2613 = vmatprep.mubr.f32.mxu0 %v10888_v20  ;;  %v8643_v38 = vpop.f32.mrf.mxu1 }
 0x19f   : > { %v8630_v46 = vpop.f32.mrf.mxu0 }
 0x1a0   : > { %10959 = vst [vmem:[#allocation67_spill] sm:$0xff] %v8625_v19  ;;  %10960 = vst [vmem:[#allocation68_spill] sm:$0xff] %v8630_v46 }
 0x1a1   : > { %v1603_v48 = vpop.f32.mrf.mxu0  ;;  %6161 = vmatmul.mubr.msk.f32.gmra.mxu0 %vm667_vm1, %v2297_v60  ;;  %v8650_v60 = vpop.f32.mrf.mxu1 }
 0x1a2   : > { %v8634_v55 = vadd.f32 %v1603_v48, %v8208_v1 }
 0x1a3   : > { %v8638_v8 = vpop.f32.mrf.mxu0 }
 0x1a4   : > { %10961 = vst [vmem:[#allocation69_spill] sm:$0xff] %v8634_v55  ;;  %10962 = vst [vmem:[#allocation70_spill] sm:$0xff] %v8638_v8  ;;  %v8657_v8 = vpop.f32.mrf.mxu1 }
 0x1a5   : > { %v1609_v18 = vpop.f32.mrf.mxu0 }
 0x1a6   : > { %v8641_v56 = vadd.f32 %v1609_v18, %v8218_v31 }
 0x1a7   : > { %v8645_v20 = vpop.f32.mrf.mxu0 }
 0x1a8   : > { %10963 = vst [vmem:[#allocation71_spill] sm:$0xff] %v8641_v56  ;;  %10964 = vst [vmem:[#allocation72_spill] sm:$0xff] %v8645_v20  ;;  %v8664_v20 = vpop.f32.mrf.mxu1 }
 0x1a9   : > { %v1615_v19 = vpop.f32.mrf.mxu0 }
 0x1aa   : > { %v8648_v46 = vadd.f32 %v1615_v19, %v8228_v45 }
 0x1ab   : > { %v8652_v1 = vpop.f32.mrf.mxu0 }
 0x1ac   : > { %10965 = vst [vmem:[#allocation73_spill] sm:$0xff] %v8648_v46  ;;  %10966 = vst [vmem:[#allocation74_spill] sm:$0xff] %v8652_v1  ;;  %v8671_v1 = vpop.f32.mrf.mxu1 }
 0x1ad   : > { %v1621_v48 = vpop.f32.mrf.mxu0 }
 0x1ae   : > { %v8655_v55 = vadd.f32 %v1621_v48, %v8238_v4 }
 0x1af   : > { %v8659_v31 = vpop.f32.mrf.mxu0 }
 0x1b0   : > { %10967 = vst [vmem:[#allocation75_spill] sm:$0xff] %v8655_v55  ;;  %10968 = vst [vmem:[#allocation76_spill] sm:$0xff] %v8659_v31  ;;  %v8678_v31 = vpop.f32.mrf.mxu1 }
 0x1b1   : > { %v1627_v18 = vpop.f32.mrf.mxu0 }
 0x1b2   : > { %v8662_v56 = vadd.f32 %v1627_v18, %v8248_v17 }
 0x1b3   : > { %v8666_v45 = vpop.f32.mrf.mxu0 }
 0x1b4   : > { %10969 = vst [vmem:[#allocation77_spill] sm:$0xff] %v8662_v56  ;;  %10970 = vst [vmem:[#allocation78_spill] sm:$0xff] %v8666_v45  ;;  %v8685_v45 = vpop.f32.mrf.mxu1 }
 0x1b5   : > { %v1633_v19 = vpop.f32.mrf.mxu0 }
 0x1b6   : > { %v8669_v46 = vadd.f32 %v1633_v19, %v8258_v21 }
 0x1b7   : > { %v8673_v4 = vpop.f32.mrf.mxu0 }
 0x1b8   : > { %10971 = vst [vmem:[#allocation79_spill] sm:$0xff] %v8669_v46  ;;  %10972 = vst [vmem:[#allocation80_spill] sm:$0xff] %v8673_v4  ;;  %v8692_v4 = vpop.f32.mrf.mxu1 }
 0x1b9   : > { %v1639_v48 = vpop.f32.mrf.mxu0 }
 0x1ba   : > { %v8676_v55 = vadd.f32 %v1639_v48, %v8268_v10 }
 0x1bb   : > { %v8680_v17 = vpop.f32.mrf.mxu0 }
 0x1bc   : > { %10973 = vst [vmem:[#allocation81_spill] sm:$0xff] %v8676_v55  ;;  %10974 = vst [vmem:[#allocation82_spill] sm:$0xff] %v8680_v17  ;;  %v8699_v17 = vpop.f32.mrf.mxu1 }
 0x1bd   : > { %v1645_v18 = vpop.f32.mrf.mxu0 }
 0x1be   : > { %v8683_v56 = vadd.f32 %v1645_v18, %v8278_v57 }
 0x1bf   : > { %v8687_v21 = vpop.f32.mrf.mxu0 }
 0x1c0   : > { %10975 = vst [vmem:[#allocation83_spill] sm:$0xff] %v8683_v56  ;;  %10976 = vst [vmem:[#allocation84_spill] sm:$0xff] %v8687_v21  ;;  %v8706_v21 = vpop.f32.mrf.mxu1 }
 0x1c1   : > { %v1651_v19 = vpop.f32.mrf.mxu0 }
 0x1c2   : > { %v8690_v46 = vadd.f32 %v1651_v19, %v8288_v5 }
 0x1c3   : > { %v8694_v10 = vpop.f32.mrf.mxu0 }
 0x1c4   : > { %10977 = vst [vmem:[#allocation85_spill] sm:$0xff] %v8690_v46  ;;  %10978 = vst [vmem:[#allocation86_spill] sm:$0xff] %v8694_v10  ;;  %v8713_v10 = vpop.f32.mrf.mxu1 }
 0x1c5   : > { %v1657_v48 = vpop.f32.mrf.mxu0  ;;  %10984 = vst [vmem:[#allocation92_spill] sm:$0xff] %v8713_v10 }
 0x1c6   : > { %v8697_v55 = vadd.f32 %v1657_v48, %v8298_v52 }
 0x1c7   : > { %v8701_v57 = vpop.f32.mrf.mxu0 }
 0x1c8   : > { %10979 = vst [vmem:[#allocation87_spill] sm:$0xff] %v8697_v55  ;;  %10980 = vst [vmem:[#allocation88_spill] sm:$0xff] %v8701_v57  ;;  %v8720_v57 = vpop.f32.mrf.mxu1 }
 0x1c9   : > { %v1663_v18 = vpop.f32.mrf.mxu0 }
 0x1ca   : > { %v8704_v56 = vadd.f32 %v1663_v18, %v8308_v33 }
 0x1cb   : > { %v8708_v5 = vpop.f32.mrf.mxu0 }
 0x1cc   : > { %10981 = vst [vmem:[#allocation89_spill] sm:$0xff] %v8704_v56  ;;  %10982 = vst [vmem:[#allocation90_spill] sm:$0xff] %v8708_v5  ;;  %v8727_v5 = vpop.f32.mrf.mxu1 }
 0x1cd   : > { %v1669_v19 = vpop.f32.mrf.mxu0 }
 0x1ce   : > { %v8711_v46 = vadd.f32 %v1669_v19, %v8318_v13  ;;  %v8734_v10 = vpop.f32.mrf.mxu1 }
 0x1cf   : > { %v8715_v52 = vpop.f32.mrf.mxu0 }
 0x1d0   : > { %10983 = vst [vmem:[#allocation91_spill] sm:$0xff] %v8711_v46  ;;  %10985 = vst [vmem:[#allocation93_spill] sm:$0xff] %v8715_v52  ;;  %v2686_v46 = vlaneseq }
 0x1d1   : > { %v1675_v48 = vpop.f32.mrf.mxu0 }
 0x1d2   : > { %v8718_v55 = vadd.f32 %v1675_v48, %v8331_v51 }
 0x1d3   : > { %v8722_v33 = vpop.f32.mrf.mxu0 }
 0x1d4   : > { %10986 = vst [vmem:[#allocation94_spill] sm:$0xff] %v8718_v55  ;;  %10987 = vst [vmem:[#allocation95_spill] sm:$0xff] %v8722_v33  ;;  %v8738_v55 = vshrl.u32 %v2686_v46, 7 }
 0x1d5   : > { %v1681_v18 = vpop.f32.mrf.mxu0 }
 0x1d6   : > { %v8725_v56 = vadd.f32 %v1681_v18, %v8349_v14  ;;  %v8743_v14 = vpop.f32.mrf.mxu1  ;;  %v10891_v46 = vsub.s32 1, %v8738_v55 }
 0x1d7   : > { %v8729_v13 = vpop.f32.mrf.mxu0  ;;  %10993 = vst [vmem:[#allocation101_spill] sm:$0xff] %v8743_v14 }
 0x1d8   : > { %10988 = vst [vmem:[#allocation96_spill] sm:$0xff] %v8725_v56  ;;  %10989 = vst [vmem:[#allocation97_spill] sm:$0xff] %v8729_v13  ;;  %v10890_v13 = vsub.s32 0, %v8738_v55 }
 0x1d9   : > { %v1687_v19 = vpop.f32.mrf.mxu0 }
 0x1da   : > { %v8732_v52 = vadd.f32 %v1687_v19, %v8367_v47  ;;  %v2684_v19 = vld [vmem:[%s10867_s2] sm:$0x3] }
 0x1db   : > { %v8736_v51 = vpop.f32.mrf.mxu0 }
 0x1dc   : > { %10990 = vst [vmem:[#allocation98_spill] sm:$0xff] %v8732_v52  ;;  %10991 = vst [vmem:[#allocation99_spill] sm:$0xff] %v8736_v51  ;;  %v8755_v52 = vpop.f32.mrf.mxu1 }
 0x1dd   : > { %v1693_v48 = vpop.f32.mrf.mxu0  ;;  %10996 = vst [vmem:[#allocation104_spill] sm:$0xff] %v8755_v52 }
 0x1de   : > { %v8741_v33 = vadd.f32 %v1693_v48, %v8385_v36  ;;  %v2162_v48 = vadd.f32 %v8416_v44, %v8424_v40  ;;  %v8771_v51 = vpop.f32.mrf.mxu1 }
 0x1df   : > { %v8745_v18 = vpop.f32.mrf.mxu0 }
 0x1e0   : > { %10992 = vst [vmem:[#allocation100_spill] sm:$0xff] %v8741_v33  ;;  %10994 = vst [vmem:[#allocation102_spill] sm:$0xff] %v8745_v18  ;;  %v8763_v18 = vrot.slane %v2684_v19, %v10890_v13  ;;  %v2165_v13 = vadd.f32 %v8469_v7, %v8456_v54 }
 0x1e1   : > { %v1699_v56 = vpop.f32.mrf.mxu0 }
 0x1e2   : > { %v8749_v47 = vadd.f32 %v1699_v56, %v8403_v34  ;;  %v2163_v34 = vadd.f32 %v8429_v3, %v8436_v16 }
 0x1e3   : > { %v8757_v36 = vpop.f32.mrf.mxu0 }
 0x1e4   : > { %10995 = vst [vmem:[#allocation103_spill] sm:$0xff] %v8749_v47  ;;  %10997 = vst [vmem:[#allocation105_spill] sm:$0xff] %v8757_v36  ;;  %v8769_v47 = vrot.slane %v2684_v19, %v10891_v46  ;;  %v2164_v36 = vadd.f32 %v8449_v26, %v8444_v0 }
 0x1e5   : > { %v2429_v33 = vpop.f32.mrf.mxu0 }
 0x1e6   : > { %v2620_v56 = vadd.f32 %v2429_v33, %v2162_v48  ;;  %v8779_v33 = vpop.f32.mrf.mxu1  ;;  %v2166_v48 = vadd.f32 %v8489_v9, %v8464_v59 }
 0x1e7   : > { %v2431_v52 = vpop.f32.mrf.mxu0 }
 0x1e8   : > { %v2621_v44 = vadd.f32 %v2431_v52, %v2163_v34  ;;  %v2696_v40 = vadd.f32 %v8763_v18, %v2620_v56  ;;  %v2167_v52 = vadd.f32 %v8509_v63, %v8476_v39  ;;  %v8787_v34 = vpop.f32.mrf.mxu1  ;;  %v2169_v56 = vadd.f32 %v8541_v28, %v8496_v50 }
 0x1e9   : > { %v2435_v14 = vpop.f32.mrf.mxu0 }
 0x1ea   : > { %v2697_v3 = vadd.f32 %v8769_v47, %v2621_v44  ;;  %v2622_v16 = vadd.f32 %v2435_v14, %v2164_v36  ;;  %v2168_v36 = vadd.f32 %v8529_v23, %v8484_v15 }
 0x1eb   : > { %v2437_v19 = vpop.f32.mrf.mxu0 }
 0x1ec   : > { %7006 = vtanh.f32 %v2697_v3  ;;  %v2623_v46 = vadd.f32 %v2437_v19, %v2165_v13  ;;  %v2698_v0 = vadd.f32 %v8763_v18, %v2622_v16  ;;  %v2171_v16 = vadd.f32 %v8565_v22, %v8516_v62 }
 0x1ed   : > { %7008 = vtanh.f32 %v2696_v40  ;;  %v2441_v26 = vpop.f32.mrf.mxu0  ;;  %v2170_v40 = vadd.f32 %v8553_v61, %v8504_v25  ;;  %v2173_v62 = vadd.f32 %v8587_v53, %v8532_v30  ;;  %v2175_v53 = vadd.f32 %v8609_v11, %v8544_v12 }
 0x1ee   : > { %v2699_v54 = vadd.f32 %v8769_v47, %v2623_v46  ;;  %v2624_v7 = vadd.f32 %v2441_v26, %v2166_v48  ;;  %v8795_v46 = vpop.f32.mrf.mxu1 }
 0x1ef   : > { %v2443_v14 = vpop.f32.mrf.mxu0 }
 0x1f0   : > { %7010 = vtanh.f32 %v2699_v54  ;;  %v2625_v59 = vadd.f32 %v2443_v14, %v2167_v52  ;;  %v2700_v9 = vadd.f32 %v8763_v18, %v2624_v7  ;;  %v8803_v19 = vpop.f32.mrf.mxu1 }
 0x1f1   : > { %7012 = vtanh.f32 %v2698_v0  ;;  %v2447_v13 = vpop.f32.mrf.mxu0  ;;  %v2172_v0 = vadd.f32 %v8576_v2, %v8524_v58  ;;  %v2174_v58 = vadd.f32 %v8598_v42, %v8536_v35  ;;  %v1170_v35 = vadd.f32 %v8119_v24, %v8124_v6  ;;  %v10998_v42 = vld [vmem:[#allocation57_spill] sm:$0xff] }
 0x1f2   : > { %v2701_v39 = vadd.f32 %v8769_v47, %v2625_v59  ;;  %v2626_v63 = vadd.f32 %v2447_v13, %v2168_v36  ;;  %v8812_v14 = vpop.f32.mrf.mxu1 }
 0x1f3   : > { %v2449_v44 = vpop.f32.mrf.mxu0 }
 0x1f4   : > { %7014 = vtanh.f32 %v2701_v39  ;;  %v2627_v15 = vadd.f32 %v2449_v44, %v2169_v56  ;;  %v2702_v23 = vadd.f32 %v8763_v18, %v2626_v63  ;;  %v8821_v63 = vpop.f32.mrf.mxu1 }
 0x1f5   : > { %7016 = vtanh.f32 %v2700_v9  ;;  %v2453_v3 = vpop.f32.mrf.mxu0 }
 0x1f6   : > { %v2703_v50 = vadd.f32 %v8769_v47, %v2627_v15  ;;  %v2628_v28 = vadd.f32 %v2453_v3, %v2170_v40  ;;  %v2176_v40 = vadd.f32 %v8619_v43, %v10998_v42  ;;  %v8833_v24 = vpop.f32.mrf.mxu1  ;;  %v10999_v43 = vld [vmem:[#allocation12_spill] sm:$0xff] }
 0x1f7   : > { %v2455_v48 = vpop.f32.mrf.mxu0 }
 0x1f8   : > { %7018 = vtanh.f32 %v2703_v50  ;;  %v2629_v25 = vadd.f32 %v2455_v48, %v2171_v16  ;;  %v2704_v26 = vadd.f32 %v8763_v18, %v2628_v28  ;;  %v2177_v16 = vadd.f32 %v8628_v49, %v8556_v29 }
 0x1f9   : > { %v7007_v61 = vpop.eup %7006  ;;  %7020 = vtanh.f32 %v2702_v23  ;;  %v2459_v52 = vpop.f32.mrf.mxu0  ;;  %v1721_v50 = vadd.f32 %v8567_v32, %v1170_v35 }
 0x1fa   : > { %v7009_v54 = vpop.eup %7008  ;;  %v2705_v22 = vadd.f32 %v8769_v47, %v2629_v25  ;;  %v2630_v7 = vadd.f32 %v2459_v52, %v2172_v0  ;;  %6162 = vmatprep.mubr.msk.f32.mxu1 %vm2845_vm5, %v7007_v61  ;;  %v11000_v0 = vld [vmem:[#allocation11_spill] sm:$0xff]  ;;  %v11001_v61 = vld [vmem:[#allocation58_spill] sm:$0xff] }
 0x1fb   : > { %v2461_v36 = vpop.f32.mrf.mxu0  ;;  %3007 = vmatmul.mubr.f32.vlgmr.msra.gmra.mxu1 %v7009_v54  ;;  %v1176_v25 = vadd.f32 %v11000_v0, %v10999_v43 }
 0x1fc   : > { %7022 = vtanh.f32 %v2705_v22  ;;  %v2631_v2 = vadd.f32 %v2461_v36, %v2173_v62  ;;  %v2706_v9 = vadd.f32 %v8763_v18, %v2630_v7  ;;  %v2179_v62 = vadd.f32 %v8643_v38, %v1721_v50  ;;  %v11002_v22 = vld [vmem:[#allocation60_spill] sm:$0xff] }
 0x1fd   : > { %v7011_v59 = vpop.eup %7010  ;;  %7024 = vtanh.f32 %v2704_v26  ;;  %v2465_v13 = vpop.f32.mrf.mxu0  ;;  %v2178_v26 = vadd.f32 %v8636_v41, %v11001_v61  ;;  %v1723_v7 = vadd.f32 %v11002_v22, %v1176_v25 }
 0x1fe   : > { %v7013_v30 = vpop.eup %7012  ;;  %v2707_v56 = vadd.f32 %v8769_v47, %v2631_v2  ;;  %v2632_v39 = vadd.f32 %v2465_v13, %v2174_v58  ;;  %6163 = vmatprep.mubr.msk.f32.mxu1 %vm2845_vm5, %v7011_v59  ;;  %v8844_v2 = vpop.f32.mrf.mxu1  ;;  %v11003_v59 = vld [vmem:[#allocation14_spill] sm:$0xff] }
 0x1ff   : > { %v2467_v44 = vpop.f32.mrf.mxu0  ;;  %3012 = vmatmul.mubr.f32.gmra.mxu1 %v7013_v30  ;;  %v11005_v30 = vld [vmem:[#allocation59_spill] sm:$0xff]  ;;  %v2181_v42 = vadd.f32 %v8657_v8, %v1723_v7 }
 0x200   : > { %7026 = vtanh.f32 %v2707_v56  ;;  %v2633_v15 = vadd.f32 %v2467_v44, %v2175_v53  ;;  %v2708_v12 = vadd.f32 %v8763_v18, %v2632_v39  ;;  %v2180_v53 = vadd.f32 %v8650_v60, %v11005_v30  ;;  %v11013_v7 = vld [vmem:[#allocation63_spill] sm:$0xff] }
 0x201   : > { %v7015_v23 = vpop.eup %7014  ;;  %7028 = vtanh.f32 %v2706_v9  ;;  %v2471_v11 = vpop.f32.mrf.mxu0  ;;  %v11004_v9 = vld [vmem:[#allocation13_spill] sm:$0xff] }
 0x202   : > { %v7017_v3 = vpop.eup %7016  ;;  %v2709_v28 = vadd.f32 %v8769_v47, %v2633_v15  ;;  %v2634_v48 = vadd.f32 %v2471_v11, %v2176_v40  ;;  %6164 = vmatprep.mubr.msk.f32.mxu1 %vm2845_vm5, %v7015_v23  ;;  %v1182_v13 = vadd.f32 %v11004_v9, %v11003_v59  ;;  %v11006_v40 = vld [vmem:[#allocation62_spill] sm:$0xff]  ;;  %v8855_v11 = vpop.f32.mrf.mxu1 }
 0x203   : > { %v2473_v6 = vpop.f32.mrf.mxu0  ;;  %3017 = vmatmul.mubr.f32.gmra.mxu1 %v7017_v3  ;;  %v11007_v3 = vld [vmem:[#allocation16_spill] sm:$0xff] }
 0x204   : > { %7030 = vtanh.f32 %v2709_v28  ;;  %v2635_v52 = vadd.f32 %v2473_v6, %v2177_v16  ;;  %v2710_v32 = vadd.f32 %v8763_v18, %v2634_v48  ;;  %v1725_v15 = vadd.f32 %v11006_v40, %v1182_v13  ;;  %v11008_v16 = vld [vmem:[#allocation15_spill] sm:$0xff]  ;;  %v11009_v28 = vld [vmem:[#allocation61_spill] sm:$0xff] }
 0x205   : > { %v7019_v29 = vpop.eup %7018  ;;  %7032 = vtanh.f32 %v2708_v12  ;;  %v2477_v49 = vpop.f32.mrf.mxu0  ;;  %v1188_v50 = vadd.f32 %v11008_v16, %v11007_v3  ;;  %v2182_v48 = vadd.f32 %v8664_v20, %v11009_v28 }
 0x206   : > { %v7021_v54 = vpop.eup %7020  ;;  %v2711_v36 = vadd.f32 %v8769_v47, %v2635_v52  ;;  %v2636_v58 = vadd.f32 %v2477_v49, %v2178_v26  ;;  %6165 = vmatprep.mubr.msk.f32.mxu1 %vm2845_vm5, %v7019_v29  ;;  %v2183_v61 = vadd.f32 %v8671_v1, %v1725_v15  ;;  %v11010_v26 = vld [vmem:[#allocation64_spill] sm:$0xff]  ;;  %v8866_v49 = vpop.f32.mrf.mxu1 }
 0x207   : > { %v2479_v41 = vpop.f32.mrf.mxu0  ;;  %3022 = vmatmul.mubr.f32.gmra.mxu1 %v7021_v54  ;;  %v1727_v52 = vadd.f32 %v11010_v26, %v1188_v50  ;;  %v11011_v54 = vld [vmem:[#allocation18_spill] sm:$0xff] }
 0x208   : > { %7034 = vtanh.f32 %v2711_v36  ;;  %v2637_v56 = vadd.f32 %v2479_v41, %v2179_v62  ;;  %v2712_v39 = vadd.f32 %v8763_v18, %v2636_v58  ;;  %v11012_v62 = vld [vmem:[#allocation17_spill] sm:$0xff]  ;;  %v2184_v36 = vadd.f32 %v8678_v31, %v11013_v7  ;;  %v11022_v7 = vld [vmem:[#allocation24_spill] sm:$0xff] }
 0x209   : > { %v7023_v38 = vpop.eup %7022  ;;  %7036 = vtanh.f32 %v2710_v32  ;;  %v2483_v44 = vpop.f32.mrf.mxu0  ;;  %v1194_v22 = vadd.f32 %v11012_v62, %v11011_v54  ;;  %v2185_v13 = vadd.f32 %v8685_v45, %v1727_v52  ;;  %v11020_v52 = vld [vmem:[#allocation92_spill] sm:$0xff] }
 0x20a   : > { %v7025_v35 = vpop.eup %7024  ;;  %v2713_v23 = vadd.f32 %v8769_v47, %v2637_v56  ;;  %v2638_v12 = vadd.f32 %v2483_v44, %v2180_v53  ;;  %6166 = vmatprep.mubr.msk.f32.mxu1 %vm2845_vm5, %v7023_v38  ;;  %v8877_v38 = vpop.f32.mrf.mxu1  ;;  %v11015_v44 = vld [vmem:[#allocation19_spill] sm:$0xff] }
 0x20b   : > { %v2485_v60 = vpop.f32.mrf.mxu0  ;;  %3027 = vmatmul.mubr.f32.gmra.mxu1 %v7025_v35  ;;  %v1729_v30 = vadd.f32 %v8611_v37, %v1194_v22 }
 0x20c   : > { %7038 = vtanh.f32 %v2713_v23  ;;  %v2639_v6 = vadd.f32 %v2485_v60, %v2181_v42  ;;  %v2714_v43 = vadd.f32 %v8763_v18, %v2638_v12  ;;  %v2186_v42 = vadd.f32 %v8692_v4, %v8604_v27  ;;  %v11016_v60 = vld [vmem:[#allocation66_spill] sm:$0xff]  ;;  %v8888_v28 = vpop.f32.mrf.mxu1 }
 0x20d   : > { %v7027_v8 = vpop.eup %7026  ;;  %7040 = vtanh.f32 %v2712_v39  ;;  %v2489_v0 = vpop.f32.mrf.mxu0  ;;  %v11014_v39 = vld [vmem:[#allocation20_spill] sm:$0xff]  ;;  %v2187_v12 = vadd.f32 %v8699_v17, %v1729_v30  ;;  %v11017_v4 = vld [vmem:[#allocation22_spill] sm:$0xff] }
 0x20e   : > { %v7029_v25 = vpop.eup %7028  ;;  %v2715_v29 = vadd.f32 %v8769_v47, %v2639_v6  ;;  %v2640_v32 = vadd.f32 %v2489_v0, %v2182_v48  ;;  %6167 = vmatprep.mubr.msk.f32.mxu1 %vm2845_vm5, %v7027_v8  ;;  %v1200_v35 = vadd.f32 %v11015_v44, %v11014_v39  ;;  %v11018_v48 = vld [vmem:[#allocation21_spill] sm:$0xff]  ;;  %v8899_v22 = vpop.f32.mrf.mxu1 }
 0x20f   : > { %v2491_v20 = vpop.f32.mrf.mxu0  ;;  %3032 = vmatmul.mubr.f32.gmra.mxu1 %v7029_v25  ;;  %v1206_v6 = vadd.f32 %v11018_v48, %v11017_v4  ;;  %v11019_v8 = vld [vmem:[#allocation65_spill] sm:$0xff]  ;;  %v11030_v4 = vld [vmem:[#allocation72_spill] sm:$0xff] }
 0x210   : > { %7042 = vtanh.f32 %v2715_v29  ;;  %v2641_v58 = vadd.f32 %v2491_v20, %v2183_v61  ;;  %v2716_v41 = vadd.f32 %v8763_v18, %v2640_v32  ;;  %v1731_v3 = vadd.f32 %v11016_v60, %v1200_v35  ;;  %v11021_v32 = vld [vmem:[#allocation68_spill] sm:$0xff] }
 0x211   : > { %v7031_v1 = vpop.eup %7030  ;;  %7044 = vtanh.f32 %v2714_v43  ;;  %v2495_v59 = vpop.f32.mrf.mxu0  ;;  %v2188_v43 = vadd.f32 %v8706_v21, %v11019_v8  ;;  %v1733_v20 = vadd.f32 %v11021_v32, %v1206_v6 }
 0x212   : > { %v7033_v9 = vpop.eup %7032  ;;  %v2717_v53 = vadd.f32 %v8769_v47, %v2641_v58  ;;  %v2642_v56 = vadd.f32 %v2495_v59, %v2184_v36  ;;  %6168 = vmatprep.mubr.msk.f32.mxu1 %vm2845_vm5, %v7031_v1  ;;  %v2189_v29 = vadd.f32 %v11020_v52, %v1731_v3  ;;  %v11023_v36 = vld [vmem:[#allocation23_spill] sm:$0xff] }
 0x213   : > { %v2497_v31 = vpop.f32.mrf.mxu0  ;;  %3037 = vmatmul.mubr.f32.gmra.mxu1 %v7033_v9  ;;  %v1212_v58 = vadd.f32 %v11023_v36, %v11022_v7  ;;  %v11024_v1 = vld [vmem:[#allocation67_spill] sm:$0xff]  ;;  %v11035_v7 = vld [vmem:[#allocation74_spill] sm:$0xff] }
 0x214   : > { %7046 = vtanh.f32 %v2717_v53  ;;  %v2643_v40 = vadd.f32 %v2497_v31, %v2185_v13  ;;  %v2718_v37 = vadd.f32 %v8763_v18, %v2642_v56  ;;  %v2191_v56 = vadd.f32 %v8727_v5, %v1733_v20  ;;  %v11025_v31 = vld [vmem:[#allocation70_spill] sm:$0xff] }
 0x215   : > { %v7035_v45 = vpop.eup %7034  ;;  %7048 = vtanh.f32 %v2716_v41  ;;  %v2501_v15 = vpop.f32.mrf.mxu0  ;;  %v2190_v41 = vadd.f32 %v8720_v57, %v11024_v1  ;;  %v1735_v39 = vadd.f32 %v11025_v31, %v1212_v58 }
 0x216   : > { %v7037_v23 = vpop.eup %7036  ;;  %v2719_v16 = vadd.f32 %v8769_v47, %v2643_v40  ;;  %v2644_v50 = vadd.f32 %v2501_v15, %v2186_v42  ;;  %6169 = vmatprep.mubr.msk.f32.mxu1 %vm2845_vm5, %v7035_v45  ;;  %v8910_v42 = vpop.f32.mrf.mxu1  ;;  %v11026_v40 = vld [vmem:[#allocation26_spill] sm:$0xff]  ;;  %v11027_v45 = vld [vmem:[#allocation25_spill] sm:$0xff] }
 0x217   : > { %v2503_v27 = vpop.f32.mrf.mxu0  ;;  %3042 = vmatmul.mubr.f32.gmra.mxu1 %v7037_v23  ;;  %v11028_v15 = vld [vmem:[#allocation69_spill] sm:$0xff] }
 0x218   : > { %7050 = vtanh.f32 %v2719_v16  ;;  %v2645_v0 = vadd.f32 %v2503_v27, %v2187_v12  ;;  %v2720_v25 = vadd.f32 %v8763_v18, %v2644_v50  ;;  %v2192_v23 = vadd.f32 %v8734_v10, %v11028_v15  ;;  %v11029_v50 = vld [vmem:[#allocation101_spill] sm:$0xff] }
 0x219   : > { %v7039_v17 = vpop.eup %7038  ;;  %7052 = vtanh.f32 %v2718_v37  ;;  %v2507_v61 = vpop.f32.mrf.mxu0  ;;  %v1218_v37 = vadd.f32 %v11027_v45, %v11026_v40  ;;  %v2193_v27 = vadd.f32 %v11029_v50, %v1735_v39  ;;  %v11039_v40 = vld [vmem:[#allocation76_spill] sm:$0xff] }
 0x21a   : > { %v7041_v26 = vpop.eup %7040  ;;  %v2721_v54 = vadd.f32 %v8769_v47, %v2645_v0  ;;  %v2646_v62 = vadd.f32 %v2507_v61, %v2188_v43  ;;  %6170 = vmatprep.mubr.msk.f32.mxu1 %vm2845_vm5, %v7039_v17  ;;  %v8921_v43 = vpop.f32.mrf.mxu1  ;;  %v11031_v0 = vld [vmem:[#allocation28_spill] sm:$0xff]  ;;  %v11032_v17 = vld [vmem:[#allocation27_spill] sm:$0xff] }
 0x21b   : > { %v2509_v21 = vpop.f32.mrf.mxu0  ;;  %3047 = vmatmul.mubr.f32.gmra.mxu1 %v7041_v26  ;;  %v1737_v48 = vadd.f32 %v11030_v4, %v1218_v37  ;;  %v11033_v61 = vld [vmem:[#allocation71_spill] sm:$0xff]  ;;  %v11034_v26 = vld [vmem:[#allocation104_spill] sm:$0xff] }
 0x21c   : > { %7054 = vtanh.f32 %v2721_v54  ;;  %v2647_v59 = vadd.f32 %v2509_v21, %v2189_v29  ;;  %v2722_v13 = vadd.f32 %v8763_v18, %v2646_v62  ;;  %v2194_v52 = vadd.f32 %v11034_v26, %v11033_v61  ;;  %v11044_v61 = vld [vmem:[#allocation34_spill] sm:$0xff]  ;;  %v11045_v26 = vld [vmem:[#allocation33_spill] sm:$0xff] }
 0x21d   : > { %v7043_v9 = vpop.eup %7042  ;;  %7056 = vtanh.f32 %v2720_v25  ;;  %v2513_v30 = vpop.f32.mrf.mxu0  ;;  %v1224_v25 = vadd.f32 %v11032_v17, %v11031_v0  ;;  %v2195_v21 = vadd.f32 %v8771_v51, %v1737_v48 }
 0x21e   : > { %v7045_v53 = vpop.eup %7044  ;;  %v2723_v44 = vadd.f32 %v8769_v47, %v2647_v59  ;;  %v2648_v35 = vadd.f32 %v2513_v30, %v2190_v41  ;;  %6171 = vmatprep.mubr.msk.f32.mxu1 %vm2845_vm5, %v7043_v9  ;;  %v8932_v41 = vpop.f32.mrf.mxu1  ;;  %v11036_v9 = vld [vmem:[#allocation30_spill] sm:$0xff] }
 0x21f   : > { %v2515_v57 = vpop.f32.mrf.mxu0  ;;  %3052 = vmatmul.mubr.f32.gmra.mxu1 %v7045_v53  ;;  %v1739_v36 = vadd.f32 %v11035_v7, %v1224_v25  ;;  %v11038_v53 = vld [vmem:[#allocation73_spill] sm:$0xff] }
 0x220   : > { %7058 = vtanh.f32 %v2723_v44  ;;  %v2649_v12 = vadd.f32 %v2515_v57, %v2191_v56  ;;  %v2724_v60 = vadd.f32 %v8763_v18, %v2648_v35  ;;  %v2196_v56 = vadd.f32 %v8779_v33, %v11038_v53 }
 0x221   : > { %v7047_v5 = vpop.eup %7046  ;;  %7060 = vtanh.f32 %v2722_v13  ;;  %v2519_v3 = vpop.f32.mrf.mxu0  ;;  %v11037_v13 = vld [vmem:[#allocation29_spill] sm:$0xff]  ;;  %v2197_v57 = vadd.f32 %v8787_v34, %v1739_v36  ;;  %v11047_v36 = vld [vmem:[#allocation80_spill] sm:$0xff] }
 0x222   : > { %v7049_v16 = vpop.eup %7048  ;;  %v2725_v6 = vadd.f32 %v8769_v47, %v2649_v12  ;;  %v2650_v8 = vadd.f32 %v2519_v3, %v2192_v23  ;;  %6172 = vmatprep.mubr.msk.f32.mxu1 %vm2845_vm5, %v7047_v5  ;;  %v1230_v30 = vadd.f32 %v11037_v13, %v11036_v9  ;;  %v8943_v23 = vpop.f32.mrf.mxu1  ;;  %v11040_v12 = vld [vmem:[#allocation32_spill] sm:$0xff]  ;;  %v11041_v5 = vld [vmem:[#allocation31_spill] sm:$0xff] }
 0x223   : > { %v2521_v10 = vpop.f32.mrf.mxu0  ;;  %3057 = vmatmul.mubr.f32.gmra.mxu1 %v7049_v16  ;;  %v11042_v3 = vld [vmem:[#allocation75_spill] sm:$0xff]  ;;  %v11048_v13 = vld [vmem:[#allocation36_spill] sm:$0xff] }
 0x224   : > { %7062 = vtanh.f32 %v2725_v6  ;;  %v2651_v29 = vadd.f32 %v2521_v10, %v2193_v27  ;;  %v2726_v20 = vadd.f32 %v8763_v18, %v2650_v8  ;;  %v1741_v45 = vadd.f32 %v11039_v40, %v1230_v30  ;;  %v11043_v8 = vld [vmem:[#allocation78_spill] sm:$0xff]  ;;  %v8954_v25 = vpop.f32.mrf.mxu1  ;;  %v11049_v30 = vld [vmem:[#allocation35_spill] sm:$0xff] }
 0x225   : > { %v7051_v32 = vpop.eup %7050  ;;  %7064 = vtanh.f32 %v2724_v60  ;;  %v2525_v54 = vpop.f32.mrf.mxu0  ;;  %v1236_v60 = vadd.f32 %v11041_v5, %v11040_v12  ;;  %v2198_v16 = vadd.f32 %v8795_v46, %v11042_v3  ;;  %v1248_v53 = vadd.f32 %v11049_v30, %v11048_v13  ;;  %v11051_v40 = vld [vmem:[#allocation82_spill] sm:$0xff]  ;;  %v11053_v5 = vld [vmem:[#allocation37_spill] sm:$0xff] }
 0x226   : > { %v7053_v62 = vpop.eup %7052  ;;  %v2727_v58 = vadd.f32 %v8769_v47, %v2651_v29  ;;  %v2652_v1 = vadd.f32 %v2525_v54, %v2194_v52  ;;  %6173 = vmatprep.mubr.msk.f32.mxu1 %vm2845_vm5, %v7051_v32  ;;  %v2199_v6 = vadd.f32 %v8803_v19, %v1741_v45  ;;  %v1242_v52 = vadd.f32 %v11045_v26, %v11044_v61  ;;  %v11046_v29 = vld [vmem:[#allocation77_spill] sm:$0xff]  ;;  %v8965_v9 = vpop.f32.mrf.mxu1  ;;  %v11052_v12 = vld [vmem:[#allocation38_spill] sm:$0xff]  ;;  %v11057_v61 = vld [vmem:[#allocation39_spill] sm:$0xff] }
 0x227   : > { %v2527_v59 = vpop.f32.mrf.mxu0  ;;  %3062 = vmatmul.mubr.f32.gmra.mxu1 %v7053_v62  ;;  %v1743_v10 = vadd.f32 %v11043_v8, %v1236_v60  ;;  %v2200_v32 = vadd.f32 %v8812_v14, %v11046_v29  ;;  %v1747_v45 = vadd.f32 %v11051_v40, %v1248_v53  ;;  %v1254_v60 = vadd.f32 %v11053_v5, %v11052_v12  ;;  %v11054_v3 = vld [vmem:[#allocation81_spill] sm:$0xff]  ;;  %v11066_v12 = vld [vmem:[#allocation87_spill] sm:$0xff] }
 0x228   : > { %7066 = vtanh.f32 %v2727_v58  ;;  %v2653_v31 = vadd.f32 %v2527_v59, %v2195_v21  ;;  %v2728_v39 = vadd.f32 %v8763_v18, %v2652_v1  ;;  %v1745_v58 = vadd.f32 %v11047_v36, %v1242_v52  ;;  %v11058_v52 = vld [vmem:[#allocation83_spill] sm:$0xff]  ;;  %v11062_v30 = vld [vmem:[#allocation85_spill] sm:$0xff] }
 0x229   : > { %v7055_v51 = vpop.eup %7054  ;;  %7068 = vtanh.f32 %v2726_v20  ;;  %v2531_v44 = vpop.f32.mrf.mxu0  ;;  %v2201_v7 = vadd.f32 %v8821_v63, %v1743_v10  ;;  %v2206_v29 = vadd.f32 %v8877_v38, %v11058_v52  ;;  %v2208_v53 = vadd.f32 %v8899_v22, %v11062_v30 }
 0x22a   : > { %v7057_v35 = vpop.eup %7056  ;;  %v2729_v37 = vadd.f32 %v8769_v47, %v2653_v31  ;;  %v2654_v15 = vadd.f32 %v2531_v44, %v2196_v56  ;;  %6174 = vmatprep.mubr.msk.f32.mxu1 %vm2845_vm5, %v7055_v51  ;;  %v11050_v56 = vld [vmem:[#allocation79_spill] sm:$0xff]  ;;  %v2210_v5 = vadd.f32 %v8921_v43, %v11066_v12 }
 0x22b   : > { %v2533_v33 = vpop.f32.mrf.mxu0  ;;  %3067 = vmatmul.mubr.f32.gmra.mxu1 %v7057_v35  ;;  %v2202_v31 = vadd.f32 %v8833_v24, %v11050_v56 }
 0x22c   : > { %7070 = vtanh.f32 %v2729_v37  ;;  %v2655_v50 = vadd.f32 %v2533_v33, %v2197_v57  ;;  %v2730_v27 = vadd.f32 %v8763_v18, %v2654_v15  ;;  %v2203_v57 = vadd.f32 %v8844_v2, %v1745_v58  ;;  %v8976_v33 = vpop.f32.mrf.mxu1 }
 0x22d   : > { %v7059_v34 = vpop.eup %7058  ;;  %7072 = vtanh.f32 %v2728_v39  ;;  %v2537_v4 = vpop.f32.mrf.mxu0 }
 0x22e   : > { %v7061_v48 = vpop.eup %7060  ;;  %v2731_v0 = vadd.f32 %v8769_v47, %v2655_v50  ;;  %v2656_v17 = vadd.f32 %v2537_v4, %v2198_v16  ;;  %6175 = vmatprep.mubr.msk.f32.mxu1 %vm2845_vm5, %v7059_v34  ;;  %v2204_v16 = vadd.f32 %v8855_v11, %v11054_v3 }
 0x22f   : > { %v2539_v46 = vpop.f32.mrf.mxu0  ;;  %3072 = vmatmul.mubr.f32.gmra.mxu1 %v7061_v48  ;;  %v2205_v48 = vadd.f32 %v8866_v49, %v1747_v45 }
 0x230   : > { %7074 = vtanh.f32 %v2731_v0  ;;  %v2657_v20 = vadd.f32 %v2539_v46, %v2199_v6  ;;  %v2732_v54 = vadd.f32 %v8763_v18, %v2656_v17  ;;  %v11055_v6 = vld [vmem:[#allocation84_spill] sm:$0xff]  ;;  %v8987_v17 = vpop.f32.mrf.mxu1 }
 0x231   : > { %v7063_v19 = vpop.eup %7062  ;;  %7076 = vtanh.f32 %v2730_v27  ;;  %v2543_v62 = vpop.f32.mrf.mxu0  ;;  %v1749_v8 = vadd.f32 %v11055_v6, %v1254_v60  ;;  %v11056_v46 = vld [vmem:[#allocation40_spill] sm:$0xff] }
 0x232   : > { %v7065_v21 = vpop.eup %7064  ;;  %v2733_v1 = vadd.f32 %v8769_v47, %v2657_v20  ;;  %v2658_v59 = vadd.f32 %v2543_v62, %v2200_v32  ;;  %6176 = vmatprep.mubr.msk.f32.mxu1 %vm2845_vm5, %v7063_v19  ;;  %v1260_v26 = vadd.f32 %v11057_v61, %v11056_v46 }
 0x233   : > { %v2545_v14 = vpop.f32.mrf.mxu0  ;;  %3077 = vmatmul.mubr.f32.gmra.mxu1 %v7065_v21  ;;  %v2207_v62 = vadd.f32 %v8888_v28, %v1749_v8  ;;  %v11059_v21 = vld [vmem:[#allocation86_spill] sm:$0xff] }
 0x234   : > { %7078 = vtanh.f32 %v2733_v1  ;;  %v2659_v51 = vadd.f32 %v2545_v14, %v2201_v7  ;;  %v2734_v39 = vadd.f32 %v8763_v18, %v2658_v59  ;;  %v1751_v7 = vadd.f32 %v11059_v21, %v1260_v26  ;;  %v8998_v1 = vpop.f32.mrf.mxu1  ;;  %v11060_v59 = vld [vmem:[#allocation42_spill] sm:$0xff]  ;;  %v11061_v14 = vld [vmem:[#allocation41_spill] sm:$0xff] }
 0x235   : > { %v7067_v63 = vpop.eup %7066  ;;  %7080 = vtanh.f32 %v2732_v54  ;;  %v2549_v44 = vpop.f32.mrf.mxu0  ;;  %v1266_v13 = vadd.f32 %v11061_v14, %v11060_v59  ;;  %v11068_v8 = vld [vmem:[#allocation46_spill] sm:$0xff] }
 0x236   : > { %v7069_v35 = vpop.eup %7068  ;;  %v2735_v37 = vadd.f32 %v8769_v47, %v2659_v51  ;;  %v2660_v15 = vadd.f32 %v2549_v44, %v2202_v31  ;;  %6177 = vmatprep.mubr.msk.f32.mxu1 %vm2845_vm5, %v7067_v63  ;;  %v11063_v44 = vld [vmem:[#allocation88_spill] sm:$0xff]  ;;  %v9009_v45 = vpop.f32.mrf.mxu1 }
 0x237   : > { %v2551_v24 = vpop.f32.mrf.mxu0  ;;  %3082 = vmatmul.mubr.f32.gmra.mxu1 %v7069_v35  ;;  %v1753_v35 = vadd.f32 %v11063_v44, %v1266_v13  ;;  %v11077_v44 = vld [vmem:[#allocation49_spill] sm:$0xff] }
 0x238   : > { %7082 = vtanh.f32 %v2735_v37  ;;  %v2661_v50 = vadd.f32 %v2551_v24, %v2203_v57  ;;  %v2736_v34 = vadd.f32 %v8763_v18, %v2660_v15  ;;  %v11064_v37 = vld [vmem:[#allocation44_spill] sm:$0xff]  ;;  %v11065_v15 = vld [vmem:[#allocation43_spill] sm:$0xff]  ;;  %v9020_v6 = vpop.f32.mrf.mxu1 }
 0x239   : > { %v7071_v2 = vpop.eup %7070  ;;  %7084 = vtanh.f32 %v2734_v39  ;;  %v2555_v27 = vpop.f32.mrf.mxu0  ;;  %v2209_v39 = vadd.f32 %v8910_v42, %v1751_v7  ;;  %v1272_v24 = vadd.f32 %v11065_v15, %v11064_v37  ;;  %v11073_v7 = vld [vmem:[#allocation47_spill] sm:$0xff] }
 0x23a   : > { %v7073_v4 = vpop.eup %7072  ;;  %v2737_v10 = vadd.f32 %v8769_v47, %v2661_v50  ;;  %v2662_v0 = vadd.f32 %v2555_v27, %v2204_v16  ;;  %6178 = vmatprep.mubr.msk.f32.mxu1 %vm2845_vm5, %v7071_v2  ;;  %v2211_v2 = vadd.f32 %v8932_v41, %v1753_v35 }
 0x23b   : > { %v2557_v11 = vpop.f32.mrf.mxu0  ;;  %3087 = vmatmul.mubr.f32.gmra.mxu1 %v7073_v4 }
 0x23c   : > { %7086 = vtanh.f32 %v2737_v10  ;;  %v2663_v32 = vadd.f32 %v2557_v11, %v2205_v48  ;;  %v2738_v20 = vadd.f32 %v8763_v18, %v2662_v0  ;;  %v11069_v10 = vld [vmem:[#allocation45_spill] sm:$0xff] }
 0x23d   : > { %v7075_v49 = vpop.eup %7074  ;;  %7088 = vtanh.f32 %v2736_v34  ;;  %v2561_v19 = vpop.f32.mrf.mxu0  ;;  %v11067_v34 = vld [vmem:[#allocation90_spill] sm:$0xff]  ;;  %v1278_v0 = vadd.f32 %v11069_v10, %v11068_v8  ;;  %v11070_v11 = vld [vmem:[#allocation89_spill] sm:$0xff] }
 0x23e   : > { %v7077_v54 = vpop.eup %7076  ;;  %v2739_v36 = vadd.f32 %v8769_v47, %v2663_v32  ;;  %v2664_v58 = vadd.f32 %v2561_v19, %v2206_v29  ;;  %6179 = vmatprep.mubr.msk.f32.mxu1 %vm2845_vm5, %v7075_v49  ;;  %v1755_v27 = vadd.f32 %v11067_v34, %v1272_v24  ;;  %v2212_v46 = vadd.f32 %v8943_v23, %v11070_v11  ;;  %v11071_v49 = vld [vmem:[#allocation93_spill] sm:$0xff]  ;;  %v11072_v23 = vld [vmem:[#allocation48_spill] sm:$0xff]  ;;  %v11083_v11 = vld [vmem:[#allocation99_spill] sm:$0xff] }
 0x23f   : > { %v2563_v38 = vpop.f32.mrf.mxu0  ;;  %3092 = vmatmul.mubr.f32.gmra.mxu1 %v7077_v54 }
 0x240   : > { %7090 = vtanh.f32 %v2739_v36  ;;  %v2665_v56 = vadd.f32 %v2563_v38, %v2207_v62  ;;  %v2740_v31 = vadd.f32 %v8763_v18, %v2664_v58  ;;  %v2213_v32 = vadd.f32 %v8954_v25, %v1755_v27  ;;  %v2145_v62 = vpop.f32.mrf.mxu1  ;;  %v11074_v58 = vld [vmem:[#allocation91_spill] sm:$0xff]  ;;  %v11082_v27 = vld [vmem:[#allocation96_spill] sm:$0xff] }
 0x241   : > { %v7079_v28 = vpop.eup %7078  ;;  %7092 = vtanh.f32 %v2738_v20  ;;  %v2567_v51 = vpop.f32.mrf.mxu0  ;;  %v1757_v20 = vadd.f32 %v11071_v49, %v1278_v0  ;;  %v1284_v36 = vadd.f32 %v11073_v7, %v11072_v23  ;;  %v2214_v38 = vadd.f32 %v8965_v9, %v11074_v58  ;;  %v11076_v9 = vld [vmem:[#allocation50_spill] sm:$0xff] }
 0x242   : > { %v7081_v63 = vpop.eup %7080  ;;  %v2741_v57 = vadd.f32 %v8769_v47, %v2665_v56  ;;  %v2666_v40 = vadd.f32 %v2567_v51, %v2208_v53  ;;  %6180 = vmatprep.mubr.msk.f32.mxu1 %vm2845_vm5, %v7079_v28  ;;  %v11075_v56 = vld [vmem:[#allocation95_spill] sm:$0xff]  ;;  %v1290_v35 = vadd.f32 %v11077_v44, %v11076_v9  ;;  %v11086_v49 = vld [vmem:[#allocation98_spill] sm:$0xff]  ;;  %v11091_v44 = vld [vmem:[#allocation105_spill] sm:$0xff] }
 0x243   : > { %v2569_v22 = vpop.f32.mrf.mxu0  ;;  %3097 = vmatmul.mubr.f32.gmra.mxu1 %v7081_v63  ;;  %v2215_v53 = vadd.f32 %v8976_v33, %v1757_v20  ;;  %v1759_v28 = vadd.f32 %v11075_v56, %v1284_v36  ;;  %v2147_v63 = vpop.f32.mrf.mxu1  ;;  %v2220_v20 = vadd.f32 %v2145_v62, %v11086_v49  ;;  %v11087_v36 = vld [vmem:[#allocation102_spill] sm:$0xff]  ;;  %v11088_v62 = vld [vmem:[#allocation56_spill] sm:$0xff] }
 0x244   : > { %7094 = vtanh.f32 %v2741_v57  ;;  %v2667_v60 = vadd.f32 %v2569_v22, %v2209_v39  ;;  %v2742_v3 = vadd.f32 %v8763_v18, %v2666_v40  ;;  %v11078_v57 = vld [vmem:[#allocation94_spill] sm:$0xff] }
 0x245   : > { %v7083_v42 = vpop.eup %7082  ;;  %7096 = vtanh.f32 %v2740_v31  ;;  %v2573_v16 = vpop.f32.mrf.mxu0  ;;  %v2216_v40 = vadd.f32 %v8987_v17, %v11078_v57  ;;  %v2217_v12 = vadd.f32 %v8998_v1, %v1759_v28  ;;  %v11080_v17 = vld [vmem:[#allocation52_spill] sm:$0xff] }
 0x246   : > { %v7085_v50 = vpop.eup %7084  ;;  %v2743_v4 = vadd.f32 %v8769_v47, %v2667_v60  ;;  %v2668_v48 = vadd.f32 %v2573_v16, %v2210_v5  ;;  %6181 = vmatprep.mubr.msk.f32.mxu1 %vm2845_vm5, %v7083_v42  ;;  %v11079_v5 = vld [vmem:[#allocation97_spill] sm:$0xff]  ;;  %v2151_v16 = vpop.f32.mrf.mxu1 }
 0x247   : > { %v2575_v43 = vpop.f32.mrf.mxu0  ;;  %3102 = vmatmul.mubr.f32.gmra.mxu1 %v7085_v50  ;;  %v1761_v60 = vadd.f32 %v11079_v5, %v1290_v35 }
 0x248   : > { %7098 = vtanh.f32 %v2743_v4  ;;  %v2669_v61 = vadd.f32 %v2575_v43, %v2211_v2  ;;  %v2744_v26 = vadd.f32 %v8763_v18, %v2668_v48  ;;  %v11081_v2 = vld [vmem:[#allocation51_spill] sm:$0xff]  ;;  %v2218_v4 = vadd.f32 %v9009_v45, %v11082_v27  ;;  %v11084_v45 = vld [vmem:[#allocation54_spill] sm:$0xff] }
 0x249   : > { %v7087_v41 = vpop.eup %7086  ;;  %7100 = vtanh.f32 %v2742_v3  ;;  %v2579_v52 = vpop.f32.mrf.mxu0  ;;  %v1296_v34 = vadd.f32 %v11081_v2, %v11080_v17  ;;  %v2219_v0 = vadd.f32 %v9020_v6, %v1761_v60 }
 0x24a   : > { %v7089_v29 = vpop.eup %7088  ;;  %v2745_v19 = vadd.f32 %v8769_v47, %v2669_v61  ;;  %v2670_v54 = vadd.f32 %v2579_v52, %v2212_v46  ;;  %6182 = vmatprep.mubr.msk.f32.mxu1 %vm2845_vm5, %v7087_v41 }
 0x24b   : > { %v2581_v21 = vpop.f32.mrf.mxu0  ;;  %3107 = vmatmul.mubr.f32.gmra.mxu1 %v7089_v29  ;;  %v1763_v46 = vadd.f32 %v11083_v11, %v1296_v34  ;;  %v11085_v29 = vld [vmem:[#allocation53_spill] sm:$0xff] }
 0x24c   : > { %7102 = vtanh.f32 %v2745_v19  ;;  %v2671_v59 = vadd.f32 %v2581_v21, %v2213_v32  ;;  %v2746_v25 = vadd.f32 %v8763_v18, %v2670_v54  ;;  %v1302_v32 = vadd.f32 %v11085_v29, %v11084_v45 }
 0x24d   : > { %v7091_v14 = vpop.eup %7090  ;;  %7104 = vtanh.f32 %v2744_v26  ;;  %v2585_v13 = vpop.f32.mrf.mxu0  ;;  %v2221_v7 = vadd.f32 %v2147_v63, %v1763_v46  ;;  %v11093_v46 = vmov 0.0  }
 0x24e   : > { %v7093_v30 = vpop.eup %7092  ;;  %v2747_v31 = vadd.f32 %v8769_v47, %v2671_v59  ;;  %v2672_v51 = vadd.f32 %v2585_v13, %v2214_v38  ;;  %6183 = vmatprep.mubr.msk.f32.mxu1 %vm2845_vm5, %v7091_v14  ;;  %v2153_v26 = vpop.f32.mrf.mxu1  ;;  %v1765_v58 = vadd.f32 %v11087_v36, %v1302_v32  ;;  %v11089_v13 = vld [vmem:[#allocation55_spill] sm:$0xff] }
 0x24f   : > { %v2587_v39 = vpop.f32.mrf.mxu0  ;;  %3112 = vmatmul.mubr.f32.gmra.mxu1 %v7093_v30  ;;  %v1308_v30 = vadd.f32 %v11089_v13, %v11088_v62 }
 0x250   : > { %7106 = vtanh.f32 %v2747_v31  ;;  %v2673_v22 = vadd.f32 %v2587_v39, %v2215_v53  ;;  %v2748_v33 = vadd.f32 %v8763_v18, %v2672_v51  ;;  %v2157_v14 = vpop.f32.mrf.mxu1  ;;  %v11090_v53 = vld [vmem:[#allocation100_spill] sm:$0xff]  ;;  %v2223_v9 = vadd.f32 %v2153_v26, %v1765_v58 }
 0x251   : > { %v7095_v37 = vpop.eup %7094  ;;  %7108 = vtanh.f32 %v2746_v25  ;;  %v2591_v15 = vpop.f32.mrf.mxu0  ;;  %v2222_v56 = vadd.f32 %v2151_v16, %v11090_v53  ;;  %v1767_v35 = vadd.f32 %v11091_v44, %v1308_v30 }
 0x252   : > { %v7097_v24 = vpop.eup %7096  ;;  %v2749_v42 = vadd.f32 %v8769_v47, %v2673_v22  ;;  %v2674_v3 = vadd.f32 %v2591_v15, %v2216_v40  ;;  %6184 = vmatprep.mubr.msk.f32.mxu1 %vm2845_vm5, %v7095_v37  ;;  %v2159_v22 = vpop.f32.mrf.mxu1 }
 0x253   : > { %v2593_v50 = vpop.f32.mrf.mxu0  ;;  %3117 = vmatmul.mubr.f32.gmra.mxu1 %v7097_v24 }
 0x254   : > { %7110 = vtanh.f32 %v2749_v42  ;;  %v2675_v48 = vadd.f32 %v2593_v50, %v2217_v12  ;;  %v2750_v1 = vadd.f32 %v8763_v18, %v2674_v3  ;;  %v2225_v3 = vadd.f32 %v2159_v22, %v1767_v35 }
 0x255   : > { %v7099_v43 = vpop.eup %7098  ;;  %7112 = vtanh.f32 %v2748_v33  ;;  %v2597_v8 = vpop.f32.mrf.mxu0  ;;  %v11092_v33 = vld [vmem:[#allocation103_spill] sm:$0xff] }
 0x256   : > { %v7101_v10 = vpop.eup %7100  ;;  %v2751_v61 = vadd.f32 %v8769_v47, %v2675_v48  ;;  %v2676_v41 = vadd.f32 %v2597_v8, %v2218_v4  ;;  %6185 = vmatprep.mubr.msk.f32.mxu1 %vm2845_vm5, %v7099_v43  ;;  %v2224_v15 = vadd.f32 %v2157_v14, %v11092_v33 }
 0x257   : > { %v2599_v52 = vpop.f32.mrf.mxu0  ;;  %3122 = vmatmul.mubr.f32.gmra.mxu1 %v7101_v10 }
 0x258   : > { %7114 = vtanh.f32 %v2751_v61  ;;  %v2677_v19 = vadd.f32 %v2599_v52, %v2219_v0  ;;  %v2752_v6 = vadd.f32 %v8763_v18, %v2676_v41 }
 0x259   : > { %v7103_v54 = vpop.eup %7102  ;;  %7116 = vtanh.f32 %v2750_v1  ;;  %v2603_v21 = vpop.f32.mrf.mxu0 }
 0x25a   : > { %v7105_v23 = vpop.eup %7104  ;;  %v2753_v38 = vadd.f32 %v8769_v47, %v2677_v19  ;;  %v2678_v59 = vadd.f32 %v2603_v21, %v2220_v20  ;;  %6186 = vmatprep.mubr.msk.f32.mxu1 %vm2845_vm5, %v7103_v54 }
 0x25b   : > { %v2605_v25 = vpop.f32.mrf.mxu0  ;;  %3127 = vmatmul.mubr.f32.gmra.mxu1 %v7105_v23 }
 0x25c   : > { %7118 = vtanh.f32 %v2753_v38  ;;  %v2679_v28 = vadd.f32 %v2605_v25, %v2221_v7  ;;  %v2754_v51 = vadd.f32 %v8763_v18, %v2678_v59  ;;  %v3168_v7 = vld [vmem:[%s10869_s4 + $0x8] sm:$0xff] }
 0x25d   : > { %v7107_v31 = vpop.eup %7106  ;;  %7120 = vtanh.f32 %v2752_v6  ;;  %v2609_v63 = vpop.f32.mrf.mxu0  ;;  %6195 = vmatprep.mubr.msk.f32.mxu0 %vm3195_vm6, %v3168_v7 }
 0x25e   : > { %v7109_v39 = vpop.eup %7108  ;;  %v2755_v57 = vadd.f32 %v8769_v47, %v2679_v28  ;;  %v2680_v40 = vadd.f32 %v2609_v63, %v2222_v56  ;;  %6187 = vmatprep.mubr.msk.f32.mxu1 %vm2845_vm5, %v7107_v31 }
 0x25f   : > { %v2611_v37 = vpop.f32.mrf.mxu0  ;;  %3132 = vmatmul.mubr.f32.gmra.mxu1 %v7109_v39 }
 0x260   : > { %7122 = vtanh.f32 %v2755_v57  ;;  %v2681_v24 = vadd.f32 %v2611_v37, %v2223_v9  ;;  %v2756_v5 = vadd.f32 %v8763_v18, %v2680_v40 }
 0x261   : > { %v7111_v12 = vpop.eup %7110  ;;  %7124 = vtanh.f32 %v2754_v51  ;;  %v2615_v60 = vpop.f32.mrf.mxu0 }
 0x262   : > { %v7113_v42 = vpop.eup %7112  ;;  %v2757_v16 = vadd.f32 %v8769_v47, %v2681_v24  ;;  %v2682_v50 = vadd.f32 %v2615_v60, %v2224_v15  ;;  %6188 = vmatprep.mubr.msk.f32.mxu1 %vm2845_vm5, %v7111_v12  ;;  %v6229_v60 = vld [vmem:[%s10870_s5 + $0x150] sm:$0xf] }
 0x263   : > { %v2617_v17 = vpop.f32.mrf.mxu0  ;;  %3137 = vmatmul.mubr.f32.gmra.mxu1 %v7113_v42  ;;  %v6228_v42 = vld [vmem:[%s10870_s5 + $0x148] sm:$0xff] }
 0x264   : > { %7126 = vtanh.f32 %v2757_v16  ;;  %v2683_v2 = vadd.f32 %v2617_v17, %v2225_v3  ;;  %v2758_v27 = vadd.f32 %v8763_v18, %v2682_v50  ;;  %v6227_v16 = vld [vmem:[%s10870_s5 + $0x140] sm:$0xff]  ;;  %v6226_v50 = vld [vmem:[%s10870_s5 + $0x138] sm:$0xff] }
 0x265   : > { %v7115_v34 = vpop.eup %7114  ;;  %7128 = vtanh.f32 %v2756_v5  ;;  %v6230_v5 = vld [vmem:[%s10870_s5 + $0x158] sm:$0xf] }
 0x266   : > { %v7117_v4 = vpop.eup %7116  ;;  %v2759_v48 = vadd.f32 %v8769_v47, %v2683_v2  ;;  %6189 = vmatprep.mubr.msk.f32.mxu1 %vm2845_vm5, %v7115_v34  ;;  %6231 = vmatprep.subr.msk.mxu1 %vm2235_vm4, %v6230_v5  ;;  %v6225_v2 = vld [vmem:[%s10870_s5 + $0x130] sm:$0xff]  ;;  %v6224_v34 = vld [vmem:[%s10870_s5 + $0x128] sm:$0xff] }
 0x267   : > { %3142 = vmatmul.mubr.f32.gmra.mxu1 %v7117_v4  ;;  %v6223_v4 = vld [vmem:[%s10870_s5 + $0x120] sm:$0xff]  ;;  %v3189_v5 = vld [vmem:[%s10869_s4 + $0xb0] sm:$0xff] }
 0x268   : > { %7130 = vtanh.f32 %v2759_v48  ;;  %6232 = vmatpush1.msk.msra.mxu1 %vm2235_vm4, %v6229_v60  ;;  %v6222_v48 = vld [vmem:[%s10870_s5 + $0x118] sm:$0xff]  ;;  %v3192_v60 = vld [vmem:[%s10869_s4 + $0xc8] sm:$0xff] }
 0x269   : > { %v7119_v43 = vpop.eup %7118  ;;  %7132 = vtanh.f32 %v2758_v27  ;;  %3509 = vmatprep.subr.mxu1 %v6228_v42  ;;  %v3191_v42 = vld [vmem:[%s10869_s4 + $0xc0] sm:$0xff] }
 0x26a   : > { %v7121_v1 = vpop.eup %7120  ;;  %6190 = vmatprep.mubr.msk.f32.mxu1 %vm2845_vm5, %v7119_v43  ;;  %3510 = vmatpush1.msra.mxu1 %v6227_v16  ;;  %v3193_v16 = vld [vmem:[%s10869_s4 + $0xd0] sm:$0xff] }
 0x26b   : > { %3147 = vmatmul.mubr.f32.gmra.mxu1 %v7121_v1  ;;  %3511 = vmatprep.subr.mxu1 %v6226_v50  ;;  %v6221_v1 = vld [vmem:[%s10870_s5 + $0x110] sm:$0xff] }
 0x26c   : > { %3512 = vmatpush1.msra.mxu1 %v6225_v2  ;;  %v3390_v50 = vld [vmem:[%s10870_s5 + $0x70] sm:$0xff]  ;;  %v3388_v2 = vld [vmem:[%s10870_s5 + $0x60] sm:$0xff] }
 0x26d   : > { %v7123_v8 = vpop.eup %7122  ;;  %3513 = vmatprep.subr.mxu1 %v6224_v34  ;;  %v3387_v34 = vld [vmem:[%s10870_s5 + $0x58] sm:$0xff] }
 0x26e   : > { %v7125_v10 = vpop.eup %7124  ;;  %6191 = vmatprep.mubr.msk.f32.mxu1 %vm2845_vm5, %v7123_v8  ;;  %3514 = vmatpush1.msra.mxu1 %v6223_v4  ;;  %v3385_v4 = vld [vmem:[%s10870_s5 + $0x48] sm:$0xff] }
 0x26f   : > { %3152 = vmatmul.mubr.f32.gmra.mxu1 %v7125_v10  ;;  %3515 = vmatprep.subr.mxu1 %v6222_v48  ;;  %v3384_v48 = vld [vmem:[%s10870_s5 + $0x40] sm:$0xff] }
 0x270   : > { %3516 = vmatpush1.msra.mxu1 %v6221_v1  ;;  %v3382_v1 = vld [vmem:[%s10870_s5 + $0x30] sm:$0xff] }
 0x271   : > { %v7127_v0 = vpop.eup %7126 }
 0x272   : > { %v7129_v18 = vpop.eup %7128  ;;  %6192 = vmatprep.mubr.msk.f32.mxu1 %vm2845_vm5, %v7127_v0 }
 0x273   : > { %3157 = vmatmul.mubr.f32.gmra.mxu1 %v7129_v18 }
 0x275   : > { %v7131_v47 = vpop.eup %7130 }
 0x276   : > { %v7133_v11 = vpop.eup %7132  ;;  %6193 = vmatprep.mubr.msk.f32.mxu1 %vm2845_vm5, %v7131_v47 }
 0x277   : > { %3162 = vmatmul.mubr.f32.gmra.mxu1 %v7133_v11 }
 0x278   : > { %3561 = vmatprep.mubr.f32.mxu1 %v11093_v46 }
 0x2bb   : > { %v9084_v61 = vpop.f32.mrf.mxu1 }
 0x2bd   : > { %v3010_v41 = vpop.f32.mrf.mxu1 }
 0x2bf   : > { %v9086_v26 = vpop.f32.mrf.mxu1 }
 0x2c1   : > { %v3015_v52 = vpop.f32.mrf.mxu1 }
 0x2c3   : > { %v9088_v45 = vpop.f32.mrf.mxu1 }
 0x2c5   : > { %v3020_v29 = vpop.f32.mrf.mxu1 }
 0x2c7   : > { %v9090_v32 = vpop.f32.mrf.mxu1 }
 0x2c9   : > { %v3025_v49 = vpop.f32.mrf.mxu1 }
 0x2cb   : > { %v9092_v20 = vpop.f32.mrf.mxu1 }
 0x2cd   : > { %v3030_v19 = vpop.f32.mrf.mxu1 }
 0x2cf   : > { %v9094_v54 = vpop.f32.mrf.mxu1 }
 0x2d1   : > { %v3035_v6 = vpop.f32.mrf.mxu1 }
 0x2d3   : > { %v9096_v21 = vpop.f32.mrf.mxu1 }
 0x2d5   : > { %v3040_v23 = vpop.f32.mrf.mxu1 }
 0x2d7   : > { %v9101_v36 = vpop.f32.mrf.mxu1 }
 0x2d9   : > { %v3045_v58 = vpop.f32.mrf.mxu1 }
 0x2db   : > { %v9104_v38 = vpop.f32.mrf.mxu1 }
 0x2dd   : > { %v3050_v59 = vpop.f32.mrf.mxu1 }
 0x2df   : > { %v9106_v14 = vpop.f32.mrf.mxu1 }
 0x2e1   : > { %v3055_v25 = vpop.f32.mrf.mxu1 }
 0x2e3   : > { %v9108_v62 = vpop.f32.mrf.mxu1 }
 0x2e5   : > { %v3060_v13 = vpop.f32.mrf.mxu1 }
 0x2e7   : > { %v9110_v30 = vpop.f32.mrf.mxu1 }
 0x2e9   : > { %v3065_v53 = vpop.f32.mrf.mxu1 }
 0x2eb   : > { %v9112_v56 = vpop.f32.mrf.mxu1 }
 0x2ed   : > { %v3070_v28 = vpop.f32.mrf.mxu1 }
 0x2ee   : > { %v3173_v28 = vld [vmem:[%s10869_s4 + $0x30] sm:$0xff] }
 0x2ef   : > { %v3073_v31 = vpop.f32.mrf.mxu1 }
 0x2f1   : > { %v3075_v51 = vpop.f32.mrf.mxu1 }
 0x2f2   : > { %v3175_v51 = vld [vmem:[%s10869_s4 + $0x40] sm:$0xff] }
 0x2f3   : > { %v3078_v63 = vpop.f32.mrf.mxu1 }
 0x2f5   : > { %v3080_v39 = vpop.f32.mrf.mxu1 }
 0x2f6   : > { %v3177_v39 = vld [vmem:[%s10869_s4 + $0x50] sm:$0xff] }
 0x2f7   : > { %v3083_v9 = vpop.f32.mrf.mxu1 }
 0x2f9   : > { %v3085_v44 = vpop.f32.mrf.mxu1 }
 0x2fa   : > { %v3179_v44 = vld [vmem:[%s10869_s4 + $0x60] sm:$0xff] }
 0x2fb   : > { %v9114_v35 = vpop.f32.mrf.mxu1 }
 0x2fd   : > { %v3090_v57 = vpop.f32.mrf.mxu1 }
 0x2fe   : > { %v3181_v57 = vld [vmem:[%s10869_s4 + $0x70] sm:$0xff] }
 0x2ff   : > { %v9116_v40 = vpop.f32.mrf.mxu1 }
 0x301   : > { %v3095_v22 = vpop.f32.mrf.mxu1 }
 0x302   : > { %v3183_v22 = vld [vmem:[%s10869_s4 + $0x80] sm:$0xff] }
 0x303   : > { %v9118_v37 = vpop.f32.mrf.mxu1 }
 0x305   : > { %v3100_v33 = vpop.f32.mrf.mxu1 }
 0x306   : > { %v3185_v33 = vld [vmem:[%s10869_s4 + $0x90] sm:$0xff] }
 0x307   : > { %v9120_v15 = vpop.f32.mrf.mxu1 }
 0x309   : > { %v3105_v24 = vpop.f32.mrf.mxu1 }
 0x30a   : > { %v3187_v24 = vld [vmem:[%s10869_s4 + $0xa0] sm:$0xff] }
 0x30b   : > { %v9122_v12 = vpop.f32.mrf.mxu1 }
 0x30d   : > { %v3110_v3 = vpop.f32.mrf.mxu1 }
 0x30e   : > { %v3194_v3 = vld [vmem:[%s10869_s4 + $0xd8] sm:$0xff] }
 0x30f   : > { %v3113_v17 = vpop.f32.mrf.mxu1 }
 0x311   : > { %v3115_v27 = vpop.f32.mrf.mxu1 }
 0x312   : > { %v3386_v27 = vld [vmem:[%s10870_s5 + $0x50] sm:$0xff] }
 0x313   : > { %v3118_v43 = vpop.f32.mrf.mxu1 }
 0x315   : > { %v3120_v8 = vpop.f32.mrf.mxu1 }
 0x316   : > { %v3381_v8 = vld [vmem:[%s10870_s5 + $0x28] sm:$0xff] }
 0x317   : > { %v3123_v10 = vpop.f32.mrf.mxu1 }
 0x319   : > { %v3125_v0 = vpop.f32.mrf.mxu1 }
 0x31a   : > { %v3380_v0 = vld [vmem:[%s10870_s5 + $0x20] sm:$0xff] }
 0x31b   : > { %v3128_v18 = vpop.f32.mrf.mxu1 }
 0x31d   : > { %v3130_v47 = vpop.f32.mrf.mxu1 }
 0x31e   : > { %v3379_v47 = vld [vmem:[%s10870_s5 + $0x18] sm:$0xff] }
 0x31f   : > { %v3133_v11 = vpop.f32.mrf.mxu1 }
 0x321   : > { %v3135_v41 = vpop.f32.mrf.mxu1 }
 0x322   : > { %v3378_v41 = vld [vmem:[%s10870_s5 + $0x10] sm:$0xff] }
 0x323   : > { %v3138_v52 = vpop.f32.mrf.mxu1 }
 0x325   : > { %v3140_v29 = vpop.f32.mrf.mxu1 }
 0x326   : > { %v3377_v29 = vld [vmem:[%s10870_s5 + $0x8] sm:$0xff] }
 0x327   : > { %v3143_v49 = vpop.f32.mrf.mxu1 }
 0x329   : > { %v3145_v19 = vpop.f32.mrf.mxu1 }
 0x32a   : > { %v3376_v19 = vld [vmem:[%s10870_s5] sm:$0xff] }
 0x32b   : > { %v3148_v6 = vpop.f32.mrf.mxu1 }
 0x32d   : > { %v3150_v23 = vpop.f32.mrf.mxu1 }
 0x32e   : > { %v6214_v23 = vld [vmem:[%s10870_s5 + $0xd8] sm:$0xff] }
 0x32f   : > { %v3153_v7 = vpop.f32.mrf.mxu1 }
 0x331   : > { %v3155_v58 = vpop.f32.mrf.mxu1 }
 0x332   : > { %v6212_v58 = vld [vmem:[%s10870_s5 + $0xc8] sm:$0xff] }
 0x333   : > { %v3158_v59 = vpop.f32.mrf.mxu1 }
 0x335   : > { %v3160_v25 = vpop.f32.mrf.mxu1 }
 0x336   : > { %v6210_v25 = vld [vmem:[%s10870_s5 + $0xb8] sm:$0xff] }
 0x337   : > { %v3163_v13 = vpop.f32.mrf.mxu1 }
 0x338   : > { %6474 = vmatprep.subr.msk.mxu0 %vm2235_vm4, %v3163_v13  ;;  %v6209_v13 = vld [vmem:[%s10870_s5 + $0xb0] sm:$0xff] }
 0x339   : > { %v3165_v53 = vpop.f32.mrf.mxu1  ;;  %6475 = vmatpush3.msra.mxu0 %v3083_v9  ;;  %v3180_v9 = vld [vmem:[%s10869_s4 + $0x68] sm:$0xff] }
 0x33a   : > { %6476 = vmatprep.subr.mxu0 %v3158_v59  ;;  %v6211_v59 = vld [vmem:[%s10870_s5 + $0xc0] sm:$0xff]  ;;  %v6322_v53 = vld [vmem:[%s10870_s5 + $0x2b8] sm:$0xf] }
 0x33b   : > { %6477 = vmatpush3.msra.mxu0 %v3078_v63  ;;  %v3178_v63 = vld [vmem:[%s10869_s4 + $0x58] sm:$0xff] }
 0x33c   : > { %6478 = vmatprep.subr.mxu0 %v3153_v7  ;;  %v6213_v7 = vld [vmem:[%s10870_s5 + $0xd0] sm:$0xff] }
 0x33d   : > { %6479 = vmatpush3.msra.mxu0 %v3073_v31  ;;  %v3176_v31 = vld [vmem:[%s10869_s4 + $0x48] sm:$0xff] }
 0x33e   : > { %6480 = vmatprep.subr.mxu0 %v3148_v6  ;;  %v6215_v6 = vld [vmem:[%s10870_s5 + $0xe0] sm:$0xff] }
 0x33f   : > { %6481 = vmatpush3.msra.mxu0 %v9112_v56  ;;  %v3174_v56 = vld [vmem:[%s10869_s4 + $0x38] sm:$0xff] }
 0x340   : > { %6482 = vmatprep.subr.mxu0 %v3143_v49  ;;  %v6216_v49 = vld [vmem:[%s10870_s5 + $0xe8] sm:$0xff] }
 0x341   : > { %6483 = vmatpush3.msra.mxu0 %v9110_v30  ;;  %v3171_v30 = vld [vmem:[%s10869_s4 + $0x20] sm:$0xff] }
 0x342   : > { %6484 = vmatprep.subr.mxu0 %v3138_v52  ;;  %v6217_v52 = vld [vmem:[%s10870_s5 + $0xf0] sm:$0xff] }
 0x343   : > { %6485 = vmatpush3.msra.mxu0 %v9108_v62  ;;  %v3391_v62 = vld [vmem:[%s10870_s5 + $0x78] sm:$0xff] }
 0x344   : > { %6486 = vmatprep.subr.mxu0 %v3133_v11  ;;  %v6218_v11 = vld [vmem:[%s10870_s5 + $0xf8] sm:$0xff] }
 0x345   : > { %6487 = vmatpush3.msra.mxu0 %v9106_v14  ;;  %v3392_v14 = vld [vmem:[%s10870_s5 + $0x80] sm:$0xff] }
 0x346   : > { %6488 = vmatprep.subr.mxu0 %v3128_v18  ;;  %v6219_v18 = vld [vmem:[%s10870_s5 + $0x100] sm:$0xff] }
 0x347   : > { %6489 = vmatpush3.msra.mxu0 %v9104_v38  ;;  %v3172_v38 = vld [vmem:[%s10869_s4 + $0x28] sm:$0xff] }
 0x348   : > { %6490 = vmatprep.subr.mxu0 %v3123_v10  ;;  %v6220_v10 = vld [vmem:[%s10870_s5 + $0x108] sm:$0xff] }
 0x349   : > { %6491 = vmatpush3.msra.mxu0 %v9101_v36  ;;  %v3169_v36 = vld [vmem:[%s10869_s4 + $0x10] sm:$0xff]  ;;  %3517 = vmatprep.subr.mxu1 %v6220_v10  ;;  %v6279_v10 = vld [vmem:[%s10870_s5 + $0x1e0] sm:$0xff] }
 0x34a   : > { %6492 = vmatprep.subr.mxu0 %v3118_v43  ;;  %v3383_v43 = vld [vmem:[%s10870_s5 + $0x38] sm:$0xff]  ;;  %3518 = vmatpush1.msra.mxu1 %v6219_v18 }
 0x34b   : > { %6493 = vmatpush3.msra.mxu0 %v9096_v21  ;;  %v3394_v21 = vld [vmem:[%s10870_s5 + $0x90] sm:$0xff]  ;;  %3519 = vmatprep.subr.mxu1 %v6218_v11  ;;  %v6278_v18 = vld [vmem:[%s10870_s5 + $0x1d8] sm:$0xff] }
 0x34c   : > { %6494 = vmatprep.subr.mxu0 %v3113_v17  ;;  %v3389_v17 = vld [vmem:[%s10870_s5 + $0x68] sm:$0xff]  ;;  %3520 = vmatpush1.msra.mxu1 %v6217_v52  ;;  %v6309_v52 = vld [vmem:[%s10870_s5 + $0x250] sm:$0xff] }
 0x34d   : > { %6495 = vmatpush3.msra.mxu0 %v9094_v54  ;;  %v3167_v54 = vld [vmem:[%s10869_s4] sm:$0xff]  ;;  %3521 = vmatprep.subr.mxu1 %v6216_v49 }
 0x34e   : > { %6496 = vmatprep.subr.mxu0 %v9122_v12  ;;  %v3190_v12 = vld [vmem:[%s10869_s4 + $0xb8] sm:$0xff]  ;;  %3522 = vmatpush1.msra.mxu1 %v6215_v6 }
 0x34f   : > { %6497 = vmatpush3.msra.mxu0 %v9092_v20  ;;  %v3397_v20 = vld [vmem:[%s10870_s5 + $0xa8] sm:$0xf]  ;;  %3523 = vmatprep.subr.mxu1 %v6214_v23  ;;  %v6277_v23 = vld [vmem:[%s10870_s5 + $0x1d0] sm:$0xff] }
 0x350   : > { %6498 = vmatprep.subr.mxu0 %v9120_v15  ;;  %v3188_v15 = vld [vmem:[%s10869_s4 + $0xa8] sm:$0xff]  ;;  %3524 = vmatpush1.msra.mxu1 %v6213_v7 }
 0x351   : > { %6499 = vmatpush3.msra.mxu0 %v9090_v32  ;;  %v3170_v32 = vld [vmem:[%s10869_s4 + $0x18] sm:$0xff]  ;;  %3525 = vmatprep.subr.mxu1 %v6212_v58  ;;  %v6276_v58 = vld [vmem:[%s10870_s5 + $0x1c8] sm:$0xff] }
 0x352   : > { %6500 = vmatprep.subr.mxu0 %v9118_v37  ;;  %v3186_v37 = vld [vmem:[%s10869_s4 + $0x98] sm:$0xff]  ;;  %3526 = vmatpush1.msra.mxu1 %v6211_v59  ;;  %v6308_v59 = vld [vmem:[%s10870_s5 + $0x248] sm:$0xff] }
 0x353   : > { %6501 = vmatpush3.msra.mxu0 %v9088_v45  ;;  %v3396_v45 = vld [vmem:[%s10870_s5 + $0xa0] sm:$0xf]  ;;  %3527 = vmatprep.subr.mxu1 %v6210_v25 }
 0x354   : > { %6502 = vmatprep.subr.mxu0 %v9116_v40  ;;  %v3184_v40 = vld [vmem:[%s10869_s4 + $0x88] sm:$0xff]  ;;  %3528 = vmatpush1.msra.mxu1 %v6209_v13 }
 0x355   : > { %6503 = vmatpush3.msra.mxu0 %v9086_v26  ;;  %v3395_v26 = vld [vmem:[%s10870_s5 + $0x98] sm:$0xff] }
 0x356   : > { %6504 = vmatprep.subr.mxu0 %v9114_v35  ;;  %v3182_v35 = vld [vmem:[%s10869_s4 + $0x78] sm:$0xff] }
 0x357   : > { %6505 = vmatpush3.msra.mxu0 %v9084_v61  ;;  %v3393_v61 = vld [vmem:[%s10870_s5 + $0x88] sm:$0xff] }
 0x358   : > { %3306 = vmatmul.mubr.f32.vlgmr.msra.gmra.mxu0 %v3167_v54  ;;  %6247 = vmatprep.subr.msk.mxu0 %vm2235_vm4, %v3397_v20  ;;  %v6284_v54 = vld [vmem:[%s10870_s5 + $0x208] sm:$0xf] }
 0x359   : > { %6196 = vmatprep.mubr.msk.f32.mxu0 %vm3195_vm6, %v3170_v32  ;;  %6248 = vmatpush1.msk.msra.mxu0 %vm2235_vm4, %v3396_v45 }
 0x35a   : > { %3692 = vmatprep.subr.mxu0 %v3395_v26  ;;  %6285 = vmatprep.subr.msk.mxu1 %vm2235_vm4, %v6284_v54  ;;  %v6321_v26 = vld [vmem:[%s10870_s5 + $0x2b0] sm:$0xf] }
 0x35b   : > { %3693 = vmatpush1.msra.mxu0 %v3394_v21 }
 0x35c   : > { %3311 = vmatmul.mubr.f32.gmra.mxu0 %v3169_v36  ;;  %3694 = vmatprep.subr.mxu0 %v3393_v61  ;;  %v6320_v36 = vld [vmem:[%s10870_s5 + $0x2a8] sm:$0xff]  ;;  %v6319_v61 = vld [vmem:[%s10870_s5 + $0x2a0] sm:$0xff] }
 0x35d   : > { %6197 = vmatprep.mubr.msk.f32.mxu0 %vm3195_vm6, %v3172_v38  ;;  %3695 = vmatpush1.msra.mxu0 %v3392_v14  ;;  %v6318_v14 = vld [vmem:[%s10870_s5 + $0x298] sm:$0xff] }
 0x35e   : > { %3696 = vmatprep.subr.mxu0 %v3391_v62 }
 0x35f   : > { %3697 = vmatpush1.msra.mxu0 %v3390_v50 }
 0x360   : > { %3316 = vmatmul.mubr.f32.gmra.mxu0 %v3171_v30  ;;  %3698 = vmatprep.subr.mxu0 %v3389_v17  ;;  %v6317_v30 = vld [vmem:[%s10870_s5 + $0x290] sm:$0xff]  ;;  %v6280_v17 = vld [vmem:[%s10870_s5 + $0x1e8] sm:$0xff] }
 0x361   : > { %6198 = vmatprep.mubr.msk.f32.mxu0 %vm3195_vm6, %v3174_v56  ;;  %3699 = vmatpush1.msra.mxu0 %v3388_v2  ;;  %v6312_v2 = vld [vmem:[%s10870_s5 + $0x268] sm:$0xff] }
 0x362   : > { %3700 = vmatprep.subr.mxu0 %v3387_v34 }
 0x363   : > { %3701 = vmatpush1.msra.mxu0 %v3386_v27 }
 0x364   : > { %3321 = vmatmul.mubr.f32.gmra.mxu0 %v3173_v28  ;;  %3702 = vmatprep.subr.mxu0 %v3385_v4  ;;  %v6316_v28 = vld [vmem:[%s10870_s5 + $0x288] sm:$0xff]  ;;  %v6311_v4 = vld [vmem:[%s10870_s5 + $0x260] sm:$0xff] }
 0x365   : > { %6199 = vmatprep.mubr.msk.f32.mxu0 %vm3195_vm6, %v3176_v31  ;;  %3703 = vmatpush1.msra.mxu0 %v3384_v48 }
 0x366   : > { %3704 = vmatprep.subr.mxu0 %v3383_v43 }
 0x367   : > { %3705 = vmatpush1.msra.mxu0 %v3382_v1 }
 0x368   : > { %3326 = vmatmul.mubr.f32.gmra.mxu0 %v3175_v51  ;;  %3706 = vmatprep.subr.mxu0 %v3381_v8 }
 0x369   : > { %6200 = vmatprep.mubr.msk.f32.mxu0 %vm3195_vm6, %v3178_v63  ;;  %3707 = vmatpush1.msra.mxu0 %v3380_v0 }
 0x36a   : > { %3708 = vmatprep.subr.mxu0 %v3379_v47  ;;  %v6310_v47 = vld [vmem:[%s10870_s5 + $0x258] sm:$0xff] }
 0x36b   : > { %3709 = vmatpush1.msra.mxu0 %v3378_v41 }
 0x36c   : > { %3331 = vmatmul.mubr.f32.gmra.mxu0 %v3177_v39  ;;  %3710 = vmatprep.subr.mxu0 %v3377_v29  ;;  %v6315_v39 = vld [vmem:[%s10870_s5 + $0x280] sm:$0xff] }
 0x36d   : > { %6201 = vmatprep.mubr.msk.f32.mxu0 %vm3195_vm6, %v3180_v9  ;;  %3711 = vmatpush1.msra.mxu0 %v3376_v19 }
 0x36e   : > { %6323 = vmatprep.subr.msk.mxu0 %vm2235_vm4, %v6322_v53  ;;  %v6307_v53 = vld [vmem:[%s10870_s5 + $0x240] sm:$0xff] }
 0x370   : > { %3336 = vmatmul.mubr.f32.gmra.mxu0 %v3179_v44 }
 0x371   : > { %6202 = vmatprep.mubr.msk.f32.mxu0 %vm3195_vm6, %v3182_v35 }
 0x374   : > { %3341 = vmatmul.mubr.f32.gmra.mxu0 %v3181_v57 }
 0x375   : > { %6203 = vmatprep.mubr.msk.f32.mxu0 %vm3195_vm6, %v3184_v40  ;;  %v6283_v40 = vld [vmem:[%s10870_s5 + $0x200] sm:$0xf] }
 0x378   : > { %3346 = vmatmul.mubr.f32.gmra.mxu0 %v3183_v22 }
 0x379   : > { %6204 = vmatprep.mubr.msk.f32.mxu0 %vm3195_vm6, %v3186_v37  ;;  %v6282_v37 = vld [vmem:[%s10870_s5 + $0x1f8] sm:$0xff] }
 0x37c   : > { %3351 = vmatmul.mubr.f32.gmra.mxu0 %v3185_v33  ;;  %v6314_v33 = vld [vmem:[%s10870_s5 + $0x278] sm:$0xff] }
 0x37d   : > { %6205 = vmatprep.mubr.msk.f32.mxu0 %vm3195_vm6, %v3188_v15 }
 0x380   : > { %3356 = vmatmul.mubr.f32.gmra.mxu0 %v3187_v24 }
 0x381   : > { %6206 = vmatprep.mubr.msk.f32.mxu0 %vm3195_vm6, %v3190_v12  ;;  %v6313_v12 = vld [vmem:[%s10870_s5 + $0x270] sm:$0xff] }
 0x384   : > { %3361 = vmatmul.mubr.f32.gmra.mxu0 %v3189_v5 }
 0x385   : > { %6207 = vmatprep.mubr.msk.f32.mxu0 %vm3195_vm6, %v3192_v60 }
 0x388   : > { %3366 = vmatmul.mubr.f32.gmra.mxu0 %v3191_v42 }
 0x389   : > { %6208 = vmatprep.mubr.msk.f32.mxu0 %vm3195_vm6, %v3194_v3 }
 0x38c   : > { %3371 = vmatmul.mubr.f32.gmra.mxu0 %v3193_v16  ;;  %v6281_v16 = vld [vmem:[%s10870_s5 + $0x1f0] sm:$0xff] }
 0x38d   : > { %3744 = vmatprep.mubr.f32.mxu0 %v11093_v46 }
 0x418   : > { %v6506_v20 = vpop.f32.mrf.mxu0 }
 0x41a   : > { %v6507_v32 = vpop.f32.mrf.mxu0 }
 0x41b   : > { %v9382_v45 = vadd.f32 %v6507_v32, %v6506_v20 }
 0x41c   : > { %v6509_v21 = vpop.f32.mrf.mxu0 }
 0x41d   : > { %6249 = vmatmul.mubr.msk.f32.vlgmr.msra.gmra.mxu0 %vm3462_vm7, %v9382_v45  ;;  %v3435_v31 = vrot.slane %v9382_v45, 1  ;;  %v4374_v9 = vrot.slane %v9382_v45, 4 }
 0x41e   : > { %v6510_v38 = vpop.f32.mrf.mxu0  ;;  %3750 = vmatprep.mubr.f32.mxu0 %v11093_v46  ;;  %6324 = vmatpush1.msk.msra.mxu0 %vm2235_vm4, %v6321_v26 }
 0x41f   : > { %v9400_v62 = vadd.f32 %v6510_v38, %v6509_v21  ;;  %4186 = vmatprep.subr.mxu0 %v6320_v36  ;;  %v6275_v21 = vld [vmem:[%s10870_s5 + $0x1c0] sm:$0xff]  ;;  %v6306_v38 = vld [vmem:[%s10870_s5 + $0x238] sm:$0xff] }
 0x420   : > { %v6512_v56 = vpop.f32.mrf.mxu0  ;;  %4187 = vmatpush1.msra.mxu0 %v6319_v61  ;;  %v6274_v61 = vld [vmem:[%s10870_s5 + $0x1b8] sm:$0xff] }
 0x421   : > { %v3436_v51 = vrot.slane %v9400_v62, 1  ;;  %v4375_v63 = vrot.slane %v9400_v62, 4  ;;  %6250 = vmatmul.mubr.msk.f32.gmra.mxu0 %vm3462_vm7, %v9400_v62  ;;  %4188 = vmatprep.subr.mxu0 %v6318_v14 }
 0x422   : > { %v6513_v44 = vpop.f32.mrf.mxu0  ;;  %3756 = vmatprep.mubr.f32.mxu0 %v11093_v46  ;;  %4189 = vmatpush1.msra.mxu0 %v6317_v30 }
 0x423   : > { %v9418_v35 = vadd.f32 %v6513_v44, %v6512_v56  ;;  %v3437_v57 = vsel %vm603_vm0, %v3435_v31, %v3436_v51  ;;  %4190 = vmatprep.subr.mxu0 %v6316_v28  ;;  %v9432_v15 = vsel %vm2235_vm4, %v4374_v9, %v4375_v63  ;;  %v6305_v56 = vld [vmem:[%s10870_s5 + $0x230] sm:$0xff]  ;;  %v6272_v44 = vld [vmem:[%s10870_s5 + $0x1a8] sm:$0xff] }
 0x424   : > { %v6515_v22 = vpop.f32.mrf.mxu0  ;;  %6233 = vmatmul.mubr.msk.f32.vlgmr.msra.gmra.mxu1 %vm3462_vm7, %v3437_v57  ;;  %4191 = vmatpush1.msra.mxu0 %v6315_v39  ;;  %v6273_v39 = vld [vmem:[%s10870_s5 + $0x1b0] sm:$0xff]  ;;  %v6304_v57 = vld [vmem:[%s10870_s5 + $0x228] sm:$0xff] }
 0x425   : > { %3567 = vmatprep.mubr.f32.mxu1 %v11093_v46  ;;  %v3438_v24 = vrot.slane %v9418_v35, 1  ;;  %6251 = vmatmul.mubr.msk.f32.gmra.mxu0 %vm3462_vm7, %v9418_v35  ;;  %v4377_v5 = vrot.slane %v9418_v35, 4 }
 0x426   : > { %v6516_v60 = vpop.f32.mrf.mxu0  ;;  %3762 = vmatprep.mubr.f32.mxu0 %v11093_v46  ;;  %6286 = vmatpush1.msk.msra.mxu1 %vm2235_vm4, %v6283_v40 }
 0x427   : > { %v9444_v42 = vadd.f32 %v6516_v60, %v6515_v22  ;;  %v3439_v3 = vsel %vm603_vm0, %v3436_v51, %v3438_v24  ;;  %3925 = vmatprep.subr.mxu1 %v6282_v37  ;;  %4192 = vmatprep.subr.mxu0 %v6314_v33  ;;  %v9458_v34 = vsel %vm2235_vm4, %v4375_v63, %v4377_v5  ;;  %v6303_v37 = vld [vmem:[%s10870_s5 + $0x220] sm:$0xff] }
 0x428   : > { %v6518_v50 = vpop.f32.mrf.mxu0  ;;  %6234 = vmatmul.mubr.msk.f32.gmra.mxu1 %vm3462_vm7, %v3439_v3  ;;  %4193 = vmatpush1.msra.mxu0 %v6313_v12  ;;  %v6271_v60 = vld [vmem:[%s10870_s5 + $0x1a0] sm:$0xff] }
 0x429   : > { %3573 = vmatprep.mubr.f32.mxu1 %v11093_v46  ;;  %v3440_v27 = vrot.slane %v9444_v42, 1  ;;  %6252 = vmatmul.mubr.msk.f32.gmra.mxu0 %vm3462_vm7, %v9444_v42  ;;  %v4379_v48 = vrot.slane %v9444_v42, 4 }
 0x42a   : > { %v6519_v43 = vpop.f32.mrf.mxu0  ;;  %3768 = vmatprep.mubr.f32.mxu0 %v11093_v46  ;;  %3926 = vmatpush1.msra.mxu1 %v6281_v16  ;;  %v6270_v16 = vld [vmem:[%s10870_s5 + $0x198] sm:$0xff] }
 0x42b   : > { %v9469_v1 = vadd.f32 %v6519_v43, %v6518_v50  ;;  %v3441_v8 = vsel %vm603_vm0, %v3438_v24, %v3440_v27  ;;  %3927 = vmatprep.subr.mxu1 %v6280_v17  ;;  %4194 = vmatprep.subr.mxu0 %v6312_v2  ;;  %v9483_v11 = vsel %vm2235_vm4, %v4377_v5, %v4379_v48  ;;  %v6302_v50 = vld [vmem:[%s10870_s5 + $0x218] sm:$0xff] }
 0x42c   : > { %v6521_v0 = vpop.f32.mrf.mxu0  ;;  %6235 = vmatmul.mubr.msk.f32.gmra.mxu1 %vm3462_vm7, %v3441_v8  ;;  %4195 = vmatpush1.msra.mxu0 %v6311_v4 }
 0x42d   : > { %3579 = vmatprep.mubr.f32.mxu1 %v11093_v46  ;;  %v3442_v41 = vrot.slane %v9469_v1, 1  ;;  %6253 = vmatmul.mubr.msk.f32.gmra.mxu0 %vm3462_vm7, %v9469_v1  ;;  %v4381_v29 = vrot.slane %v9469_v1, 4 }
 0x42e   : > { %v6522_v49 = vpop.f32.mrf.mxu0  ;;  %3774 = vmatprep.mubr.f32.mxu0 %v11093_v46  ;;  %3928 = vmatpush1.msra.mxu1 %v6279_v10  ;;  %v6269_v10 = vld [vmem:[%s10870_s5 + $0x190] sm:$0xff] }
 0x42f   : > { %v9494_v19 = vadd.f32 %v6522_v49, %v6521_v0  ;;  %v3443_v6 = vsel %vm603_vm0, %v3440_v27, %v3442_v41  ;;  %3929 = vmatprep.subr.mxu1 %v6278_v18  ;;  %4196 = vmatprep.subr.mxu0 %v6310_v47  ;;  %v9508_v25 = vsel %vm2235_vm4, %v4379_v48, %v4381_v29  ;;  %v6301_v27 = vld [vmem:[%s10870_s5 + $0x210] sm:$0xff]  ;;  %v6268_v18 = vld [vmem:[%s10870_s5 + $0x188] sm:$0xff] }
 0x430   : > { %v6524_v7 = vpop.f32.mrf.mxu0  ;;  %6236 = vmatmul.mubr.msk.f32.gmra.mxu1 %vm3462_vm7, %v3443_v6  ;;  %4197 = vmatpush1.msra.mxu0 %v6309_v52 }
 0x431   : > { %3585 = vmatprep.mubr.f32.mxu1 %v11093_v46  ;;  %v3444_v13 = vrot.slane %v9494_v19, 1  ;;  %6254 = vmatmul.mubr.msk.f32.gmra.mxu0 %vm3462_vm7, %v9494_v19  ;;  %v4383_v54 = vrot.slane %v9494_v19, 4 }
 0x432   : > { %v6525_v20 = vpop.f32.mrf.mxu0  ;;  %3780 = vmatprep.mubr.f32.mxu0 %v11093_v46  ;;  %3930 = vmatpush1.msra.mxu1 %v6277_v23  ;;  %v6267_v23 = vld [vmem:[%s10870_s5 + $0x180] sm:$0xff] }
 0x433   : > { %v9519_v32 = vadd.f32 %v6525_v20, %v6524_v7  ;;  %v3445_v26 = vsel %vm603_vm0, %v3442_v41, %v3444_v13  ;;  %3931 = vmatprep.subr.mxu1 %v6276_v58  ;;  %4198 = vmatprep.subr.mxu0 %v6308_v59  ;;  %v9533_v14 = vsel %vm2235_vm4, %v4381_v29, %v4383_v54  ;;  %v6266_v58 = vld [vmem:[%s10870_s5 + $0x178] sm:$0xff] }
 0x434   : > { %v6527_v36 = vpop.f32.mrf.mxu0  ;;  %6237 = vmatmul.mubr.msk.f32.gmra.mxu1 %vm3462_vm7, %v3445_v26  ;;  %4199 = vmatpush1.msra.mxu0 %v6307_v53 }
 0x435   : > { %3591 = vmatprep.mubr.f32.mxu1 %v11093_v46  ;;  %v3446_v30 = vrot.slane %v9519_v32, 1  ;;  %6255 = vmatmul.mubr.msk.f32.gmra.mxu0 %vm3462_vm7, %v9519_v32  ;;  %v4385_v28 = vrot.slane %v9519_v32, 4 }
 0x436   : > { %v6528_v31 = vpop.f32.mrf.mxu0  ;;  %3786 = vmatprep.mubr.f32.mxu0 %v11093_v46  ;;  %3932 = vmatpush1.msra.mxu1 %v6275_v21  ;;  %v6265_v21 = vld [vmem:[%s10870_s5 + $0x170] sm:$0xff] }
 0x437   : > { %v9544_v51 = vadd.f32 %v6528_v31, %v6527_v36  ;;  %v3447_v63 = vsel %vm603_vm0, %v3444_v13, %v3446_v30  ;;  %3933 = vmatprep.subr.mxu1 %v6274_v61  ;;  %4200 = vmatprep.subr.mxu0 %v6306_v38  ;;  %v9558_v40 = vsel %vm2235_vm4, %v4383_v54, %v4385_v28  ;;  %v6264_v61 = vld [vmem:[%s10870_s5 + $0x168] sm:$0xff] }
 0x438   : > { %v6530_v9 = vpop.f32.mrf.mxu0  ;;  %6238 = vmatmul.mubr.msk.f32.gmra.mxu1 %vm3462_vm7, %v3447_v63  ;;  %4201 = vmatpush1.msra.mxu0 %v6305_v56 }
 0x439   : > { %3597 = vmatprep.mubr.f32.mxu1 %v11093_v46  ;;  %v3448_v22 = vrot.slane %v9544_v51, 1  ;;  %6256 = vmatmul.mubr.msk.f32.gmra.mxu0 %vm3462_vm7, %v9544_v51  ;;  %v4387_v33 = vrot.slane %v9544_v51, 4 }
 0x43a   : > { %v6531_v24 = vpop.f32.mrf.mxu0  ;;  %3792 = vmatprep.mubr.f32.mxu0 %v11093_v46  ;;  %3934 = vmatpush1.msra.mxu1 %v6273_v39  ;;  %v6263_v39 = vld [vmem:[%s10870_s5 + $0x160] sm:$0xff] }
 0x43b   : > { %v9569_v12 = vadd.f32 %v6531_v24, %v6530_v9  ;;  %v3449_v5 = vsel %vm603_vm0, %v3446_v30, %v3448_v22  ;;  %3935 = vmatprep.subr.mxu1 %v6272_v44  ;;  %4202 = vmatprep.subr.mxu0 %v6304_v57  ;;  %v9583_v17 = vsel %vm2235_vm4, %v4385_v28, %v4387_v33  ;;  %v6360_v44 = vld [vmem:[%s10870_s5 + $0x368] sm:$0xf] }
 0x43c   : > { %v6533_v3 = vpop.f32.mrf.mxu0  ;;  %6239 = vmatmul.mubr.msk.f32.gmra.mxu1 %vm3462_vm7, %v3449_v5  ;;  %4203 = vmatpush1.msra.mxu0 %v6303_v37 }
 0x43d   : > { %3603 = vmatprep.mubr.f32.mxu1 %v11093_v46  ;;  %v3450_v2 = vrot.slane %v9569_v12, 1  ;;  %6257 = vmatmul.mubr.msk.f32.gmra.mxu0 %vm3462_vm7, %v9569_v12  ;;  %v4389_v4 = vrot.slane %v9569_v12, 4 }
 0x43e   : > { %v6534_v48 = vpop.f32.mrf.mxu0  ;;  %3798 = vmatprep.mubr.f32.mxu0 %v11093_v46  ;;  %3936 = vmatpush1.msra.mxu1 %v6271_v60  ;;  %v4114_v60 = vrot.slane %v9400_v62, 3 }
 0x43f   : > { %v9594_v43 = vadd.f32 %v6534_v48, %v6533_v3  ;;  %v3451_v8 = vsel %vm603_vm0, %v3448_v22, %v3450_v2  ;;  %3937 = vmatprep.subr.mxu1 %v6270_v16  ;;  %4204 = vmatprep.subr.mxu0 %v6302_v50  ;;  %v9605_v47 = vsel %vm2235_vm4, %v4387_v33, %v4389_v4 }
 0x440   : > { %v6536_v0 = vpop.f32.mrf.mxu0  ;;  %6240 = vmatmul.mubr.msk.f32.gmra.mxu1 %vm3462_vm7, %v3451_v8  ;;  %4205 = vmatpush1.msra.mxu0 %v6301_v27  ;;  %v4116_v8 = vrot.slane %v9418_v35, 3 }
 0x441   : > { %3609 = vmatprep.mubr.f32.mxu1 %v11093_v46  ;;  %v3452_v41 = vrot.slane %v9594_v43, 1  ;;  %6258 = vmatmul.mubr.msk.f32.gmra.mxu0 %vm3462_vm7, %v9594_v43  ;;  %v4391_v52 = vrot.slane %v9594_v43, 4 }
 0x442   : > { %v6537_v29 = vpop.f32.mrf.mxu0  ;;  %3804 = vmatprep.mubr.f32.mxu0 %v11093_v46  ;;  %3938 = vmatpush1.msra.mxu1 %v6269_v10  ;;  %v3853_v10 = vrot.slane %v9400_v62, 2  ;;  %v6359_v62 = vld [vmem:[%s10870_s5 + $0x360] sm:$0xf] }
 0x443   : > { %v9613_v49 = vadd.f32 %v6537_v29, %v6536_v0  ;;  %v3453_v6 = vsel %vm603_vm0, %v3450_v2, %v3452_v41  ;;  %3939 = vmatprep.subr.mxu1 %v6268_v18  ;;  %v9624_v59 = vsel %vm2235_vm4, %v4389_v4, %v4391_v52  ;;  %4742 = vmatprep.subr.mxu0 %v11093_v46  ;;  %v4113_v2 = vrot.slane %v9382_v45, 3 }
 0x444   : > { %v6539_v7 = vpop.f32.mrf.mxu0  ;;  %6241 = vmatmul.mubr.msk.f32.gmra.mxu1 %vm3462_vm7, %v3453_v6  ;;  %v4117_v0 = vsel %vm1777_vm2, %v4114_v60, %v4116_v8  ;;  %v4118_v18 = vrot.slane %v9444_v42, 3  ;;  %v3855_v29 = vrot.slane %v9418_v35, 2 }
 0x445   : > { %3615 = vmatprep.mubr.f32.mxu1 %v11093_v46  ;;  %v3454_v13 = vrot.slane %v9613_v49, 1  ;;  %6259 = vmatmul.mubr.msk.f32.gmra.mxu0 %vm3462_vm7, %v9613_v49  ;;  %v4393_v53 = vrot.slane %v9613_v49, 4  ;;  %v4115_v48 = vsel %vm1777_vm2, %v4113_v2, %v4114_v60  ;;  %v3865_v60 = vrot.slane %v9544_v51, 2 }
 0x446   : > { %v6540_v54 = vpop.f32.mrf.mxu0  ;;  %3810 = vmatprep.mubr.f32.mxu0 %v11093_v46  ;;  %3940 = vmatpush1.msra.mxu1 %v6267_v23  ;;  %v4119_v6 = vsel %vm1777_vm2, %v4116_v8, %v4118_v18  ;;  %v6358_v23 = vld [vmem:[%s10870_s5 + $0x358] sm:$0xff]  ;;  %v3856_v35 = vsel %vm1319_vm3, %v3853_v10, %v3855_v29  ;;  %v3867_v8 = vrot.slane %v9569_v12, 2 }
 0x447   : > { %v9633_v20 = vadd.f32 %v6540_v54, %v6539_v7  ;;  %v3455_v26 = vsel %vm603_vm0, %v3452_v41, %v3454_v13  ;;  %3941 = vmatprep.subr.mxu1 %v6266_v58  ;;  %v9644_v38 = vsel %vm2235_vm4, %v4391_v52, %v4393_v53  ;;  %v3852_v41 = vrot.slane %v9382_v45, 2  ;;  %v6357_v58 = vld [vmem:[%s10870_s5 + $0x350] sm:$0xff]  ;;  %v6356_v54 = vld [vmem:[%s10870_s5 + $0x348] sm:$0xff] }
 0x448   : > { %v6542_v36 = vpop.f32.mrf.mxu0  ;;  %6242 = vmatmul.mubr.msk.f32.gmra.mxu1 %vm3462_vm7, %v3455_v26  ;;  %v4120_v45 = vrot.slane %v9469_v1, 3  ;;  %v3857_v7 = vrot.slane %v9444_v42, 2  ;;  %v3859_v26 = vrot.slane %v9469_v1, 2 }
 0x449   : > { %3621 = vmatprep.mubr.f32.mxu1 %v11093_v46  ;;  %v3456_v30 = vrot.slane %v9633_v20, 1  ;;  %6260 = vmatmul.mubr.msk.f32.gmra.mxu0 %vm3462_vm7, %v9633_v20  ;;  %v4395_v56 = vrot.slane %v9633_v20, 4  ;;  %v3854_v52 = vsel %vm1319_vm3, %v3852_v41, %v3853_v10  ;;  %v6347_v10 = vld [vmem:[%s10870_s5 + $0x300] sm:$0xff]  ;;  %v6346_v41 = vld [vmem:[%s10870_s5 + $0x2f8] sm:$0xff] }
 0x44a   : > { %v6543_v28 = vpop.f32.mrf.mxu0  ;;  %3816 = vmatprep.mubr.f32.mxu0 %v11093_v46  ;;  %3942 = vmatpush1.msra.mxu1 %v6265_v21  ;;  %v3858_v42 = vsel %vm1319_vm3, %v3855_v29, %v3857_v7  ;;  %v6355_v21 = vld [vmem:[%s10870_s5 + $0x340] sm:$0xff]  ;;  %v3860_v1 = vsel %vm1319_vm3, %v3857_v7, %v3859_v26  ;;  %v6345_v29 = vld [vmem:[%s10870_s5 + $0x2f0] sm:$0xff] }
 0x44b   : > { %v9652_v31 = vadd.f32 %v6543_v28, %v6542_v36  ;;  %v3457_v63 = vsel %vm603_vm0, %v3454_v13, %v3456_v30  ;;  %3943 = vmatprep.subr.mxu1 %v6264_v61  ;;  %v9663_v57 = vsel %vm2235_vm4, %v4393_v53, %v4395_v56  ;;  %v4121_v13 = vsel %vm1777_vm2, %v4118_v18, %v4120_v45  ;;  %v6353_v28 = vld [vmem:[%s10870_s5 + $0x330] sm:$0xff] }
 0x44c   : > { %v6545_v9 = vpop.f32.mrf.mxu0  ;;  %6243 = vmatmul.mubr.msk.f32.gmra.mxu1 %vm3462_vm7, %v3457_v63  ;;  %v4122_v53 = vrot.slane %v9494_v19, 3  ;;  %v4124_v61 = vrot.slane %v9519_v32, 3  ;;  %v4132_v18 = vrot.slane %v9613_v49, 3 }
 0x44d   : > { %3627 = vmatprep.mubr.f32.mxu1 %v11093_v46  ;;  %v3458_v22 = vrot.slane %v9652_v31, 1  ;;  %6261 = vmatmul.mubr.msk.f32.gmra.mxu0 %vm3462_vm7, %v9652_v31  ;;  %v4397_v37 = vrot.slane %v9652_v31, 4 }
 0x44e   : > { %v6546_v33 = vpop.f32.mrf.mxu0  ;;  %3822 = vmatprep.mubr.f32.mxu0 %v11093_v46  ;;  %3944 = vmatpush1.msra.mxu1 %v6263_v39  ;;  %v4123_v36 = vsel %vm1777_vm2, %v4120_v45, %v4122_v53  ;;  %v4125_v63 = vsel %vm1777_vm2, %v4122_v53, %v4124_v61  ;;  %v4126_v39 = vrot.slane %v9544_v51, 3  ;;  %v6344_v45 = vld [vmem:[%s10870_s5 + $0x2e8] sm:$0xff]  ;;  %v3873_v53 = vrot.slane %v9633_v20, 2 }
 0x44f   : > { %v9671_v24 = vadd.f32 %v6546_v33, %v6545_v9  ;;  %v3459_v5 = vsel %vm603_vm0, %v3456_v30, %v3458_v22  ;;  %6361 = vmatprep.subr.msk.mxu1 %vm2235_vm4, %v6360_v44  ;;  %v9678_v3 = vsel %vm2235_vm4, %v4395_v56, %v4397_v37  ;;  %v6354_v30 = vld [vmem:[%s10870_s5 + $0x338] sm:$0xff]  ;;  %v3861_v56 = vrot.slane %v9494_v19, 2  ;;  %v6352_v9 = vld [vmem:[%s10870_s5 + $0x328] sm:$0xff] }
 0x450   : > { %6244 = vmatmul.mubr.msk.f32.gmra.mxu1 %vm3462_vm7, %v3459_v5  ;;  %v3863_v44 = vrot.slane %v9519_v32, 2  ;;  %v4128_v33 = vrot.slane %v9569_v12, 3  ;;  %v6350_v5 = vld [vmem:[%s10870_s5 + $0x318] sm:$0xff]  ;;  %v3868_v12 = vsel %vm1319_vm3, %v3865_v60, %v3867_v8 }
 0x451   : > { %3633 = vmatprep.mubr.f32.mxu1 %v11093_v46  ;;  %v3460_v16 = vrot.slane %v9671_v24, 1  ;;  %6262 = vmatmul.mubr.msk.f32.gmra.mxu0 %vm3462_vm7, %v9671_v24  ;;  %v4399_v50 = vrot.slane %v9671_v24, 4  ;;  %v3862_v19 = vsel %vm1319_vm3, %v3859_v26, %v3861_v56  ;;  %v4138_v26 = vrot.slane %v9671_v24, 3 }
 0x452   : > { %4238 = vmatprep.mubr.f32.mxu0 %v11093_v46  ;;  %v3864_v32 = vsel %vm1319_vm3, %v3861_v56, %v3863_v44  ;;  %v4129_v2 = vsel %vm1777_vm2, %v4126_v39, %v4128_v33  ;;  %v3866_v51 = vsel %vm1319_vm3, %v3863_v44, %v3865_v60  ;;  %v4699_v44 = vld [vmem:[%s10872_s7 + $0x98] sm:$0xff]  ;;  %v4697_v60 = vld [vmem:[%s10872_s7 + $0x88] sm:$0xff] }
 0x453   : > { %v3461_v27 = vsel %vm603_vm0, %v3458_v22, %v3460_v16  ;;  %v9691_v4 = vsel %vm2235_vm4, %v4397_v37, %v4399_v50  ;;  %v6351_v22 = vld [vmem:[%s10870_s5 + $0x320] sm:$0xff]  ;;  %v4127_v37 = vsel %vm1777_vm2, %v4124_v61, %v4126_v39 }
 0x454   : > { %6245 = vmatmul.mubr.msk.f32.gmra.mxu1 %vm3462_vm7, %v3461_v27  ;;  %v4130_v27 = vrot.slane %v9594_v43, 3  ;;  %v6339_v61 = vld [vmem:[%s10870_s5 + $0x2c0] sm:$0xff] }
 0x455   : > { %3639 = vmatprep.mubr.f32.mxu1 %v11093_v46  ;;  %6325 = vmatmul.mubr.msk.f32.vlgmr.msra.gmra.mxu0 %vm3462_vm7, %v4115_v48  ;;  %v6348_v48 = vld [vmem:[%s10870_s5 + $0x308] sm:$0xff] }
 0x456   : > { %4244 = vmatprep.mubr.f32.mxu0 %v11093_v46 }
 0x458   : > { %6246 = vmatmul.mubr.msk.f32.gmra.mxu1 %vm3462_vm7, %v3460_v16  ;;  %v6349_v16 = vld [vmem:[%s10870_s5 + $0x310] sm:$0xff] }
 0x459   : > { %3977 = vmatprep.mubr.f32.mxu1 %v11093_v46  ;;  %6326 = vmatmul.mubr.msk.f32.gmra.mxu0 %vm3462_vm7, %v4117_v0  ;;  %v4131_v0 = vsel %vm1777_vm2, %v4128_v33, %v4130_v27  ;;  %v4698_v33 = vld [vmem:[%s10872_s7 + $0x90] sm:$0xff] }
 0x45a   : > { %4250 = vmatprep.mubr.f32.mxu0 %v11093_v46 }
 0x45c   : > { %6287 = vmatmul.mubr.msk.f32.vlgmr.msra.gmra.mxu1 %vm3462_vm7, %v3854_v52  ;;  %v3869_v52 = vrot.slane %v9594_v43, 2 }
 0x45d   : > { %3983 = vmatprep.mubr.f32.mxu1 %v11093_v46  ;;  %6327 = vmatmul.mubr.msk.f32.gmra.mxu0 %vm3462_vm7, %v4119_v6  ;;  %v4134_v6 = vrot.slane %v9633_v20, 3 }
 0x45e   : > { %4256 = vmatprep.mubr.f32.mxu0 %v11093_v46  ;;  %6362 = vmatpush1.msk.msra.mxu1 %vm2235_vm4, %v6359_v62  ;;  %v4133_v62 = vsel %vm1777_vm2, %v4130_v27, %v4132_v18  ;;  %v3870_v43 = vsel %vm1319_vm3, %v3867_v8, %v3869_v52  ;;  %v4696_v27 = vld [vmem:[%s10872_s7 + $0x80] sm:$0xff] }
 0x45f   : > { %4447 = vmatprep.subr.mxu1 %v6358_v23  ;;  %v3871_v23 = vrot.slane %v9613_v49, 2  ;;  %v4135_v7 = vsel %vm1777_vm2, %v4132_v18, %v4134_v6 }
 0x460   : > { %6288 = vmatmul.mubr.msk.f32.gmra.mxu1 %vm3462_vm7, %v3856_v35  ;;  %v6343_v35 = vld [vmem:[%s10870_s5 + $0x2e0] sm:$0xff] }
 0x461   : > { %3989 = vmatprep.mubr.f32.mxu1 %v11093_v46  ;;  %6328 = vmatmul.mubr.msk.f32.gmra.mxu0 %vm3462_vm7, %v4121_v13  ;;  %v6342_v13 = vld [vmem:[%s10870_s5 + $0x2d8] sm:$0xff]  ;;  %v3872_v49 = vsel %vm1319_vm3, %v3869_v52, %v3871_v23  ;;  %v3874_v20 = vsel %vm1319_vm3, %v3871_v23, %v3873_v53 }
 0x462   : > { %4262 = vmatprep.mubr.f32.mxu0 %v11093_v46  ;;  %4448 = vmatpush1.msra.mxu1 %v6357_v58  ;;  %v4136_v58 = vrot.slane %v9652_v31, 3 }
 0x463   : > { %4449 = vmatprep.subr.mxu1 %v6356_v54  ;;  %v6341_v54 = vld [vmem:[%s10870_s5 + $0x2d0] sm:$0xff] }
 0x464   : > { %6289 = vmatmul.mubr.msk.f32.gmra.mxu1 %vm3462_vm7, %v3858_v42  ;;  %v4137_v42 = vsel %vm1777_vm2, %v4134_v6, %v4136_v58 }
 0x465   : > { %3995 = vmatprep.mubr.f32.mxu1 %v11093_v46  ;;  %6329 = vmatmul.mubr.msk.f32.gmra.mxu0 %vm3462_vm7, %v4123_v36  ;;  %v3875_v36 = vrot.slane %v9652_v31, 2  ;;  %v3877_v31 = vrot.slane %v9671_v24, 2  ;;  %v4684_v24 = vld [vmem:[%s10872_s7 + $0x20] sm:$0xff] }
 0x466   : > { %4268 = vmatprep.mubr.f32.mxu0 %v11093_v46  ;;  %4450 = vmatpush1.msra.mxu1 %v6355_v21  ;;  %v6340_v21 = vld [vmem:[%s10870_s5 + $0x2c8] sm:$0xff] }
 0x467   : > { %4451 = vmatprep.subr.mxu1 %v6354_v30  ;;  %v4139_v30 = vsel %vm1777_vm2, %v4136_v58, %v4138_v26  ;;  %v3878_v56 = vsel %vm1319_vm3, %v3875_v36, %v3877_v31 }
 0x468   : > { %6290 = vmatmul.mubr.msk.f32.gmra.mxu1 %vm3462_vm7, %v3860_v1  ;;  %v3876_v1 = vsel %vm1319_vm3, %v3873_v53, %v3875_v36 }
 0x469   : > { %4001 = vmatprep.mubr.f32.mxu1 %v11093_v46  ;;  %6330 = vmatmul.mubr.msk.f32.gmra.mxu0 %vm3462_vm7, %v4125_v63  ;;  %v4681_v63 = vld [vmem:[%s10872_s7 + $0x8] sm:$0xff] }
 0x46a   : > { %4274 = vmatprep.mubr.f32.mxu0 %v11093_v46  ;;  %4452 = vmatpush1.msra.mxu1 %v6353_v28 }
 0x46b   : > { %4453 = vmatprep.subr.mxu1 %v6352_v9  ;;  %v4680_v9 = vld [vmem:[%s10872_s7] sm:$0xff] }
 0x46c   : > { %6291 = vmatmul.mubr.msk.f32.gmra.mxu1 %vm3462_vm7, %v3862_v19 }
 0x46d   : > { %4007 = vmatprep.mubr.f32.mxu1 %v11093_v46  ;;  %6331 = vmatmul.mubr.msk.f32.gmra.mxu0 %vm3462_vm7, %v4127_v37 }
 0x46e   : > { %4280 = vmatprep.mubr.f32.mxu0 %v11093_v46  ;;  %4454 = vmatpush1.msra.mxu1 %v6351_v22 }
 0x46f   : > { %4455 = vmatprep.subr.mxu1 %v6350_v5 }
 0x470   : > { %6292 = vmatmul.mubr.msk.f32.gmra.mxu1 %vm3462_vm7, %v3864_v32 }
 0x471   : > { %4013 = vmatprep.mubr.f32.mxu1 %v11093_v46  ;;  %6332 = vmatmul.mubr.msk.f32.gmra.mxu0 %vm3462_vm7, %v4129_v2 }
 0x472   : > { %4286 = vmatprep.mubr.f32.mxu0 %v11093_v46  ;;  %4456 = vmatpush1.msra.mxu1 %v6349_v16 }
 0x473   : > { %4457 = vmatprep.subr.mxu1 %v6348_v48 }
 0x474   : > { %6293 = vmatmul.mubr.msk.f32.gmra.mxu1 %vm3462_vm7, %v3866_v51 }
 0x475   : > { %4019 = vmatprep.mubr.f32.mxu1 %v11093_v46  ;;  %6333 = vmatmul.mubr.msk.f32.gmra.mxu0 %vm3462_vm7, %v4131_v0 }
 0x476   : > { %4292 = vmatprep.mubr.f32.mxu0 %v11093_v46  ;;  %4458 = vmatpush1.msra.mxu1 %v6347_v10 }
 0x477   : > { %4459 = vmatprep.subr.mxu1 %v6346_v41 }
 0x478   : > { %6294 = vmatmul.mubr.msk.f32.gmra.mxu1 %vm3462_vm7, %v3868_v12 }
 0x479   : > { %4025 = vmatprep.mubr.f32.mxu1 %v11093_v46  ;;  %6334 = vmatmul.mubr.msk.f32.gmra.mxu0 %vm3462_vm7, %v4133_v62 }
 0x47a   : > { %4298 = vmatprep.mubr.f32.mxu0 %v11093_v46  ;;  %4460 = vmatpush1.msra.mxu1 %v6345_v29 }
 0x47b   : > { %4461 = vmatprep.subr.mxu1 %v6344_v45 }
 0x47c   : > { %6295 = vmatmul.mubr.msk.f32.gmra.mxu1 %vm3462_vm7, %v3870_v43 }
 0x47d   : > { %4031 = vmatprep.mubr.f32.mxu1 %v11093_v46  ;;  %6335 = vmatmul.mubr.msk.f32.gmra.mxu0 %vm3462_vm7, %v4135_v7 }
 0x47e   : > { %4304 = vmatprep.mubr.f32.mxu0 %v11093_v46  ;;  %4462 = vmatpush1.msra.mxu1 %v6343_v35 }
 0x47f   : > { %4463 = vmatprep.subr.mxu1 %v6342_v13 }
 0x480   : > { %6296 = vmatmul.mubr.msk.f32.gmra.mxu1 %vm3462_vm7, %v3872_v49 }
 0x481   : > { %4037 = vmatprep.mubr.f32.mxu1 %v11093_v46  ;;  %6336 = vmatmul.mubr.msk.f32.gmra.mxu0 %vm3462_vm7, %v4137_v42 }
 0x482   : > { %4310 = vmatprep.mubr.f32.mxu0 %v11093_v46  ;;  %4464 = vmatpush1.msra.mxu1 %v6341_v54 }
 0x483   : > { %4465 = vmatprep.subr.mxu1 %v6340_v21 }
 0x484   : > { %6297 = vmatmul.mubr.msk.f32.gmra.mxu1 %vm3462_vm7, %v3874_v20 }
 0x485   : > { %4043 = vmatprep.mubr.f32.mxu1 %v11093_v46  ;;  %6337 = vmatmul.mubr.msk.f32.gmra.mxu0 %vm3462_vm7, %v4139_v30 }
 0x486   : > { %4316 = vmatprep.mubr.f32.mxu0 %v11093_v46  ;;  %4466 = vmatpush1.msra.mxu1 %v6339_v61 }
 0x487   : > { %6676 = vmatprep.subr.mxu1 %v11093_v46 }
 0x488   : > { %6298 = vmatmul.mubr.msk.f32.gmra.mxu1 %vm3462_vm7, %v3876_v1 }
 0x489   : > { %4049 = vmatprep.mubr.f32.mxu1 %v11093_v46  ;;  %6338 = vmatmul.mubr.msk.f32.gmra.mxu0 %vm3462_vm7, %v4138_v26 }
 0x48c   : > { %6299 = vmatmul.mubr.msk.f32.gmra.mxu1 %vm3462_vm7, %v3878_v56 }
 0x48d   : > { %4055 = vmatprep.mubr.f32.mxu1 %v11093_v46 }
 0x490   : > { %6300 = vmatmul.mubr.msk.f32.gmra.mxu1 %vm3462_vm7, %v3877_v31 }
 0x491   : > { %4499 = vmatprep.mubr.f32.mxu1 %v11093_v46 }
 0x494   : > { %6363 = vmatmul.mubr.msk.f32.vlgmr.msra.gmra.mxu1 %vm3462_vm7, %v9432_v15  ;;  %v4695_v15 = vld [vmem:[%s10872_s7 + $0x78] sm:$0xff] }
 0x495   : > { %4505 = vmatprep.mubr.f32.mxu1 %v11093_v46  ;;  %4743 = vmatpush1.msra.mxu0 %v4695_v15 }
 0x496   : > { %4744 = vmatprep.subr.mxu0 %v11093_v46 }
 0x498   : > { %6364 = vmatmul.mubr.msk.f32.gmra.mxu1 %vm3462_vm7, %v9458_v34  ;;  %v4694_v34 = vld [vmem:[%s10872_s7 + $0x70] sm:$0xff] }
 0x499   : > { %4511 = vmatprep.mubr.f32.mxu1 %v11093_v46  ;;  %4745 = vmatpush1.msra.mxu0 %v4694_v34 }
 0x49a   : > { %4746 = vmatprep.subr.mxu0 %v11093_v46 }
 0x49c   : > { %6365 = vmatmul.mubr.msk.f32.gmra.mxu1 %vm3462_vm7, %v9483_v11  ;;  %v4693_v11 = vld [vmem:[%s10872_s7 + $0x68] sm:$0xff] }
 0x49d   : > { %4517 = vmatprep.mubr.f32.mxu1 %v11093_v46  ;;  %4747 = vmatpush1.msra.mxu0 %v4693_v11 }
 0x49e   : > { %4748 = vmatprep.subr.mxu0 %v11093_v46 }
 0x4a0   : > { %6366 = vmatmul.mubr.msk.f32.gmra.mxu1 %vm3462_vm7, %v9508_v25  ;;  %v4692_v25 = vld [vmem:[%s10872_s7 + $0x60] sm:$0xff] }
 0x4a1   : > { %4523 = vmatprep.mubr.f32.mxu1 %v11093_v46  ;;  %4749 = vmatpush1.msra.mxu0 %v4692_v25 }
 0x4a2   : > { %4750 = vmatprep.subr.mxu0 %v11093_v46 }
 0x4a4   : > { %6367 = vmatmul.mubr.msk.f32.gmra.mxu1 %vm3462_vm7, %v9533_v14  ;;  %v4691_v14 = vld [vmem:[%s10872_s7 + $0x58] sm:$0xff] }
 0x4a5   : > { %4529 = vmatprep.mubr.f32.mxu1 %v11093_v46  ;;  %4751 = vmatpush1.msra.mxu0 %v4691_v14 }
 0x4a6   : > { %4752 = vmatprep.subr.mxu0 %v11093_v46 }
 0x4a8   : > { %6368 = vmatmul.mubr.msk.f32.gmra.mxu1 %vm3462_vm7, %v9558_v40  ;;  %v4690_v40 = vld [vmem:[%s10872_s7 + $0x50] sm:$0xff] }
 0x4a9   : > { %4535 = vmatprep.mubr.f32.mxu1 %v11093_v46  ;;  %4753 = vmatpush1.msra.mxu0 %v4690_v40 }
 0x4aa   : > { %4754 = vmatprep.subr.mxu0 %v11093_v46 }
 0x4ac   : > { %6369 = vmatmul.mubr.msk.f32.gmra.mxu1 %vm3462_vm7, %v9583_v17  ;;  %v4689_v17 = vld [vmem:[%s10872_s7 + $0x48] sm:$0xff] }
 0x4ad   : > { %4541 = vmatprep.mubr.f32.mxu1 %v11093_v46  ;;  %4755 = vmatpush1.msra.mxu0 %v4689_v17 }
 0x4ae   : > { %4756 = vmatprep.subr.mxu0 %v11093_v46 }
 0x4b0   : > { %6370 = vmatmul.mubr.msk.f32.gmra.mxu1 %vm3462_vm7, %v9605_v47  ;;  %v4688_v47 = vld [vmem:[%s10872_s7 + $0x40] sm:$0xff] }
 0x4b1   : > { %4547 = vmatprep.mubr.f32.mxu1 %v11093_v46  ;;  %4757 = vmatpush1.msra.mxu0 %v4688_v47 }
 0x4b2   : > { %4758 = vmatprep.subr.mxu0 %v11093_v46 }
 0x4b4   : > { %6371 = vmatmul.mubr.msk.f32.gmra.mxu1 %vm3462_vm7, %v9624_v59  ;;  %v4687_v59 = vld [vmem:[%s10872_s7 + $0x38] sm:$0xff] }
 0x4b5   : > { %4553 = vmatprep.mubr.f32.mxu1 %v11093_v46  ;;  %4759 = vmatpush1.msra.mxu0 %v4687_v59 }
 0x4b6   : > { %4760 = vmatprep.subr.mxu0 %v11093_v46 }
 0x4b8   : > { %6372 = vmatmul.mubr.msk.f32.gmra.mxu1 %vm3462_vm7, %v9644_v38  ;;  %v4686_v38 = vld [vmem:[%s10872_s7 + $0x30] sm:$0xff] }
 0x4b9   : > { %4559 = vmatprep.mubr.f32.mxu1 %v11093_v46  ;;  %4761 = vmatpush1.msra.mxu0 %v4686_v38 }
 0x4ba   : > { %4762 = vmatprep.subr.mxu0 %v11093_v46 }
 0x4bc   : > { %6373 = vmatmul.mubr.msk.f32.gmra.mxu1 %vm3462_vm7, %v9663_v57  ;;  %v4685_v57 = vld [vmem:[%s10872_s7 + $0x28] sm:$0xff] }
 0x4bd   : > { %4565 = vmatprep.mubr.f32.mxu1 %v11093_v46  ;;  %4763 = vmatpush1.msra.mxu0 %v4685_v57 }
 0x4be   : > { %4764 = vmatprep.subr.mxu0 %v11093_v46 }
 0x4bf   : > { %4765 = vmatpush1.msra.mxu0 %v4684_v24 }
 0x4c0   : > { %6374 = vmatmul.mubr.msk.f32.gmra.mxu1 %vm3462_vm7, %v9678_v3  ;;  %4766 = vmatprep.subr.mxu0 %v11093_v46  ;;  %v4683_v3 = vld [vmem:[%s10872_s7 + $0x18] sm:$0xff] }
 0x4c1   : > { %4571 = vmatprep.mubr.f32.mxu1 %v11093_v46  ;;  %4767 = vmatpush1.msra.mxu0 %v4683_v3 }
 0x4c2   : > { %4768 = vmatprep.subr.mxu0 %v11093_v46 }
 0x4c4   : > { %6375 = vmatmul.mubr.msk.f32.gmra.mxu1 %vm3462_vm7, %v9691_v4  ;;  %v4682_v4 = vld [vmem:[%s10872_s7 + $0x10] sm:$0xff] }
 0x4c5   : > { %4577 = vmatprep.mubr.f32.mxu1 %v11093_v46  ;;  %4769 = vmatpush1.msra.mxu0 %v4682_v4 }
 0x4c6   : > { %4770 = vmatprep.subr.mxu0 %v11093_v46 }
 0x4c7   : > { %4771 = vmatpush1.msra.mxu0 %v4681_v63 }
 0x4c8   : > { %6376 = vmatmul.mubr.msk.f32.gmra.mxu1 %vm3462_vm7, %v4399_v50  ;;  %4772 = vmatprep.subr.mxu0 %v11093_v46 }
 0x4c9   : > { %4773 = vmatpush1.msra.mxu0 %v4680_v9 }
 0x4ca   : > { %4798 = vmatprep.subr.mxu0 %v11093_v46 }
 0x4cb   : > { %4799 = vmatpush2.msra.mxu0 %v4699_v44 }
 0x4cc   : > { %4800 = vmatprep.subr.mxu0 %v11093_v46 }
 0x4cd   : > { %4801 = vmatpush2.msra.mxu0 %v4698_v33 }
 0x4ce   : > { %4802 = vmatprep.subr.mxu0 %v11093_v46 }
 0x4cf   : > { %4803 = vmatpush2.msra.mxu0 %v4697_v60 }
 0x4d0   : > { %4804 = vmatprep.subr.mxu0 %v11093_v46 }
 0x4d1   : > { %4805 = vmatpush2.msra.mxu0 %v4696_v27 }
 0x4d2   : > { %6789 = vmatprep.subr.mxu0 %v11093_v46 }
 0x4dd   : > { %v9962_v50 = vpop.f32.mrf.mxu0 }
 0x4df   : > { %v9968_v28 = vpop.f32.mrf.mxu0 }
 0x4e1   : > { %v9974_v39 = vpop.f32.mrf.mxu0 }
 0x4e3   : > { %v9980_v19 = vpop.f32.mrf.mxu0 }
 0x4e4   : > { %v9986_v22 = vpop.f32.mrf.mxu1 }
 0x4e5   : > { %v9988_v37 = vpop.f32.mrf.mxu0 }
 0x4e6   : > { %v9994_v5 = vpop.f32.mrf.mxu1 }
 0x4e7   : > { %v9996_v32 = vpop.f32.mrf.mxu0 }
 0x4e8   : > { %v10002_v16 = vpop.f32.mrf.mxu1 }
 0x4e9   : > { %v10004_v2 = vpop.f32.mrf.mxu0 }
 0x4ea   : > { %v10010_v48 = vpop.f32.mrf.mxu1 }
 0x4eb   : > { %v10012_v51 = vpop.f32.mrf.mxu0 }
 0x4ec   : > { %v10015_v8 = vpop.f32.mrf.mxu1 }
 0x4ed   : > { %v10017_v10 = vpop.f32.mrf.mxu0 }
 0x4ee   : > { %v10019_v0 = vpop.f32.mrf.mxu1 }
 0x4ef   : > { %v10021_v18 = vpop.f32.mrf.mxu0 }
 0x4f0   : > { %v10023_v41 = vpop.f32.mrf.mxu1 }
 0x4f1   : > { %v10025_v12 = vpop.f32.mrf.mxu0 }
 0x4f2   : > { %v10027_v52 = vpop.f32.mrf.mxu1 }
 0x4f3   : > { %v10029_v29 = vpop.f32.mrf.mxu0 }
 0x4f4   : > { %v10031_v62 = vpop.f32.mrf.mxu1 }
 0x4f5   : > { %v10033_v6 = vpop.f32.mrf.mxu0 }
 0x4f6   : > { %v10035_v45 = vpop.f32.mrf.mxu1 }
 0x4f7   : > { %v10037_v43 = vpop.f32.mrf.mxu0 }
 0x4f8   : > { %v10039_v23 = vpop.f32.mrf.mxu1 }
 0x4f9   : > { %v10041_v35 = vpop.f32.mrf.mxu0 }
 0x4fa   : > { %11094 = vst [vmem:[#allocation57_spill] sm:$0xff] %v10041_v35  ;;  %v10043_v7 = vpop.f32.mrf.mxu1 }
 0x4fb   : > { %v10045_v58 = vpop.f32.mrf.mxu0 }
 0x4fc   : > { %11095 = vst [vmem:[#allocation12_spill] sm:$0xff] %v10045_v58  ;;  %v10047_v13 = vpop.f32.mrf.mxu1 }
 0x4fd   : > { %v10049_v49 = vpop.f32.mrf.mxu0 }
 0x4fe   : > { %11096 = vst [vmem:[#allocation11_spill] sm:$0xff] %v10049_v49  ;;  %v10051_v53 = vpop.f32.mrf.mxu1 }
 0x4ff   : > { %v10053_v54 = vpop.f32.mrf.mxu0 }
 0x500   : > { %11097 = vst [vmem:[#allocation58_spill] sm:$0xff] %v10053_v54  ;;  %v10055_v42 = vpop.f32.mrf.mxu1 }
 0x501   : > { %v10057_v26 = vpop.f32.mrf.mxu0 }
 0x502   : > { %11098 = vst [vmem:[#allocation60_spill] sm:$0xff] %v10057_v26  ;;  %v10059_v21 = vpop.f32.mrf.mxu1 }
 0x503   : > { %11099 = vst [vmem:[#allocation14_spill] sm:$0xff] %v10059_v21  ;;  %v10061_v20 = vpop.f32.mrf.mxu0 }
 0x504   : > { %11100 = vst [vmem:[#allocation13_spill] sm:$0xff] %v10061_v20  ;;  %v10063_v36 = vpop.f32.mrf.mxu1 }
 0x505   : > { %11101 = vst [vmem:[#allocation59_spill] sm:$0xff] %v10063_v36  ;;  %v10065_v61 = vpop.f32.mrf.mxu0 }
 0x506   : > { %11102 = vst [vmem:[#allocation62_spill] sm:$0xff] %v10065_v61  ;;  %v10067_v30 = vpop.f32.mrf.mxu1 }
 0x507   : > { %11103 = vst [vmem:[#allocation16_spill] sm:$0xff] %v10067_v30  ;;  %v10069_v1 = vpop.f32.mrf.mxu0 }
 0x508   : > { %11104 = vst [vmem:[#allocation15_spill] sm:$0xff] %v10069_v1  ;;  %v10071_v31 = vpop.f32.mrf.mxu1 }
 0x509   : > { %11105 = vst [vmem:[#allocation61_spill] sm:$0xff] %v10071_v31  ;;  %v10073_v56 = vpop.f32.mrf.mxu0 }
 0x50a   : > { %11106 = vst [vmem:[#allocation64_spill] sm:$0xff] %v10073_v56  ;;  %v10075_v15 = vpop.f32.mrf.mxu1 }
 0x50b   : > { %11107 = vst [vmem:[#allocation18_spill] sm:$0xff] %v10075_v15  ;;  %v10077_v34 = vpop.f32.mrf.mxu0 }
 0x50c   : > { %11108 = vst [vmem:[#allocation17_spill] sm:$0xff] %v10077_v34  ;;  %v10079_v11 = vpop.f32.mrf.mxu1 }
 0x50d   : > { %11109 = vst [vmem:[#allocation63_spill] sm:$0xff] %v10079_v11  ;;  %v10081_v25 = vpop.f32.mrf.mxu0 }
 0x50e   : > { %11110 = vst [vmem:[#allocation20_spill] sm:$0xff] %v10081_v25  ;;  %v10083_v14 = vpop.f32.mrf.mxu1 }
 0x50f   : > { %11111 = vst [vmem:[#allocation19_spill] sm:$0xff] %v10083_v14  ;;  %v10087_v17 = vpop.f32.mrf.mxu0 }
 0x510   : > { %v10085_v40 = vpop.f32.mrf.mxu1  ;;  %11113 = vst [vmem:[#allocation22_spill] sm:$0xff] %v10087_v17 }
 0x511   : > { %11112 = vst [vmem:[#allocation66_spill] sm:$0xff] %v10085_v40  ;;  %v10093_v38 = vpop.f32.mrf.mxu0 }
 0x512   : > { %v10089_v47 = vpop.f32.mrf.mxu1  ;;  %11116 = vst [vmem:[#allocation92_spill] sm:$0xff] %v10093_v38 }
 0x513   : > { %11114 = vst [vmem:[#allocation21_spill] sm:$0xff] %v10089_v47  ;;  %v10099_v3 = vpop.f32.mrf.mxu0 }
 0x514   : > { %v10091_v59 = vpop.f32.mrf.mxu1  ;;  %11119 = vst [vmem:[#allocation23_spill] sm:$0xff] %v10099_v3 }
 0x515   : > { %11115 = vst [vmem:[#allocation65_spill] sm:$0xff] %v10091_v59  ;;  %v4240_v9 = vpop.f32.mrf.mxu0 }
 0x516   : > { %v10095_v57 = vpop.f32.mrf.mxu1 }
 0x517   : > { %11117 = vst [vmem:[#allocation68_spill] sm:$0xff] %v10095_v57  ;;  %v4242_v60 = vpop.f32.mrf.mxu0 }
 0x518   : > { %v10097_v24 = vpop.f32.mrf.mxu1 }
 0x519   : > { %11118 = vst [vmem:[#allocation24_spill] sm:$0xff] %v10097_v24  ;;  %v4246_v46 = vpop.f32.mrf.mxu0 }
 0x51a   : > { %v10101_v4 = vpop.f32.mrf.mxu1 }
 0x51b   : > { %11120 = vst [vmem:[#allocation67_spill] sm:$0xff] %v10101_v4  ;;  %v4248_v59 = vpop.f32.mrf.mxu0 }
 0x51c   : > { %v3979_v63 = vpop.f32.mrf.mxu1 }
 0x51d   : > { %v4252_v57 = vpop.f32.mrf.mxu0 }
 0x51e   : > { %v3981_v44 = vpop.f32.mrf.mxu1 }
 0x51f   : > { %v10111_v4 = vpop.f32.mrf.mxu0 }
 0x520   : > { %v3985_v33 = vpop.f32.mrf.mxu1 }
 0x521   : > { %v10117_v40 = vpop.f32.mrf.mxu0 }
 0x522   : > { %v3987_v27 = vpop.f32.mrf.mxu1 }
 0x523   : > { %v10123_v61 = vpop.f32.mrf.mxu0 }
 0x524   : > { %v3991_v17 = vpop.f32.mrf.mxu1 }
 0x525   : > { %v10129_v15 = vpop.f32.mrf.mxu0 }
 0x526   : > { %v3993_v25 = vpop.f32.mrf.mxu1 }
 0x527   : > { %v10135_v54 = vpop.f32.mrf.mxu0 }
 0x528   : > { %v10103_v34 = vpop.f32.mrf.mxu1 }
 0x529   : > { %v10141_v36 = vpop.f32.mrf.mxu0 }
 0x52a   : > { %v10105_v38 = vpop.f32.mrf.mxu1 }
 0x52c   : > { %v10107_v24 = vpop.f32.mrf.mxu1 }
 0x52e   : > { %v10109_v3 = vpop.f32.mrf.mxu1 }
 0x530   : > { %v10113_v47 = vpop.f32.mrf.mxu1 }
 0x532   : > { %v10115_v56 = vpop.f32.mrf.mxu1 }
 0x534   : > { %v10119_v1 = vpop.f32.mrf.mxu1 }
 0x536   : > { %v10121_v14 = vpop.f32.mrf.mxu1 }
 0x537   : > { %11121 = vst [vmem:[#allocation70_spill] sm:$0xff] %v10121_v14 }
 0x538   : > { %v10125_v11 = vpop.f32.mrf.mxu1 }
 0x539   : > { %11122 = vst [vmem:[#allocation26_spill] sm:$0xff] %v10125_v11  ;;  %v10147_v11 = vpop.f32.mrf.mxu0 }
 0x53a   : > { %v10127_v20 = vpop.f32.mrf.mxu1  ;;  %11130 = vst [vmem:[#allocation104_spill] sm:$0xff] %v10147_v11 }
 0x53b   : > { %11123 = vst [vmem:[#allocation25_spill] sm:$0xff] %v10127_v20 }
 0x53c   : > { %v10131_v26 = vpop.f32.mrf.mxu1 }
 0x53d   : > { %11124 = vst [vmem:[#allocation69_spill] sm:$0xff] %v10131_v26  ;;  %v10153_v26 = vpop.f32.mrf.mxu0 }
 0x53e   : > { %v10133_v31 = vpop.f32.mrf.mxu1  ;;  %11133 = vst [vmem:[#allocation29_spill] sm:$0xff] %v10153_v26 }
 0x53f   : > { %11125 = vst [vmem:[#allocation101_spill] sm:$0xff] %v10133_v31 }
 0x540   : > { %v10137_v30 = vpop.f32.mrf.mxu1 }
 0x541   : > { %11126 = vst [vmem:[#allocation72_spill] sm:$0xff] %v10137_v30  ;;  %v3747_v30 = vadd.f32 %v9962_v50, %v9986_v22  ;;  %v3755_v50 = vadd.f32 %v9980_v19, %v10010_v48  ;;  %v3761_v48 = vadd.f32 %v9996_v32, %v10019_v0 }
 0x542   : > { %v10139_v49 = vpop.f32.mrf.mxu1 }
 0x543   : > { %11127 = vst [vmem:[#allocation28_spill] sm:$0xff] %v10139_v49  ;;  %v4062_v35 = vadd.f32 %v3979_v63, %v3747_v30  ;;  %v11138_v63 = vsub.s32 0, %v8738_v55 }
 0x544   : > { %v10143_v58 = vpop.f32.mrf.mxu1 }
 0x545   : > { %11128 = vst [vmem:[#allocation27_spill] sm:$0xff] %v10143_v58  ;;  %v3749_v58 = vadd.f32 %v9968_v28, %v9994_v5  ;;  %v4323_v22 = vadd.f32 %v4240_v9, %v4062_v35 }
 0x546   : > { %v10145_v21 = vpop.f32.mrf.mxu1 }
 0x547   : > { %11129 = vst [vmem:[#allocation71_spill] sm:$0xff] %v10145_v21  ;;  %v10163_v21 = vpop.f32.mrf.mxu0 }
 0x548   : > { %v10149_v20 = vpop.f32.mrf.mxu1 }
 0x549   : > { %11131 = vst [vmem:[#allocation74_spill] sm:$0xff] %v10149_v20  ;;  %v4063_v20 = vadd.f32 %v3981_v44, %v3749_v58  ;;  %v10176_v5 = vpop.f32.mrf.mxu0  ;;  %v3759_v58 = vadd.f32 %v9988_v37, %v10015_v8  ;;  %v4067_v37 = vadd.f32 %v3993_v25, %v3761_v48 }
 0x54a   : > { %v10151_v14 = vpop.f32.mrf.mxu1 }
 0x54b   : > { %11132 = vst [vmem:[#allocation30_spill] sm:$0xff] %v10151_v14  ;;  %v3753_v14 = vadd.f32 %v9974_v39, %v10002_v16  ;;  %v11139_v39 = vsub.s32 1, %v8738_v55  ;;  %v4324_v44 = vadd.f32 %v4242_v60, %v4063_v20  ;;  %v3767_v60 = vadd.f32 %v10012_v51, %v10027_v52 }
 0x54c   : > { %v10155_v31 = vpop.f32.mrf.mxu1  ;;  %v4328_v25 = vadd.f32 %v10111_v4, %v4067_v37  ;;  %v11141_v37 = vld [vmem:[#allocation104_spill] sm:$0xff] }
 0x54d   : > { %11134 = vst [vmem:[#allocation73_spill] sm:$0xff] %v10155_v31  ;;  %v4612_v31 = vld [vmem:[%s10871_s6] sm:$0x3]  ;;  %v4064_v28 = vadd.f32 %v3985_v33, %v3753_v14  ;;  %v4066_v14 = vadd.f32 %v3991_v17, %v3759_v58  ;;  %v3765_v33 = vadd.f32 %v10004_v2, %v10023_v41  ;;  %v3771_v2 = vadd.f32 %v10017_v10, %v10031_v62 }
 0x54e   : > { %v10159_v49 = vpop.f32.mrf.mxu1  ;;  %v10184_v16 = vrot.slane %v4612_v31, %v11139_v39 }
 0x54f   : > { %11135 = vst [vmem:[#allocation76_spill] sm:$0xff] %v10159_v49  ;;  %v4325_v35 = vadd.f32 %v4246_v46, %v4064_v28  ;;  %v4327_v46 = vadd.f32 %v4252_v57, %v4066_v14  ;;  %v4068_v0 = vadd.f32 %v10103_v34, %v3765_v33  ;;  %v3773_v34 = vadd.f32 %v10021_v18, %v10035_v45  ;;  %v11140_v33 = vld [vmem:[#allocation57_spill] sm:$0xff] }
 0x550   : > { %v10165_v11 = vpop.f32.mrf.mxu1  ;;  %v4070_v10 = vadd.f32 %v10107_v24, %v3771_v2  ;;  %v3779_v24 = vadd.f32 %v10029_v29, %v10043_v7 }
 0x551   : > { %11136 = vst [vmem:[#allocation32_spill] sm:$0xff] %v10165_v11  ;;  %v10180_v11 = vrot.slane %v4612_v31, %v11138_v63  ;;  %v10192_v63 = vpop.f32.mrf.mxu0  ;;  %v4071_v18 = vadd.f32 %v10109_v3, %v3773_v34 }
 0x552   : > { %v10172_v26 = vpop.f32.mrf.mxu1  ;;  %v4331_v58 = vadd.f32 %v10129_v15, %v4070_v10  ;;  %v4073_v29 = vadd.f32 %v10115_v56, %v3779_v24 }
 0x553   : > { %11137 = vst [vmem:[#allocation31_spill] sm:$0xff] %v10172_v26  ;;  %v4065_v26 = vadd.f32 %v3987_v27, %v3755_v50  ;;  %v10201_v41 = vpop.f32.mrf.mxu0  ;;  %v4329_v27 = vadd.f32 %v10117_v40, %v4068_v0  ;;  %v3777_v50 = vadd.f32 %v10025_v12, %v10039_v23  ;;  %v4332_v48 = vadd.f32 %v10135_v54, %v4071_v18  ;;  %v11151_v18 = vld [vmem:[#allocation58_spill] sm:$0xff] }
 0x554   : > { %v4501_v30 = vpop.f32.mrf.mxu1 }
 0x555   : > { %v4584_v49 = vadd.f32 %v4501_v30, %v4323_v22  ;;  %v4326_v39 = vadd.f32 %v4248_v59, %v4065_v26  ;;  %v4069_v59 = vadd.f32 %v10105_v38, %v3767_v60  ;;  %v10213_v22 = vpop.f32.mrf.mxu0  ;;  %v4072_v12 = vadd.f32 %v10113_v47, %v3777_v50  ;;  %v11144_v60 = vld [vmem:[#allocation12_spill] sm:$0xff] }
 0x556   : > { %v4503_v19 = vpop.f32.mrf.mxu1  ;;  %v3785_v47 = vadd.f32 %v10037_v43, %v10051_v53  ;;  %v4334_v43 = vadd.f32 %v11141_v37, %v4073_v29  ;;  %v11142_v53 = vld [vmem:[#allocation70_spill] sm:$0xff] }
 0x557   : > { %v4585_v9 = vadd.f32 %v4503_v19, %v4324_v44  ;;  %v4624_v55 = vadd.f32 %v10180_v11, %v4584_v49  ;;  %v4330_v28 = vadd.f32 %v10123_v61, %v4069_v59  ;;  %v3783_v44 = vadd.f32 %v10033_v6, %v10047_v13  ;;  %v10225_v19 = vpop.f32.mrf.mxu0  ;;  %v11148_v59 = vld [vmem:[#allocation11_spill] sm:$0xff] }
 0x558   : > { %v4507_v31 = vpop.f32.mrf.mxu1  ;;  %v4333_v14 = vadd.f32 %v10141_v36, %v4072_v12 }
 0x559   : > { %v4625_v8 = vadd.f32 %v10184_v16, %v4585_v9  ;;  %v4586_v20 = vadd.f32 %v4507_v31, %v4325_v35  ;;  %v4074_v6 = vadd.f32 %v10119_v1, %v3783_v44  ;;  %v10237_v54 = vpop.f32.mrf.mxu0  ;;  %v11154_v44 = vld [vmem:[#allocation60_spill] sm:$0xff] }
 0x55a   : > { %v4509_v32 = vpop.f32.mrf.mxu1 }
 0x55b   : > { %7134 = vtanh.f32 %v4625_v8  ;;  %v4587_v17 = vadd.f32 %v4509_v32, %v4326_v39  ;;  %v4626_v49 = vadd.f32 %v10180_v11, %v4586_v20  ;;  %v4075_v8 = vadd.f32 %v11142_v53, %v3785_v47  ;;  %v11143_v20 = vld [vmem:[#allocation14_spill] sm:$0xff]  ;;  %v11155_v47 = vld [vmem:[#allocation101_spill] sm:$0xff] }
 0x55c   : > { %7136 = vtanh.f32 %v4624_v55  ;;  %v4513_v26 = vpop.f32.mrf.mxu1  ;;  %v3789_v55 = vadd.f32 %v11140_v33, %v10055_v42  ;;  %v3791_v32 = vadd.f32 %v11144_v60, %v11143_v20 }
 0x55d   : > { %v4627_v51 = vadd.f32 %v10184_v16, %v4587_v17  ;;  %v4588_v52 = vadd.f32 %v4513_v26, %v4327_v46  ;;  %v11145_v46 = vld [vmem:[#allocation29_spill] sm:$0xff]  ;;  %v11146_v17 = vld [vmem:[#allocation26_spill] sm:$0xff]  ;;  %v4336_v10 = vadd.f32 %v10163_v21, %v4075_v8 }
 0x55e   : > { %v4515_v57 = vpop.f32.mrf.mxu1  ;;  %v4335_v0 = vadd.f32 %v11145_v46, %v4074_v6  ;;  %v4076_v2 = vadd.f32 %v11146_v17, %v3789_v55  ;;  %v11153_v21 = vld [vmem:[#allocation61_spill] sm:$0xff]  ;;  %v11156_v6 = vld [vmem:[#allocation18_spill] sm:$0xff]  ;;  %v11163_v17 = vld [vmem:[#allocation15_spill] sm:$0xff] }
 0x55f   : > { %7138 = vtanh.f32 %v4627_v51  ;;  %v4589_v62 = vadd.f32 %v4515_v57, %v4328_v25  ;;  %v4628_v38 = vadd.f32 %v10180_v11, %v4588_v52  ;;  %v11147_v25 = vld [vmem:[#allocation59_spill] sm:$0xff]  ;;  %v10250_v52 = vpop.f32.mrf.mxu0 }
 0x560   : > { %7140 = vtanh.f32 %v4626_v49  ;;  %v4519_v4 = vpop.f32.mrf.mxu1  ;;  %v3795_v51 = vadd.f32 %v11148_v59, %v11147_v25  ;;  %v4337_v24 = vadd.f32 %v10176_v5, %v4076_v2  ;;  %v11164_v25 = vld [vmem:[#allocation27_spill] sm:$0xff] }
 0x561   : > { %v4629_v45 = vadd.f32 %v10184_v16, %v4589_v62  ;;  %v4590_v40 = vadd.f32 %v4519_v4, %v4329_v27  ;;  %v11149_v62 = vld [vmem:[#allocation25_spill] sm:$0xff] }
 0x562   : > { %v4521_v30 = vpop.f32.mrf.mxu1  ;;  %v4077_v50 = vadd.f32 %v11149_v62, %v3791_v32  ;;  %v11161_v32 = vld [vmem:[#allocation28_spill] sm:$0xff] }
 0x563   : > { %7142 = vtanh.f32 %v4629_v45  ;;  %v4591_v23 = vadd.f32 %v4521_v30, %v4330_v28  ;;  %v4630_v61 = vadd.f32 %v10180_v11, %v4590_v40  ;;  %v11150_v28 = vld [vmem:[#allocation16_spill] sm:$0xff]  ;;  %v11152_v30 = vld [vmem:[#allocation69_spill] sm:$0xff] }
 0x564   : > { %7144 = vtanh.f32 %v4628_v38  ;;  %v4525_v3 = vpop.f32.mrf.mxu1  ;;  %v3797_v45 = vadd.f32 %v11151_v18, %v11150_v28  ;;  %v11167_v28 = vld [vmem:[#allocation71_spill] sm:$0xff] }
 0x565   : > { %v4631_v7 = vadd.f32 %v10184_v16, %v4591_v23  ;;  %v4592_v15 = vadd.f32 %v4525_v3, %v4331_v58  ;;  %v4078_v58 = vadd.f32 %v11152_v30, %v3795_v51  ;;  %v4302_v3 = vpop.f32.mrf.mxu0 }
 0x566   : > { %v4527_v35 = vpop.f32.mrf.mxu1 }
 0x567   : > { %7146 = vtanh.f32 %v4631_v7  ;;  %v4593_v13 = vadd.f32 %v4527_v35, %v4332_v48  ;;  %v4632_v56 = vadd.f32 %v10180_v11, %v4592_v15  ;;  %v4338_v15 = vadd.f32 %v10192_v63, %v4077_v50  ;;  %v11159_v63 = vld [vmem:[#allocation63_spill] sm:$0xff]  ;;  %v4306_v8 = vpop.f32.mrf.mxu0 }
 0x568   : > { %v7135_v9 = vpop.eup %7134  ;;  %7148 = vtanh.f32 %v4630_v61  ;;  %v4531_v31 = vpop.f32.mrf.mxu1  ;;  %v3801_v61 = vadd.f32 %v11154_v44, %v11153_v21  ;;  %v4079_v35 = vadd.f32 %v11155_v47, %v3797_v45  ;;  %v4339_v55 = vadd.f32 %v10201_v41, %v4078_v58 }
 0x569   : > { %v7137_v39 = vpop.eup %7136  ;;  %v4633_v36 = vadd.f32 %v10184_v16, %v4593_v13  ;;  %v4594_v1 = vadd.f32 %v4531_v31, %v4333_v14  ;;  %6377 = vmatprep.mubr.msk.f32.mxu0 %vm667_vm1, %v7135_v9  ;;  %v11157_v13 = vld [vmem:[#allocation13_spill] sm:$0xff] }
 0x56a   : > { %v4533_v42 = vpop.f32.mrf.mxu1  ;;  %4807 = vmatmul.mubr.f32.vlgmr.msra.gmra.mxu0 %v7137_v39  ;;  %v3803_v9 = vadd.f32 %v11157_v13, %v11156_v6  ;;  %v4340_v60 = vadd.f32 %v10213_v22, %v4079_v35  ;;  %v11165_v22 = vld [vmem:[#allocation66_spill] sm:$0xff] }
 0x56b   : > { %7150 = vtanh.f32 %v4633_v36  ;;  %v4595_v49 = vadd.f32 %v4533_v42, %v4334_v43  ;;  %v4634_v34 = vadd.f32 %v10180_v11, %v4594_v1  ;;  %v11160_v43 = vld [vmem:[#allocation62_spill] sm:$0xff] }
 0x56c   : > { %v7139_v26 = vpop.eup %7138  ;;  %7152 = vtanh.f32 %v4632_v56  ;;  %v4537_v57 = vpop.f32.mrf.mxu1  ;;  %v11158_v56 = vld [vmem:[#allocation72_spill] sm:$0xff]  ;;  %v3807_v53 = vadd.f32 %v11160_v43, %v11159_v63  ;;  %v4081_v42 = vadd.f32 %v11161_v32, %v3803_v9 }
 0x56d   : > { %v7141_v27 = vpop.eup %7140  ;;  %v4635_v38 = vadd.f32 %v10184_v16, %v4595_v49  ;;  %v4596_v4 = vadd.f32 %v4537_v57, %v4335_v0  ;;  %6378 = vmatprep.mubr.msk.f32.mxu0 %vm667_vm1, %v7139_v26  ;;  %v4080_v31 = vadd.f32 %v11158_v56, %v3801_v61  ;;  %v11162_v0 = vld [vmem:[#allocation19_spill] sm:$0xff]  ;;  %v11166_v57 = vld [vmem:[#allocation64_spill] sm:$0xff] }
 0x56e   : > { %v4539_v40 = vpop.f32.mrf.mxu1  ;;  %4812 = vmatmul.mubr.f32.gmra.mxu0 %v7141_v27  ;;  %v3809_v2 = vadd.f32 %v11163_v17, %v11162_v0  ;;  %v4082_v59 = vadd.f32 %v11164_v25, %v3807_v53  ;;  %v3813_v27 = vadd.f32 %v11166_v57, %v11165_v22  ;;  %v11174_v9 = vld [vmem:[#allocation68_spill] sm:$0xff]  ;;  %v11180_v17 = vld [vmem:[#allocation67_spill] sm:$0xff] }
 0x56f   : > { %7154 = vtanh.f32 %v4635_v38  ;;  %v4597_v12 = vadd.f32 %v4539_v40, %v4336_v10  ;;  %v4636_v48 = vadd.f32 %v10180_v11, %v4596_v4  ;;  %v4341_v26 = vadd.f32 %v10225_v19, %v4080_v31  ;;  %v4308_v10 = vpop.f32.mrf.mxu0  ;;  %v11168_v40 = vld [vmem:[#allocation21_spill] sm:$0xff]  ;;  %v11177_v53 = vld [vmem:[#allocation24_spill] sm:$0xff] }
 0x570   : > { %v7143_v23 = vpop.eup %7142  ;;  %7156 = vtanh.f32 %v4634_v34  ;;  %v4543_v29 = vpop.f32.mrf.mxu1  ;;  %v4342_v4 = vadd.f32 %v10237_v54, %v4081_v42  ;;  %v4083_v18 = vadd.f32 %v11167_v28, %v3809_v2  ;;  %v11171_v54 = vld [vmem:[#allocation65_spill] sm:$0xff]  ;;  %v11181_v2 = vld [vmem:[#allocation23_spill] sm:$0xff] }
 0x571   : > { %v7145_v7 = vpop.eup %7144  ;;  %v4637_v5 = vadd.f32 %v10184_v16, %v4597_v12  ;;  %v4598_v14 = vadd.f32 %v4543_v29, %v4337_v24  ;;  %6379 = vmatprep.mubr.msk.f32.mxu0 %vm667_vm1, %v7143_v23  ;;  %v11169_v24 = vld [vmem:[#allocation17_spill] sm:$0xff]  ;;  %v4343_v12 = vadd.f32 %v10250_v52, %v4082_v59  ;;  %v11170_v23 = vld [vmem:[#allocation74_spill] sm:$0xff]  ;;  %v11182_v59 = vld [vmem:[#allocation32_spill] sm:$0xff] }
 0x572   : > { %v4545_v33 = vpop.f32.mrf.mxu1  ;;  %4817 = vmatmul.mubr.f32.gmra.mxu0 %v7145_v7  ;;  %v3815_v30 = vadd.f32 %v11169_v24, %v11168_v40  ;;  %v4084_v21 = vadd.f32 %v11170_v23, %v3813_v27  ;;  %v4312_v7 = vpop.f32.mrf.mxu0 }
 0x573   : > { %7158 = vtanh.f32 %v4637_v5  ;;  %v4599_v39 = vadd.f32 %v4545_v33, %v4338_v15  ;;  %v4638_v36 = vadd.f32 %v10180_v11, %v4598_v14  ;;  %v4344_v5 = vadd.f32 %v4302_v3, %v4083_v18  ;;  %v11173_v14 = vld [vmem:[#allocation30_spill] sm:$0xff]  ;;  %v11178_v3 = vld [vmem:[#allocation92_spill] sm:$0xff] }
 0x574   : > { %v7147_v37 = vpop.eup %7146  ;;  %7160 = vtanh.f32 %v4636_v48  ;;  %v4549_v1 = vpop.f32.mrf.mxu1  ;;  %v11172_v48 = vld [vmem:[#allocation20_spill] sm:$0xff]  ;;  %v4085_v6 = vadd.f32 %v11173_v14, %v3815_v30  ;;  %v11175_v33 = vld [vmem:[#allocation22_spill] sm:$0xff]  ;;  %v4345_v31 = vadd.f32 %v4306_v8, %v4084_v21 }
 0x575   : > { %v7149_v20 = vpop.eup %7148  ;;  %v4639_v41 = vadd.f32 %v10184_v16, %v4599_v39  ;;  %v4600_v46 = vadd.f32 %v4549_v1, %v4339_v55  ;;  %6380 = vmatprep.mubr.msk.f32.mxu0 %vm667_vm1, %v7147_v37  ;;  %v3819_v29 = vadd.f32 %v11172_v48, %v11171_v54  ;;  %v3821_v55 = vadd.f32 %v11175_v33, %v11174_v9  ;;  %v11176_v39 = vld [vmem:[#allocation73_spill] sm:$0xff]  ;;  %v4314_v1 = vpop.f32.mrf.mxu0 }
 0x576   : > { %v4551_v49 = vpop.f32.mrf.mxu1  ;;  %4822 = vmatmul.mubr.f32.gmra.mxu0 %v7149_v20  ;;  %v4346_v42 = vadd.f32 %v4308_v10, %v4085_v6  ;;  %v11184_v9 = vmov 0.0  }
 0x577   : > { %7162 = vtanh.f32 %v4639_v41  ;;  %v4601_v51 = vadd.f32 %v4551_v49, %v4340_v60  ;;  %v4640_v62 = vadd.f32 %v10180_v11, %v4600_v46  ;;  %v4086_v37 = vadd.f32 %v11176_v39, %v3819_v29  ;;  %v11179_v41 = vld [vmem:[#allocation76_spill] sm:$0xff]  ;;  %v4318_v57 = vpop.f32.mrf.mxu0  ;;  %6704 = vmatprep.mubr.msk.f32.mxu1 %vm7297_vm8, %v11184_v9 }
 0x578   : > { %v7151_v34 = vpop.eup %7150  ;;  %7164 = vtanh.f32 %v4638_v36  ;;  %v4555_v50 = vpop.f32.mrf.mxu1  ;;  %v3825_v36 = vadd.f32 %v11178_v3, %v11177_v53  ;;  %v4087_v46 = vadd.f32 %v11179_v41, %v3821_v55  ;;  %v3827_v49 = vadd.f32 %v11181_v2, %v11180_v17 }
 0x579   : > { %v7153_v38 = vpop.eup %7152  ;;  %v4641_v19 = vadd.f32 %v10184_v16, %v4601_v51  ;;  %v4602_v45 = vadd.f32 %v4555_v50, %v4341_v26  ;;  %6381 = vmatprep.mubr.msk.f32.mxu0 %vm667_vm1, %v7151_v34  ;;  %v4347_v25 = vadd.f32 %v4312_v7, %v4086_v37  ;;  %v4320_v30 = vpop.f32.mrf.mxu0 }
 0x57a   : > { %v4557_v58 = vpop.f32.mrf.mxu1  ;;  %4827 = vmatmul.mubr.f32.gmra.mxu0 %v7153_v38  ;;  %v4088_v51 = vadd.f32 %v11182_v59, %v3825_v36  ;;  %v4348_v50 = vadd.f32 %v4314_v1, %v4087_v46  ;;  %v11183_v38 = vld [vmem:[#allocation31_spill] sm:$0xff] }
 0x57b   : > { %7166 = vtanh.f32 %v4641_v19  ;;  %v4603_v44 = vadd.f32 %v4557_v58, %v4342_v4  ;;  %v4642_v15 = vadd.f32 %v10180_v11, %v4602_v45  ;;  %v4089_v4 = vadd.f32 %v11183_v38, %v3827_v49  ;;  %v4879_v38 = vld [vmem:[%s10873_s8 + $0x10] sm:$0xff] }
 0x57c   : > { %v7155_v61 = vpop.eup %7154  ;;  %7168 = vtanh.f32 %v4640_v62  ;;  %v4561_v47 = vpop.f32.mrf.mxu1  ;;  %v4349_v45 = vadd.f32 %v4318_v57, %v4088_v51  ;;  %v6406_v57 = vld [vmem:[%s10874_s9 + $0x98] sm:$0xff] }
 0x57d   : > { %v7157_v35 = vpop.eup %7156  ;;  %v4643_v13 = vadd.f32 %v10184_v16, %v4603_v44  ;;  %v4604_v52 = vadd.f32 %v4561_v47, %v4343_v12  ;;  %6382 = vmatprep.mubr.msk.f32.mxu0 %vm667_vm1, %v7155_v61  ;;  %v4350_v21 = vadd.f32 %v4320_v30, %v4089_v4  ;;  %v6402_v4 = vld [vmem:[%s10874_s9 + $0x78] sm:$0xff]  ;;  %v6423_v30 = vld [vmem:[%s10874_s9 + $0xd0] sm:$0xff] }
 0x57e   : > { %v4563_v56 = vpop.f32.mrf.mxu1  ;;  %4832 = vmatmul.mubr.f32.gmra.mxu0 %v7157_v35 }
 0x57f   : > { %7170 = vtanh.f32 %v4643_v13  ;;  %v4605_v63 = vadd.f32 %v4563_v56, %v4344_v5  ;;  %v4644_v20 = vadd.f32 %v10180_v11, %v4604_v52 }
 0x580   : > { %v7159_v43 = vpop.eup %7158  ;;  %7172 = vtanh.f32 %v4642_v15  ;;  %v4567_v60 = vpop.f32.mrf.mxu1 }
 0x581   : > { %v7161_v32 = vpop.eup %7160  ;;  %v4645_v0 = vadd.f32 %v10184_v16, %v4605_v63  ;;  %v4606_v8 = vadd.f32 %v4567_v60, %v4345_v31  ;;  %6383 = vmatprep.mubr.msk.f32.mxu0 %vm667_vm1, %v7159_v43 }
 0x582   : > { %v4569_v26 = vpop.f32.mrf.mxu1  ;;  %4837 = vmatmul.mubr.f32.gmra.mxu0 %v7161_v32 }
 0x583   : > { %7174 = vtanh.f32 %v4645_v0  ;;  %v4607_v34 = vadd.f32 %v4569_v26, %v4346_v42  ;;  %v4646_v27 = vadd.f32 %v10180_v11, %v4606_v8 }
 0x584   : > { %v7163_v22 = vpop.eup %7162  ;;  %7176 = vtanh.f32 %v4644_v20  ;;  %v4573_v10 = vpop.f32.mrf.mxu1 }
 0x585   : > { %v7165_v62 = vpop.eup %7164  ;;  %v4647_v28 = vadd.f32 %v10184_v16, %v4607_v34  ;;  %v4608_v18 = vadd.f32 %v4573_v10, %v4347_v25  ;;  %6384 = vmatprep.mubr.msk.f32.mxu0 %vm667_vm1, %v7163_v22  ;;  %v4877_v22 = vld [vmem:[%s10873_s8] sm:$0xff]  ;;  %v4878_v10 = vld [vmem:[%s10873_s8 + $0x8] sm:$0xff] }
 0x586   : > { %v4575_v19 = vpop.f32.mrf.mxu1  ;;  %4842 = vmatmul.mubr.f32.gmra.mxu0 %v7165_v62  ;;  %v6404_v62 = vld [vmem:[%s10874_s9 + $0x88] sm:$0xff] }
 0x587   : > { %7178 = vtanh.f32 %v4647_v28  ;;  %v4609_v40 = vadd.f32 %v4575_v19, %v4348_v50  ;;  %v4648_v58 = vadd.f32 %v10180_v11, %v4608_v18  ;;  %v6403_v50 = vld [vmem:[%s10874_s9 + $0x80] sm:$0xff]  ;;  %v6401_v28 = vld [vmem:[%s10874_s9 + $0x70] sm:$0xff]  ;;  %v4880_v18 = vld [vmem:[%s10873_s8 + $0x18] sm:$0xff] }
 0x588   : > { %v7167_v24 = vpop.eup %7166  ;;  %7180 = vtanh.f32 %v4646_v27  ;;  %v4579_v12 = vpop.f32.mrf.mxu1  ;;  %v6405_v27 = vld [vmem:[%s10874_s9 + $0x90] sm:$0xff]  ;;  %v4881_v19 = vld [vmem:[%s10873_s8 + $0x20] sm:$0xff] }
 0x589   : > { %v7169_v23 = vpop.eup %7168  ;;  %v4649_v44 = vadd.f32 %v10184_v16, %v4609_v40  ;;  %v4610_v61 = vadd.f32 %v4579_v12, %v4349_v45  ;;  %6385 = vmatprep.mubr.msk.f32.mxu0 %vm667_vm1, %v7167_v24  ;;  %v6426_v45 = vld [vmem:[%s10874_s9 + $0xe8] sm:$0xff]  ;;  %v6425_v40 = vld [vmem:[%s10874_s9 + $0xe0] sm:$0xff]  ;;  %v6424_v24 = vld [vmem:[%s10874_s9 + $0xd8] sm:$0xff] }
 0x58a   : > { %v4581_v54 = vpop.f32.mrf.mxu1  ;;  %4847 = vmatmul.mubr.f32.gmra.mxu0 %v7169_v23  ;;  %v6421_v12 = vld [vmem:[%s10874_s9 + $0xc0] sm:$0xff]  ;;  %v6400_v23 = vld [vmem:[%s10874_s9 + $0x68] sm:$0xff] }
 0x58b   : > { %7182 = vtanh.f32 %v4649_v44  ;;  %v4611_v48 = vadd.f32 %v4581_v54, %v4350_v21  ;;  %v4650_v7 = vadd.f32 %v10180_v11, %v4610_v61  ;;  %6790 = vmatpush3.msra.mxu0 %v6426_v45  ;;  %v6420_v21 = vld [vmem:[%s10874_s9 + $0xb8] sm:$0xff]  ;;  %v6399_v44 = vld [vmem:[%s10874_s9 + $0x60] sm:$0xff]  ;;  %v6419_v61 = vld [vmem:[%s10874_s9 + $0xb0] sm:$0xff] }
 0x58c   : > { %v7171_v29 = vpop.eup %7170  ;;  %7184 = vtanh.f32 %v4648_v58  ;;  %6791 = vmatprep.subr.mxu0 %v11184_v9  ;;  %v6422_v58 = vld [vmem:[%s10874_s9 + $0xc8] sm:$0xff]  ;;  %v6398_v54 = vld [vmem:[%s10874_s9 + $0x58] sm:$0xff] }
 0x58d   : > { %v7173_v15 = vpop.eup %7172  ;;  %v4651_v47 = vadd.f32 %v10184_v16, %v4611_v48  ;;  %6386 = vmatprep.mubr.msk.f32.mxu0 %vm667_vm1, %v7171_v29  ;;  %6792 = vmatpush3.msra.mxu0 %v6425_v40  ;;  %v6418_v48 = vld [vmem:[%s10874_s9 + $0xa8] sm:$0xff]  ;;  %v6397_v29 = vld [vmem:[%s10874_s9 + $0x50] sm:$0xff] }
 0x58e   : > { %4852 = vmatmul.mubr.f32.gmra.mxu0 %v7173_v15  ;;  %6793 = vmatprep.subr.mxu0 %v11184_v9  ;;  %v6435_v45 = vld [vmem:[%s10874_s9 + $0x108] sm:$0xff] }
 0x58f   : > { %7186 = vtanh.f32 %v4651_v47  ;;  %6794 = vmatpush3.msra.mxu0 %v6424_v24  ;;  %v6434_v24 = vld [vmem:[%s10874_s9 + $0x100] sm:$0xff] }
 0x590   : > { %v7175_v35 = vpop.eup %7174  ;;  %7188 = vtanh.f32 %v4650_v7  ;;  %6795 = vmatprep.subr.mxu0 %v11184_v9  ;;  %v6417_v7 = vld [vmem:[%s10874_s9 + $0xa0] sm:$0xff] }
 0x591   : > { %v7177_v5 = vpop.eup %7176  ;;  %6387 = vmatprep.mubr.msk.f32.mxu0 %vm667_vm1, %v7175_v35  ;;  %6796 = vmatpush3.msra.mxu0 %v6423_v30  ;;  %v6450_v30 = vld [vmem:[%s10874_s9 + $0x158] sm:$0xff] }
 0x592   : > { %4857 = vmatmul.mubr.f32.gmra.mxu0 %v7177_v5  ;;  %6797 = vmatprep.subr.mxu0 %v11184_v9 }
 0x593   : > { %6798 = vmatpush3.msra.mxu0 %v6422_v58  ;;  %v6433_v58 = vld [vmem:[%s10874_s9 + $0xf8] sm:$0xff] }
 0x594   : > { %v7179_v14 = vpop.eup %7178  ;;  %6799 = vmatprep.subr.mxu0 %v11184_v9 }
 0x595   : > { %v7181_v6 = vpop.eup %7180  ;;  %6388 = vmatprep.mubr.msk.f32.mxu0 %vm667_vm1, %v7179_v14  ;;  %6800 = vmatpush3.msra.mxu0 %v6421_v12  ;;  %v6449_v12 = vld [vmem:[%s10874_s9 + $0x150] sm:$0xff] }
 0x596   : > { %4862 = vmatmul.mubr.f32.gmra.mxu0 %v7181_v6  ;;  %6801 = vmatprep.subr.mxu0 %v11184_v9 }
 0x597   : > { %6802 = vmatpush3.msra.mxu0 %v6420_v21  ;;  %v6432_v21 = vld [vmem:[%s10874_s9 + $0xf0] sm:$0xff] }
 0x598   : > { %v7183_v13 = vpop.eup %7182  ;;  %6803 = vmatprep.subr.mxu0 %v11184_v9 }
 0x599   : > { %v7185_v11 = vpop.eup %7184  ;;  %6389 = vmatprep.mubr.msk.f32.mxu0 %vm667_vm1, %v7183_v13  ;;  %6804 = vmatpush3.msra.mxu0 %v6419_v61  ;;  %v6448_v61 = vld [vmem:[%s10874_s9 + $0x148] sm:$0xff] }
 0x59a   : > { %4867 = vmatmul.mubr.f32.gmra.mxu0 %v7185_v11  ;;  %6805 = vmatprep.subr.mxu0 %v11184_v9 }
 0x59b   : > { %6806 = vmatpush3.msra.mxu0 %v6418_v48 }
 0x59c   : > { %v7187_v16 = vpop.eup %7186  ;;  %6807 = vmatprep.subr.mxu0 %v11184_v9 }
 0x59d   : > { %v7189_v52 = vpop.eup %7188  ;;  %6390 = vmatprep.mubr.msk.f32.mxu0 %vm667_vm1, %v7187_v16  ;;  %6808 = vmatpush3.msra.mxu0 %v6417_v7  ;;  %v5000_v16 = vld [vmem:[%s10874_s9 + $0x48] sm:$0xff]  ;;  %v6447_v7 = vld [vmem:[%s10874_s9 + $0x140] sm:$0xff] }
 0x59e   : > { %4872 = vmatmul.mubr.f32.gmra.mxu0 %v7189_v52  ;;  %6859 = vmatprep.subr.mxu0 %v11184_v9 }
 0x59f   : > { %6809 = vmatprep.mubr.msk.f32.mxu0 %vm7297_vm8, %v11184_v9 }
 0x62a   : > { %v4808_v33 = vpop.f32.mrf.mxu0 }
 0x62c   : > { %v4810_v55 = vpop.f32.mrf.mxu0 }
 0x62d   : > { %v6456_v55 = vld [vmem:[%s10874_s9 + $0x188] sm:$0xff] }
 0x62e   : > { %v4813_v56 = vpop.f32.mrf.mxu0 }
 0x630   : > { %v4815_v31 = vpop.f32.mrf.mxu0 }
 0x631   : > { %v4999_v31 = vld [vmem:[%s10874_s9 + $0x40] sm:$0xff] }
 0x632   : > { %v4818_v39 = vpop.f32.mrf.mxu0 }
 0x634   : > { %v4820_v37 = vpop.f32.mrf.mxu0 }
 0x636   : > { %v4823_v63 = vpop.f32.mrf.mxu0 }
 0x638   : > { %v4825_v43 = vpop.f32.mrf.mxu0 }
 0x63a   : > { %v4828_v53 = vpop.f32.mrf.mxu0 }
 0x63c   : > { %v4830_v3 = vpop.f32.mrf.mxu0 }
 0x63e   : > { %v4833_v36 = vpop.f32.mrf.mxu0 }
 0x640   : > { %v4835_v1 = vpop.f32.mrf.mxu0 }
 0x641   : > { %v6455_v1 = vld [vmem:[%s10874_s9 + $0x180] sm:$0xff] }
 0x642   : > { %v4838_v20 = vpop.f32.mrf.mxu0 }
 0x644   : > { %v4840_v60 = vpop.f32.mrf.mxu0 }
 0x646   : > { %v4843_v32 = vpop.f32.mrf.mxu0 }
 0x648   : > { %v4845_v42 = vpop.f32.mrf.mxu0 }
 0x64a   : > { %v4848_v41 = vpop.f32.mrf.mxu0 }
 0x64c   : > { %v4850_v46 = vpop.f32.mrf.mxu0 }
 0x64e   : > { %v4853_v0 = vpop.f32.mrf.mxu0 }
 0x650   : > { %v4855_v8 = vpop.f32.mrf.mxu0 }
 0x652   : > { %v4858_v17 = vpop.f32.mrf.mxu0 }
 0x654   : > { %v4860_v2 = vpop.f32.mrf.mxu0 }
 0x656   : > { %v4863_v49 = vpop.f32.mrf.mxu0 }
 0x658   : > { %v4865_v26 = vpop.f32.mrf.mxu0 }
 0x659   : > { %v6454_v26 = vld [vmem:[%s10874_s9 + $0x178] sm:$0xff] }
 0x65a   : > { %v4868_v25 = vpop.f32.mrf.mxu0 }
 0x65c   : > { %v4870_v59 = vpop.f32.mrf.mxu0 }
 0x65d   : > { %v4992_v59 = vld [vmem:[%s10874_s9 + $0x8] sm:$0xff] }
 0x65e   : > { %v4873_v51 = vpop.f32.mrf.mxu0 }
 0x65f   : > { %6677 = vmatpush3.msk.msra.mxu1 %vm2235_vm4, %v4873_v51 }
 0x660   : > { %v4875_v34 = vpop.f32.mrf.mxu0  ;;  %6678 = vmatprep.subr.mxu1 %v11184_v9 }
 0x661   : > { %6679 = vmatpush3.msra.mxu1 %v4868_v25  ;;  %v4993_v25 = vld [vmem:[%s10874_s9 + $0x10] sm:$0xff]  ;;  %v4991_v34 = vld [vmem:[%s10874_s9] sm:$0xff] }
 0x662   : > { %6680 = vmatprep.subr.mxu1 %v11184_v9 }
 0x663   : > { %6681 = vmatpush3.msra.mxu1 %v4863_v49 }
 0x664   : > { %6682 = vmatprep.subr.mxu1 %v11184_v9 }
 0x665   : > { %6683 = vmatpush3.msra.mxu1 %v4858_v17  ;;  %v4994_v17 = vld [vmem:[%s10874_s9 + $0x18] sm:$0xff] }
 0x666   : > { %6684 = vmatprep.subr.mxu1 %v11184_v9 }
 0x667   : > { %6685 = vmatpush3.msra.mxu1 %v4853_v0  ;;  %v4995_v0 = vld [vmem:[%s10874_s9 + $0x20] sm:$0xff] }
 0x668   : > { %6686 = vmatprep.subr.mxu1 %v11184_v9 }
 0x669   : > { %6687 = vmatpush3.msra.mxu1 %v4848_v41 }
 0x66a   : > { %6688 = vmatprep.subr.mxu1 %v11184_v9 }
 0x66b   : > { %6689 = vmatpush3.msra.mxu1 %v4843_v32  ;;  %v4996_v32 = vld [vmem:[%s10874_s9 + $0x28] sm:$0xff] }
 0x66c   : > { %6690 = vmatprep.subr.mxu1 %v11184_v9 }
 0x66d   : > { %6691 = vmatpush3.msra.mxu1 %v4838_v20 }
 0x66e   : > { %6692 = vmatprep.subr.mxu1 %v11184_v9 }
 0x66f   : > { %6693 = vmatpush3.msra.mxu1 %v4833_v36  ;;  %v4997_v36 = vld [vmem:[%s10874_s9 + $0x30] sm:$0xff] }
 0x670   : > { %6694 = vmatprep.subr.mxu1 %v11184_v9 }
 0x671   : > { %6695 = vmatpush3.msra.mxu1 %v4828_v53 }
 0x672   : > { %6696 = vmatprep.subr.mxu1 %v11184_v9 }
 0x673   : > { %6697 = vmatpush3.msra.mxu1 %v4823_v63  ;;  %v4998_v63 = vld [vmem:[%s10874_s9 + $0x38] sm:$0xff] }
 0x674   : > { %6698 = vmatprep.subr.mxu1 %v11184_v9 }
 0x675   : > { %6699 = vmatpush3.msra.mxu1 %v4818_v39 }
 0x676   : > { %6700 = vmatprep.subr.mxu1 %v11184_v9 }
 0x677   : > { %6701 = vmatpush3.msra.mxu1 %v4813_v56 }
 0x678   : > { %6702 = vmatprep.subr.mxu1 %v11184_v9 }
 0x679   : > { %6703 = vmatpush3.msra.mxu1 %v4808_v33 }
 0x67a   : > { %6705 = vmatmul.mubr.msk.f32.vlgmr.msra.gmra.mxu1 %vm4882_vm9, %v4877_v22  ;;  %6719 = vmatprep.subr.mxu1 %v11184_v9  ;;  %v6453_v22 = vld [vmem:[%s10874_s9 + $0x170] sm:$0xff] }
 0x67b   : > { %6707 = vmatprep.mubr.msk.f32.mxu1 %vm7297_vm8, %v11184_v9  ;;  %6720 = vmatpush3.msra.mxu1 %v6406_v57  ;;  %v6441_v57 = vld [vmem:[%s10874_s9 + $0x138] sm:$0xff] }
 0x67c   : > { %6721 = vmatprep.subr.mxu1 %v11184_v9 }
 0x67d   : > { %6722 = vmatpush3.msra.mxu1 %v6405_v27 }
 0x67e   : > { %6708 = vmatmul.mubr.msk.f32.gmra.mxu1 %vm4882_vm9, %v4878_v10  ;;  %6723 = vmatprep.subr.mxu1 %v11184_v9  ;;  %v6440_v10 = vld [vmem:[%s10874_s9 + $0x130] sm:$0xff] }
 0x67f   : > { %6710 = vmatprep.mubr.msk.f32.mxu1 %vm7297_vm8, %v11184_v9  ;;  %6724 = vmatpush3.msra.mxu1 %v6404_v62  ;;  %v6439_v62 = vld [vmem:[%s10874_s9 + $0x128] sm:$0xff] }
 0x680   : > { %6725 = vmatprep.subr.mxu1 %v11184_v9 }
 0x681   : > { %6726 = vmatpush3.msra.mxu1 %v6403_v50  ;;  %v6452_v50 = vld [vmem:[%s10874_s9 + $0x168] sm:$0xff] }
 0x682   : > { %6711 = vmatmul.mubr.msk.f32.gmra.mxu1 %vm4882_vm9, %v4879_v38  ;;  %6727 = vmatprep.subr.mxu1 %v11184_v9  ;;  %v6438_v38 = vld [vmem:[%s10874_s9 + $0x120] sm:$0xff] }
 0x683   : > { %6713 = vmatprep.mubr.msk.f32.mxu1 %vm7297_vm8, %v11184_v9  ;;  %6728 = vmatpush3.msra.mxu1 %v6402_v4 }
 0x684   : > { %6729 = vmatprep.subr.mxu1 %v11184_v9 }
 0x685   : > { %6730 = vmatpush3.msra.mxu1 %v6401_v28  ;;  %v6437_v28 = vld [vmem:[%s10874_s9 + $0x118] sm:$0xff] }
 0x686   : > { %6714 = vmatmul.mubr.msk.f32.gmra.mxu1 %vm4882_vm9, %v4880_v18  ;;  %6731 = vmatprep.subr.mxu1 %v11184_v9  ;;  %v6436_v18 = vld [vmem:[%s10874_s9 + $0x110] sm:$0xff] }
 0x687   : > { %6716 = vmatprep.mubr.msk.f32.mxu1 %vm7297_vm8, %v11184_v9  ;;  %6732 = vmatpush3.msra.mxu1 %v6400_v23 }
 0x688   : > { %6733 = vmatprep.subr.mxu1 %v11184_v9 }
 0x689   : > { %6734 = vmatpush3.msra.mxu1 %v6399_v44 }
 0x68a   : > { %6717 = vmatmul.mubr.msk.f32.gmra.mxu1 %vm4882_vm9, %v4881_v19  ;;  %6735 = vmatprep.subr.mxu1 %v11184_v9  ;;  %v6451_v19 = vld [vmem:[%s10874_s9 + $0x160] sm:$0xff] }
 0x68b   : > { %6739 = vmatprep.mubr.msk.f32.mxu1 %vm7297_vm8, %v11184_v9  ;;  %6736 = vmatpush3.msra.mxu1 %v6398_v54 }
 0x68c   : > { %6737 = vmatprep.subr.mxu1 %v11184_v9 }
 0x68d   : > { %6738 = vmatpush3.msra.mxu1 %v6397_v29 }
 0x68e   : > { %6754 = vmatprep.subr.mxu1 %v11184_v9 }
 0x73a   : > { %v10455_v15 = vpop.f32.mrf.mxu1 }
 0x73b   : > { %v5017_v5 = vrot.slane %v10455_v15, 1  ;;  %v5238_v14 = vrot.slane %v10455_v15, 2  ;;  %v5363_v44 = vrot.slane %v10455_v15, 3 }
 0x73c   : > { %v6706_v47 = vpop.f32.mrf.mxu1 }
 0x73d   : > { %v5488_v47 = vrot.slane %v10455_v15, 4 }
 0x73e   : > { %v10457_v35 = vpop.f32.mrf.mxu1 }
 0x73f   : > { %v5018_v6 = vrot.slane %v10457_v35, 1  ;;  %v5239_v13 = vrot.slane %v10457_v35, 2  ;;  %v5364_v23 = vrot.slane %v10457_v35, 3  ;;  %v5489_v54 = vrot.slane %v10457_v35, 4 }
 0x740   : > { %v6709_v11 = vpop.f32.mrf.mxu1 }
 0x741   : > { %v5019_v52 = vsel %vm603_vm0, %v5017_v5, %v5018_v6  ;;  %v5240_v33 = vsel %vm1319_vm3, %v5238_v14, %v5239_v13  ;;  %v5365_v29 = vsel %vm1777_vm2, %v5363_v44, %v5364_v23  ;;  %v5490_v5 = vsel %vm2235_vm4, %v5488_v47, %v5489_v54 }
 0x742   : > { %v10471_v56 = vpop.f32.mrf.mxu1  ;;  %6740 = vmatmul.mubr.msk.f32.vlgmr.msra.gmra.mxu1 %vm5026_vm10, %v5019_v52  ;;  %6810 = vmatmul.mubr.msk.f32.vlgmr.msra.gmra.mxu0 %vm5026_vm10, %v5240_v33 }
 0x743   : > { %v5020_v39 = vrot.slane %v10471_v56, 1  ;;  %6755 = vmatpush3.msra.mxu1 %v5000_v16  ;;  %6742 = vmatprep.mubr.msk.f32.mxu1 %vm7297_vm8, %v11184_v9  ;;  %v5241_v43 = vrot.slane %v10471_v56, 2  ;;  %v5366_v48 = vrot.slane %v10471_v56, 3 }
 0x744   : > { %v6712_v37 = vpop.f32.mrf.mxu1  ;;  %6756 = vmatprep.subr.mxu1 %v11184_v9  ;;  %6860 = vmatpush3.msra.mxu0 %v6456_v55 }
 0x745   : > { %6757 = vmatpush3.msra.mxu1 %v4999_v31  ;;  %v5021_v53 = vsel %vm603_vm0, %v5018_v6, %v5020_v39  ;;  %6861 = vmatprep.subr.mxu0 %v11184_v9  ;;  %v5242_v41 = vsel %vm1319_vm3, %v5239_v13, %v5241_v43  ;;  %v5711_v31 = vld [vmem:[%s10877_s12 + $0x70] sm:$0xff]  ;;  %v5709_v37 = vld [vmem:[%s10877_s12 + $0x60] sm:$0xff] }
 0x746   : > { %v10488_v3 = vpop.f32.mrf.mxu1  ;;  %6743 = vmatmul.mubr.msk.f32.gmra.mxu1 %vm5026_vm10, %v5021_v53  ;;  %6758 = vmatprep.subr.mxu1 %v11184_v9  ;;  %v5706_v53 = vld [vmem:[%s10877_s12 + $0x48] sm:$0xff] }
 0x747   : > { %v5022_v20 = vrot.slane %v10488_v3, 1  ;;  %6759 = vmatpush3.msra.mxu1 %v4998_v63  ;;  %6745 = vmatprep.mubr.msk.f32.mxu1 %vm7297_vm8, %v11184_v9  ;;  %v5243_v51 = vrot.slane %v10488_v3, 2  ;;  %v5368_v14 = vrot.slane %v10488_v3, 3  ;;  %v5493_v6 = vrot.slane %v10488_v3, 4  ;;  %v5708_v63 = vld [vmem:[%s10877_s12 + $0x58] sm:$0xff] }
 0x748   : > { %v6715_v60 = vpop.f32.mrf.mxu1  ;;  %6760 = vmatprep.subr.mxu1 %v11184_v9  ;;  %6812 = vmatprep.mubr.msk.f32.mxu0 %vm7297_vm8, %v11184_v9 }
 0x749   : > { %6761 = vmatpush3.msra.mxu1 %v4997_v36  ;;  %v5023_v42 = vsel %vm603_vm0, %v5020_v39, %v5022_v20  ;;  %6862 = vmatpush3.msra.mxu0 %v6455_v1  ;;  %v5244_v27 = vsel %vm1319_vm3, %v5241_v43, %v5243_v51  ;;  %v5369_v16 = vsel %vm1777_vm2, %v5366_v48, %v5368_v14  ;;  %v5710_v39 = vld [vmem:[%s10877_s12 + $0x68] sm:$0xff]  ;;  %v5707_v43 = vld [vmem:[%s10877_s12 + $0x50] sm:$0xff]  ;;  %v5704_v36 = vld [vmem:[%s10877_s12 + $0x38] sm:$0xff] }
 0x74a   : > { %v10509_v46 = vpop.f32.mrf.mxu1  ;;  %6746 = vmatmul.mubr.msk.f32.gmra.mxu1 %vm5026_vm10, %v5023_v42  ;;  %6762 = vmatprep.subr.mxu1 %v11184_v9  ;;  %v5703_v1 = vld [vmem:[%s10877_s12 + $0x30] sm:$0xff]  ;;  %v5701_v60 = vld [vmem:[%s10877_s12 + $0x20] sm:$0xff] }
 0x74b   : > { %v5024_v8 = vrot.slane %v10509_v46, 1  ;;  %6763 = vmatpush3.msra.mxu1 %v4996_v32  ;;  %6748 = vmatprep.mubr.msk.f32.mxu1 %vm7297_vm8, %v11184_v9  ;;  %v5245_v4 = vrot.slane %v10509_v46, 2  ;;  %v5370_v11 = vrot.slane %v10509_v46, 3  ;;  %v5495_v52 = vrot.slane %v10509_v46, 4  ;;  %v5700_v32 = vld [vmem:[%s10877_s12 + $0x18] sm:$0xff]  ;;  %v5699_v42 = vld [vmem:[%s10877_s12 + $0x10] sm:$0xff] }
 0x74c   : > { %6764 = vmatprep.subr.mxu1 %v11184_v9  ;;  %6813 = vmatmul.mubr.msk.f32.gmra.mxu0 %vm5026_vm10, %v5242_v41  ;;  %v6718_v2 = vpop.f32.mrf.mxu1  ;;  %v5698_v41 = vld [vmem:[%s10877_s12 + $0x8] sm:$0xff] }
 0x74d   : > { %6765 = vmatpush3.msra.mxu1 %v4995_v0  ;;  %v5025_v49 = vsel %vm603_vm0, %v5022_v20, %v5024_v8  ;;  %6863 = vmatprep.subr.mxu0 %v11184_v9  ;;  %v5246_v40 = vsel %vm1319_vm3, %v5243_v51, %v5245_v4  ;;  %v5371_v55 = vsel %vm1777_vm2, %v5368_v14, %v5370_v11  ;;  %v5702_v20 = vld [vmem:[%s10877_s12 + $0x28] sm:$0xff] }
 0x74e   : > { %6749 = vmatmul.mubr.msk.f32.gmra.mxu1 %vm5026_vm10, %v5025_v49  ;;  %6766 = vmatprep.subr.mxu1 %v11184_v9 }
 0x74f   : > { %6767 = vmatpush3.msra.mxu1 %v4994_v17  ;;  %6751 = vmatprep.mubr.msk.f32.mxu1 %vm7297_vm8, %v11184_v9 }
 0x750   : > { %6768 = vmatprep.subr.mxu1 %v11184_v9  ;;  %6864 = vmatpush3.msra.mxu0 %v6454_v26 }
 0x751   : > { %6769 = vmatpush3.msra.mxu1 %v4993_v25  ;;  %6865 = vmatprep.subr.mxu0 %v11184_v9 }
 0x752   : > { %6752 = vmatmul.mubr.msk.f32.gmra.mxu1 %vm5026_vm10, %v5024_v8  ;;  %6770 = vmatprep.subr.mxu1 %v11184_v9 }
 0x753   : > { %6771 = vmatpush3.msra.mxu1 %v4992_v59  ;;  %6774 = vmatprep.mubr.msk.f32.mxu1 %vm7297_vm8, %v11184_v9 }
 0x754   : > { %6772 = vmatprep.subr.mxu1 %v11184_v9  ;;  %6815 = vmatprep.mubr.msk.f32.mxu0 %vm7297_vm8, %v11184_v9 }
 0x755   : > { %6773 = vmatpush3.msra.mxu1 %v4991_v34  ;;  %6866 = vmatpush3.msra.mxu0 %v6453_v22 }
 0x756   : > { %6775 = vmatmul.mubr.msk.f32.vlgmr.msra.gmra.mxu1 %vm5026_vm10, %v10455_v15  ;;  %6824 = vmatprep.subr.mxu1 %v11184_v9  ;;  %v5367_v15 = vsel %vm1777_vm2, %v5364_v23, %v5366_v48 }
 0x757   : > { %6825 = vmatpush3.msra.mxu1 %v6441_v57  ;;  %6777 = vmatprep.mubr.msk.f32.mxu1 %vm7297_vm8, %v11184_v9 }
 0x758   : > { %6826 = vmatprep.subr.mxu1 %v11184_v9  ;;  %6816 = vmatmul.mubr.msk.f32.gmra.mxu0 %vm5026_vm10, %v5244_v27 }
 0x759   : > { %6827 = vmatpush3.msra.mxu1 %v6440_v10  ;;  %6867 = vmatprep.subr.mxu0 %v11184_v9 }
 0x75a   : > { %6778 = vmatmul.mubr.msk.f32.gmra.mxu1 %vm5026_vm10, %v10457_v35  ;;  %6828 = vmatprep.subr.mxu1 %v11184_v9  ;;  %v5491_v35 = vrot.slane %v10471_v56, 4 }
 0x75b   : > { %6829 = vmatpush3.msra.mxu1 %v6439_v62  ;;  %6780 = vmatprep.mubr.msk.f32.mxu1 %vm7297_vm8, %v11184_v9 }
 0x75c   : > { %6830 = vmatprep.subr.mxu1 %v11184_v9  ;;  %6868 = vmatpush3.msra.mxu0 %v6452_v50  ;;  %v5492_v13 = vsel %vm2235_vm4, %v5489_v54, %v5491_v35  ;;  %v5494_v33 = vsel %vm2235_vm4, %v5491_v35, %v5493_v6 }
 0x75d   : > { %6831 = vmatpush3.msra.mxu1 %v6438_v38  ;;  %6869 = vmatprep.subr.mxu0 %v11184_v9 }
 0x75e   : > { %6781 = vmatmul.mubr.msk.f32.gmra.mxu1 %vm5026_vm10, %v10471_v56  ;;  %6832 = vmatprep.subr.mxu1 %v11184_v9  ;;  %v5496_v56 = vsel %vm2235_vm4, %v5493_v6, %v5495_v52 }
 0x75f   : > { %6833 = vmatpush3.msra.mxu1 %v6437_v28  ;;  %6783 = vmatprep.mubr.msk.f32.mxu1 %vm7297_vm8, %v11184_v9 }
 0x760   : > { %6834 = vmatprep.subr.mxu1 %v11184_v9  ;;  %6818 = vmatprep.mubr.msk.f32.mxu0 %vm7297_vm8, %v11184_v9 }
 0x761   : > { %6835 = vmatpush3.msra.mxu1 %v6436_v18  ;;  %6870 = vmatpush3.msra.mxu0 %v6451_v19 }
 0x762   : > { %6784 = vmatmul.mubr.msk.f32.gmra.mxu1 %vm5026_vm10, %v10488_v3  ;;  %6836 = vmatprep.subr.mxu1 %v11184_v9  ;;  %v5705_v3 = vld [vmem:[%s10877_s12 + $0x40] sm:$0xff] }
 0x763   : > { %6837 = vmatpush3.msra.mxu1 %v6435_v45  ;;  %6819 = vmatmul.mubr.msk.f32.gmra.mxu0 %vm5026_vm10, %v5246_v40 }
 0x764   : > { %6838 = vmatprep.subr.mxu1 %v11184_v9  ;;  %6871 = vmatprep.subr.mxu0 %v11184_v9 }
 0x765   : > { %6786 = vmatprep.mubr.msk.f32.mxu1 %vm7297_vm8, %v11184_v9  ;;  %6839 = vmatpush3.msra.mxu1 %v6434_v24 }
 0x766   : > { %6872 = vmatpush3.msra.mxu0 %v6450_v30  ;;  %6787 = vmatmul.mubr.msk.f32.gmra.mxu1 %vm5026_vm10, %v10509_v46 }
 0x767   : > { %6840 = vmatprep.subr.mxu1 %v11184_v9  ;;  %6873 = vmatprep.subr.mxu0 %v11184_v9 }
 0x768   : > { %6821 = vmatprep.mubr.msk.f32.mxu0 %vm7297_vm8, %v11184_v9  ;;  %6841 = vmatpush3.msra.mxu1 %v6433_v58 }
 0x769   : > { %6874 = vmatpush3.msra.mxu0 %v6449_v12  ;;  %6842 = vmatprep.subr.mxu1 %v11184_v9 }
 0x76a   : > { %6822 = vmatmul.mubr.msk.f32.gmra.mxu0 %vm5026_vm10, %v5245_v4  ;;  %6875 = vmatprep.subr.mxu0 %v11184_v9 }
 0x76b   : > { %6843 = vmatpush3.msra.mxu1 %v6432_v21  ;;  %6844 = vmatprep.mubr.msk.f32.mxu1 %vm7297_vm8, %v11184_v9 }
 0x76c   : > { %6876 = vmatpush3.msra.mxu0 %v6448_v61  ;;  %6845 = vmatmul.mubr.msk.f32.vlgmr.msra.gmra.mxu1 %vm5026_vm10, %v5365_v29 }
 0x76d   : > { %6877 = vmatprep.subr.mxu0 %v11184_v9  ;;  %6879 = vmatprep.mubr.msk.f32.mxu0 %vm7297_vm8, %v11184_v9 }
 0x76e   : > { %6878 = vmatpush3.msra.mxu0 %v6447_v7  ;;  %6847 = vmatprep.mubr.msk.f32.mxu1 %vm7297_vm8, %v11184_v9 }
 0x76f   : > { %6880 = vmatmul.mubr.msk.f32.vlgmr.msra.gmra.mxu0 %vm5026_vm10, %v5490_v5  ;;  %6894 = vmatprep.subr.mxu1 %v11184_v9 }
 0x770   : > { %6848 = vmatmul.mubr.msk.f32.gmra.mxu1 %vm5026_vm10, %v5367_v15  ;;  %6882 = vmatprep.mubr.msk.f32.mxu0 %vm7297_vm8, %v11184_v9 }
 0x771   : > { %6850 = vmatprep.mubr.msk.f32.mxu1 %vm7297_vm8, %v11184_v9  ;;  %6907 = vmatprep.subr.mxu0 %v11184_v9 }
 0x772   : > { %6908 = vmatpush3.msra.mxu0 %v5711_v31 }
 0x773   : > { %6883 = vmatmul.mubr.msk.f32.gmra.mxu0 %vm5026_vm10, %v5492_v13  ;;  %6909 = vmatprep.subr.mxu0 %v11184_v9 }
 0x774   : > { %6851 = vmatmul.mubr.msk.f32.gmra.mxu1 %vm5026_vm10, %v5369_v16  ;;  %6885 = vmatprep.mubr.msk.f32.mxu0 %vm7297_vm8, %v11184_v9 }
 0x775   : > { %6853 = vmatprep.mubr.msk.f32.mxu1 %vm7297_vm8, %v11184_v9  ;;  %6910 = vmatpush3.msra.mxu0 %v5710_v39 }
 0x776   : > { %6911 = vmatprep.subr.mxu0 %v11184_v9 }
 0x777   : > { %6886 = vmatmul.mubr.msk.f32.gmra.mxu0 %vm5026_vm10, %v5494_v33 }
 0x778   : > { %6854 = vmatmul.mubr.msk.f32.gmra.mxu1 %vm5026_vm10, %v5371_v55  ;;  %6888 = vmatprep.mubr.msk.f32.mxu0 %vm7297_vm8, %v11184_v9 }
 0x779   : > { %6856 = vmatprep.mubr.msk.f32.mxu1 %vm7297_vm8, %v11184_v9  ;;  %6912 = vmatpush3.msra.mxu0 %v5709_v37 }
 0x77a   : > { %6913 = vmatprep.subr.mxu0 %v11184_v9 }
 0x77b   : > { %6889 = vmatmul.mubr.msk.f32.gmra.mxu0 %vm5026_vm10, %v5496_v56 }
 0x77c   : > { %6857 = vmatmul.mubr.msk.f32.gmra.mxu1 %vm5026_vm10, %v5370_v11  ;;  %6891 = vmatprep.mubr.msk.f32.mxu0 %vm7297_vm8, %v11184_v9 }
 0x77d   : > { %6904 = vmatprep.mubr.msk.f32.mxu1 %vm7297_vm8, %v11184_v9  ;;  %6914 = vmatpush3.msra.mxu0 %v5708_v63 }
 0x77e   : > { %6915 = vmatprep.subr.mxu0 %v11184_v9 }
 0x77f   : > { %6892 = vmatmul.mubr.msk.f32.gmra.mxu0 %vm5026_vm10, %v5495_v52 }
 0x780   : > { %6937 = vmatprep.mubr.msk.f32.mxu0 %vm7297_vm8, %v11184_v9  ;;  %6916 = vmatpush3.msra.mxu0 %v5707_v43 }
 0x781   : > { %6917 = vmatprep.subr.mxu0 %v11184_v9 }
 0x782   : > { %6918 = vmatpush3.msra.mxu0 %v5706_v53 }
 0x783   : > { %6919 = vmatprep.subr.mxu0 %v11184_v9 }
 0x784   : > { %6920 = vmatpush3.msra.mxu0 %v5705_v3 }
 0x785   : > { %6921 = vmatprep.subr.mxu0 %v11184_v9 }
 0x786   : > { %6922 = vmatpush3.msra.mxu0 %v5704_v36 }
 0x787   : > { %6923 = vmatprep.subr.mxu0 %v11184_v9 }
 0x788   : > { %6924 = vmatpush3.msra.mxu0 %v5703_v1 }
 0x789   : > { %6925 = vmatprep.subr.mxu0 %v11184_v9 }
 0x78a   : > { %6926 = vmatpush3.msra.mxu0 %v5702_v20 }
 0x78b   : > { %6927 = vmatprep.subr.mxu0 %v11184_v9 }
 0x78c   : > { %6928 = vmatpush3.msra.mxu0 %v5701_v60 }
 0x78d   : > { %6929 = vmatprep.subr.mxu0 %v11184_v9 }
 0x78e   : > { %6930 = vmatpush3.msra.mxu0 %v5700_v32 }
 0x78f   : > { %6931 = vmatprep.subr.mxu0 %v11184_v9 }
 0x790   : > { %6932 = vmatpush3.msra.mxu0 %v5699_v42 }
 0x791   : > { %6933 = vmatprep.subr.mxu0 %v11184_v9 }
 0x792   : > { %6934 = vmatpush3.msra.mxu0 %v5698_v41 }
 0x793   : > { %6935 = vmatprep.subr.mxu0 %v11184_v9 }
 0x802   : > { %v5103_v46 = vpop.f32.mrf.mxu1  ;;  %v5323_v0 = vpop.f32.mrf.mxu0 }
 0x804   : > { %v6741_v8 = vpop.f32.mrf.mxu1  ;;  %v6811_v17 = vpop.f32.mrf.mxu0 }
 0x806   : > { %v5108_v2 = vpop.f32.mrf.mxu1 }
 0x808   : > { %v6744_v49 = vpop.f32.mrf.mxu1 }
 0x80a   : > { %v5113_v26 = vpop.f32.mrf.mxu1 }
 0x80c   : > { %v6747_v25 = vpop.f32.mrf.mxu1  ;;  %v5328_v59 = vpop.f32.mrf.mxu0 }
 0x80e   : > { %v5118_v51 = vpop.f32.mrf.mxu1  ;;  %v6814_v34 = vpop.f32.mrf.mxu0 }
 0x810   : > { %v6750_v22 = vpop.f32.mrf.mxu1 }
 0x812   : > { %v5123_v57 = vpop.f32.mrf.mxu1 }
 0x814   : > { %v6753_v27 = vpop.f32.mrf.mxu1 }
 0x816   : > { %v5203_v10 = vpop.f32.mrf.mxu1 }
 0x817   : > { %v5204_v56 = vadd.f32 %v5203_v10, %v5103_v46  ;;  %v6462_v46 = vld [vmem:[%s10875_s10] ss:$0 sm:$0xff] }
 0x818   : > { %v6776_v62 = vpop.f32.mrf.mxu1  ;;  %v5333_v50 = vpop.f32.mrf.mxu0 }
 0x819   : > { %v5347_v60 = vadd.f32 %v5323_v0, %v5204_v56 }
 0x81a   : > { %v5208_v38 = vpop.f32.mrf.mxu1  ;;  %v6817_v4 = vpop.f32.mrf.mxu0 }
 0x81b   : > { %v5209_v16 = vadd.f32 %v5208_v38, %v5108_v2  ;;  %v5619_v38 = vld [vmem:[%s10876_s11] sm:$0xff] }
 0x81c   : > { %v6779_v28 = vpop.f32.mrf.mxu1 }
 0x81d   : > { %v5348_v53 = vadd.f32 %v5328_v59, %v5209_v16  ;;  %v5697_v28 = vld [vmem:[%s10877_s12] sm:$0xff] }
 0x81e   : > { %v5213_v18 = vpop.f32.mrf.mxu1  ;;  %6936 = vmatpush3.msra.mxu0 %v5697_v28 }
 0x81f   : > { %v5214_v15 = vadd.f32 %v5213_v18, %v5113_v26  ;;  %v5804_v18 = vld [vmem:[%s10879_s14 + $0x50] sm:$0xf] }
 0x820   : > { %v6782_v19 = vpop.f32.mrf.mxu1 }
 0x821   : > { %v5349_v31 = vadd.f32 %v5333_v50, %v5214_v15  ;;  %v5803_v19 = vld [vmem:[%s10879_s14 + $0x48] sm:$0xff] }
 0x822   : > { %v5218_v45 = vpop.f32.mrf.mxu1 }
 0x823   : > { %v5338_v40 = vpop.f32.mrf.mxu0  ;;  %v5219_v35 = vadd.f32 %v5218_v45, %v5118_v51 }
 0x824   : > { %v6785_v24 = vpop.f32.mrf.mxu1 }
 0x825   : > { %v6820_v30 = vpop.f32.mrf.mxu0  ;;  %v5350_v52 = vadd.f32 %v5338_v40, %v5219_v35  ;;  %v5802_v24 = vld [vmem:[%s10879_s14 + $0x40] sm:$0xff] }
 0x826   : > { %v5223_v58 = vpop.f32.mrf.mxu1  ;;  %v5801_v30 = vld [vmem:[%s10879_s14 + $0x38] sm:$0xff] }
 0x827   : > { %v5224_v13 = vadd.f32 %v5223_v58, %v5123_v57  ;;  %v5800_v58 = vld [vmem:[%s10879_s14 + $0x30] sm:$0xff] }
 0x828   : > { %v6788_v12 = vpop.f32.mrf.mxu1 }
 0x829   : > { %v5799_v12 = vld [vmem:[%s10879_s14 + $0x28] sm:$0xff] }
 0x82a   : > { %v5343_v23 = vpop.f32.mrf.mxu0 }
 0x82b   : > { %v5351_v63 = vadd.f32 %v5343_v23, %v5224_v13  ;;  %v5798_v23 = vld [vmem:[%s10879_s14 + $0x20] sm:$0xff] }
 0x82c   : > { %v6823_v21 = vpop.f32.mrf.mxu0  ;;  %v5448_v44 = vpop.f32.mrf.mxu1 }
 0x82d   : > { %v5472_v17 = vadd.f32 %v5448_v44, %v5347_v60  ;;  %v5797_v21 = vld [vmem:[%s10879_s14 + $0x18] sm:$0xff]  ;;  %v5796_v44 = vld [vmem:[%s10879_s14 + $0x10] sm:$0xff] }
 0x82e   : > { %v6846_v61 = vpop.f32.mrf.mxu1 }
 0x82f   : > { %v5573_v54 = vpop.f32.mrf.mxu0  ;;  %v5795_v61 = vld [vmem:[%s10879_s14 + $0x8] sm:$0xff] }
 0x830   : > { %v5453_v48 = vpop.f32.mrf.mxu1  ;;  %v5597_v34 = vadd.f32 %v5573_v54, %v5472_v17  ;;  %v5794_v54 = vld [vmem:[%s10879_s14] sm:$0xff] }
 0x831   : > { %v6881_v29 = vpop.f32.mrf.mxu0  ;;  %v5473_v32 = vadd.f32 %v5453_v48, %v5348_v53  ;;  %v6465_v48 = vld [vmem:[%s10878_s13] ss:$0 sm:$0xff] }
 0x832   : > { %v6849_v7 = vpop.f32.mrf.mxu1  ;;  %v5609_v0 = vadd.f32 %v6462_v46, %v5597_v34 }
 0x833   : > { %v5578_v47 = vpop.f32.mrf.mxu0 }
 0x834   : > { %v5458_v5 = vpop.f32.mrf.mxu1  ;;  %v5598_v25 = vadd.f32 %v5578_v47, %v5473_v32 }
 0x835   : > { %v6884_v14 = vpop.f32.mrf.mxu0  ;;  %v5474_v3 = vadd.f32 %v5458_v5, %v5349_v31  ;;  %v6467_v5 = vld [vmem:[%s10880_s15] ss:$0 sm:$0xff] }
 0x836   : > { %v6852_v6 = vpop.f32.mrf.mxu1  ;;  %v5610_v57 = vadd.f32 %v6462_v46, %v5598_v25 }
 0x837   : > { %v5583_v11 = vpop.f32.mrf.mxu0 }
 0x838   : > { %v5463_v33 = vpop.f32.mrf.mxu1  ;;  %v5599_v2 = vadd.f32 %v5583_v11, %v5474_v3 }
 0x839   : > { %v6887_v55 = vpop.f32.mrf.mxu0  ;;  %v5475_v39 = vadd.f32 %v5463_v33, %v5350_v52 }
 0x83a   : > { %v6855_v37 = vpop.f32.mrf.mxu1  ;;  %v5611_v22 = vadd.f32 %v6462_v46, %v5599_v2 }
 0x83b   : > { %v5588_v43 = vpop.f32.mrf.mxu0 }
 0x83c   : > { %v5468_v36 = vpop.f32.mrf.mxu1  ;;  %v5600_v42 = vadd.f32 %v5588_v43, %v5475_v39 }
 0x83d   : > { %v5476_v1 = vadd.f32 %v5468_v36, %v5351_v63  ;;  %v6890_v20 = vpop.f32.mrf.mxu0 }
 0x83e   : > { %v6858_v41 = vpop.f32.mrf.mxu1  ;;  %v5612_v51 = vadd.f32 %v6462_v46, %v5600_v42 }
 0x83f   : > { %v5593_v8 = vpop.f32.mrf.mxu0 }
 0x840   : > { %v5601_v49 = vadd.f32 %v5593_v8, %v5476_v1 }
 0x841   : > { %v6893_v26 = vpop.f32.mrf.mxu0 }
 0x842   : > { %v5613_v59 = vadd.f32 %v6462_v46, %v5601_v49 }
 0x844   : > { %7190 = vtanh.f32 %v5613_v59 }
 0x845   : > { %7192 = vtanh.f32 %v5612_v51 }
 0x846   : > { %7194 = vtanh.f32 %v5611_v22 }
 0x847   : > { %7196 = vtanh.f32 %v5610_v57 }
 0x848   : > { %7198 = vtanh.f32 %v5609_v0 }
 0x851   : > { %v7191_v27 = vpop.eup %7190 }
 0x852   : > { %6895 = vmatpush3.msk.msra.mxu1 %vm2235_vm4, %v7191_v27  ;;  %v7193_v10 = vpop.eup %7192 }
 0x853   : > { %6896 = vmatprep.subr.mxu1 %v11184_v9  ;;  %v7195_v62 = vpop.eup %7194 }
 0x854   : > { %6897 = vmatpush3.msra.mxu1 %v7193_v10  ;;  %v7197_v50 = vpop.eup %7196 }
 0x855   : > { %6898 = vmatprep.subr.mxu1 %v11184_v9  ;;  %v7199_v4 = vpop.eup %7198 }
 0x856   : > { %6899 = vmatpush3.msra.mxu1 %v7195_v62 }
 0x857   : > { %6900 = vmatprep.subr.mxu1 %v11184_v9 }
 0x858   : > { %6901 = vmatpush3.msra.mxu1 %v7197_v50 }
 0x859   : > { %6902 = vmatprep.subr.mxu1 %v11184_v9 }
 0x85a   : > { %6903 = vmatpush3.msra.mxu1 %v7199_v4 }
 0x85b   : > { %6905 = vmatmul.mubr.msk.f32.vlgmr.msra.gmra.mxu1 %vm5620_vm11, %v5619_v38  ;;  %6940 = vmatprep.subr.mxu1 %v11184_v9 }
 0x85c   : > { %6962 = vmatprep.mubr.msk.f32.mxu1 %vm7297_vm8, %v11184_v9  ;;  %6941 = vmatpush3.msk.msra.mxu1 %vm2235_vm4, %v5804_v18 }
 0x85d   : > { %6942 = vmatprep.subr.mxu1 %v11184_v9 }
 0x85e   : > { %6943 = vmatpush3.msra.mxu1 %v5803_v19 }
 0x85f   : > { %6944 = vmatprep.subr.mxu1 %v11184_v9 }
 0x860   : > { %6945 = vmatpush3.msra.mxu1 %v5802_v24 }
 0x861   : > { %6946 = vmatprep.subr.mxu1 %v11184_v9 }
 0x862   : > { %6947 = vmatpush3.msra.mxu1 %v5801_v30 }
 0x863   : > { %6948 = vmatprep.subr.mxu1 %v11184_v9 }
 0x864   : > { %6949 = vmatpush3.msra.mxu1 %v5800_v58 }
 0x865   : > { %6950 = vmatprep.subr.mxu1 %v11184_v9 }
 0x866   : > { %6951 = vmatpush3.msra.mxu1 %v5799_v12 }
 0x867   : > { %6952 = vmatprep.subr.mxu1 %v11184_v9 }
 0x868   : > { %6953 = vmatpush3.msra.mxu1 %v5798_v23 }
 0x869   : > { %6954 = vmatprep.subr.mxu1 %v11184_v9 }
 0x86a   : > { %6955 = vmatpush3.msra.mxu1 %v5797_v21 }
 0x86b   : > { %6956 = vmatprep.subr.mxu1 %v11184_v9 }
 0x86c   : > { %6957 = vmatpush3.msra.mxu1 %v5796_v44 }
 0x86d   : > { %6958 = vmatprep.subr.mxu1 %v11184_v9 }
 0x86e   : > { %6959 = vmatpush3.msra.mxu1 %v5795_v61 }
 0x86f   : > { %6960 = vmatprep.subr.mxu1 %v11184_v9 }
 0x870   : > { %6961 = vmatpush3.msra.mxu1 %v5794_v54 }
 0x91b   : > { %v5693_v45 = vpop.f32.mrf.mxu1 }
 0x91c   : > { %6938 = vmatmul.mubr.msk.f32.vlgmr.msra.gmra.mxu0 %vm5719_vm12, %v5693_v45 }
 0x91d   : > { %v6906_v40 = vpop.f32.mrf.mxu1 }
 0x9dc   : > { %v5789_v29 = vpop.f32.mrf.mxu0 }
 0x9dd   : > { %v5790_v7 = vadd.f32 %v6465_v48, %v5789_v29 }
 0x9de   : > { %v6939_v47 = vpop.f32.mrf.mxu0 }
 0x9df   : > { %7200 = vtanh.f32 %v5790_v7 }
 0x9ec   : > { %v7201_v35 = vpop.eup %7200 }
 0x9ed   : > { %6963 = vmatmul.mubr.msk.f32.vlgmr.msra.gmra.mxu1 %vm3462_vm7, %v7201_v35 }
 0xaad   : > { %v5884_v9 = vpop.f32.mrf.mxu1 }
 0xaae   : > { %v5885_v14 = vadd.f32 %v6467_v5, %v5884_v9 }
 0xaaf   : > { %v6964_v15 = vpop.f32.mrf.mxu1 }
 0xab0   : > { %5889 = vst.msk [vmem:[%s515_s30] sm:$0xff] %vm5888_vm13, %v5885_v14 }
 0xab1   : > { %7247 = shalt.err (!%p7244_p3)
}
 0xab2   : > { %s7248_s27 = scalar_lea.hbm %s10830_s19, 128  ;;  %s7252_s30 = scalar_lea.hbm %s10881_s16, 256 }
 0xab3   : > { %p7249_p4 = scmp.ne.s32.totalorder %s10830_s19, %s7248_s27  ;;  %p7253_p9 = scmp.lt.s32.totalorder %s10830_s19, %s10881_s16 }
 0xab4   : > { %p7254_p10 = scmp.lt.s32.totalorder %s7252_s30, %s7248_s27 }
 0xab5   : > { %p7250_p7 = pnand %p7249_p4, %p7422_p5 }
 0xab6   : > { %p7255_p11 = por %p7254_p10, %p7253_p9 }
 0xab7   : > { %p7251_p8 = pneg %p7250_p7 }
 0xab9   : > { %p7256_p12 = pnand %p7255_p11, %p7251_p8 }
 0xabb   : > { %7259 = shalt.err (!%p7256_p12)
}
 0xabc   : > { %6965 = dma.vmem_to_hbm [thread:$0]  (%p7422_p5), %s5905_s21, 128, %s10830_s19, %s5891_s20  }
 0xabd PF: > { %s11185_s26 = sld [smem:[#allocation7_spill]] }
 0xabe   : > { %s11186_s25 = sld [smem:[#allocation5_spill]] }
 0xac3   : > { %p6971_p13 = scmp.ge.s32.totalorder %s11185_s26, 2 }
 0xac4   : > { %s5916_s23 = sand.u32 1, %s11186_s25  }
 0xac5   : > { %p6968_p0 = pnand %p6971_p13, %p7426_p6  ;;  %s5917_s28 = scalar_lea.sflag [#allocation3], %s5916_s23 }
 0xac7   : > { %p6969_p1 = pneg %p6968_p0 }
 0xac9   : > { %7277 = dma.done.wait (%p6969_p1), %s5917_s28, 128  }
 0xaca   : > { %7279 = vsyncadd (%p6969_p1), %s5917_s28, 4294967168  ;;  %s11188_s24 = sld [smem:[#allocation8_spill]]  ;;  %s11191_s21 = smov %s7286_s22 }
 0xacb   : > { %s11189_s27 = sld [smem:[#allocation6_spill]] }
 0xacc   : > { %s11190_s23 = sld [smem:[#allocation9_spill]] }
 0xad0   : > { %p26_p2 = scmp.ge.s32.totalorder %s11188_s24, 4  }
 0xad1   : > { %s11192_s22 = smov %s11189_s27 }
 0xad2   :  { %28 = sbr.rel (!%p26_p2) target bundleno = 5 (0x5), region = 131 }
 0xad7   :  { %5922 = vsyncpa [#allocation3], 1 }
 0xad8   :  { %5924 = vsyncpa [#allocation3 + $0x1], 1 }

</bundles_post_ra>
